<compile_context>
chip_gen: v7x
topology: tpu7x:2x2x1
jax: 0.10.0
libtpu: 0.0.40
codegen_flags: <defaults>
</compile_context>

<pallas_src>
import functools

import jax
import jax.numpy as jnp
import numpy as np
from jax.experimental import pallas as pl
from jax.experimental.pallas import tpu as pltpu

_EPS = 1e-5


def _round_up(x, m):
    return (x + m - 1) // m * m


def _vmem_limit_bytes():
    # v5e/v6e: 128 MiB physical -> 96 MiB scoped; v7x: 64 MiB -> 48 MiB.
    try:
        cap = int(pltpu.get_tpu_info().vmem_capacity_bytes)
    except Exception:
        cap = 64 << 20
    return int(min((cap * 3) // 4, 100 << 20))


# ----------------------------------------------------------------------------
# Kernel 1: fused decoder_input Linear + ConvTranspose2d(k, c1, 4, 1, 0) on the
# 1x1 spatial input + BatchNorm (batch stats) + ReLU.
# Output layout: (B, 16*c1p) == NHWC (B, 4, 4, c1p) flattened (lane dense,
# c1p is c1 padded to a multiple of 128 so the BN slices are lane aligned).
# ----------------------------------------------------------------------------
def _head_kernel(x_ref, wlin_ref, blin_ref, wt1_ref, g_ref, b_ref, o_ref,
                 *, c1p, n_stat, eps):
    x = x_ref[...]                                                # (B, Din) bf16
    h = jnp.dot(x, wlin_ref[...],
                preferred_element_type=jnp.float32) + blin_ref[...]
    y = jnp.dot(h.astype(jnp.bfloat16), wt1_ref[...],
                preferred_element_type=jnp.float32)               # (B, 16*c1p)

    s = jnp.zeros((1, c1p), jnp.float32)
    q = jnp.zeros((1, c1p), jnp.float32)
    for t in range(16):                       # lane-aligned slices (c1p % 128 == 0)
        blk = y[:, t * c1p:(t + 1) * c1p]
        s = s + jnp.sum(blk, axis=0, keepdims=True)
        q = q + jnp.sum(blk * blk, axis=0, keepdims=True)
    mean = s / n_stat
    var = jnp.maximum(q / n_stat - mean * mean, 0.0)
    scale = g_ref[...] * jax.lax.rsqrt(var + eps)
    shift = b_ref[...] - mean * scale
    for t in range(16):
        blk = y[:, t * c1p:(t + 1) * c1p]
        o_ref[:, t * c1p:(t + 1) * c1p] = jnp.maximum(
            blk * scale + shift, 0.0).astype(o_ref.dtype)


def fused_head(x, head, vmem_limit):
    B = x.shape[0]
    c1p = head["c1p"]
    kernel = functools.partial(_head_kernel, c1p=c1p,
                               n_stat=float(B * 16), eps=_EPS)
    y = pl.pallas_call(
        kernel,
        out_shape=jax.ShapeDtypeStruct((B, 16 * c1p), jnp.bfloat16),
        grid=(1,),
        in_specs=[
            pl.BlockSpec(x.shape, lambda i: (0, 0)),
            pl.BlockSpec(head["w_lin"].shape, lambda i: (0, 0)),
            pl.BlockSpec(head["b_lin"].shape, lambda i: (0, 0)),
            pl.BlockSpec(head["wt1"].shape, lambda i: (0, 0)),
            pl.BlockSpec(head["gamma"].shape, lambda i: (0, 0)),
            pl.BlockSpec(head["beta"].shape, lambda i: (0, 0)),
        ],
        out_specs=pl.BlockSpec((B, 16 * c1p), lambda i: (0, 0)),
        compiler_params=pltpu.CompilerParams(
            dimension_semantics=("arbitrary",),
            vmem_limit_bytes=vmem_limit),
    )(x, head["w_lin"], head["b_lin"], head["wt1"],
      head["gamma"], head["beta"])
    return y.reshape(B, 4, 4, c1p)                    # NHWC, 4x4


# ----------------------------------------------------------------------------
# Kernel 2: polyphase ConvTranspose2d(cin, cout, 4, stride=2, pad=1).
# Grid = (row-tiles, ry).  One fused MXU dot per step:
#   (tm, 9*cin) x (9*cin, 2*cp)  ->  (tm, 2*cp)   lanes = (rx, channel)
# Output array (B*H (padded), 2, W, 2*cp): the phase un-interleave to NHWC
# (B, 2H, 2W, cp) is a pure reshape afterwards.  BN layers additionally emit
# per-tile sum / sum-of-squares partials (second output).
# ----------------------------------------------------------------------------
def _store_rows(o_ref, val):
    """val (t_r*W, 2*cp) -> o_ref (t_r, 1, W, 2*cp)."""
    t_r, _, w, _ = o_ref.shape
    if w % 8 == 0:
        o_ref[...] = val.reshape(o_ref.shape)
    else:                         # tiny-W early layers: unrolled row stores
        for j in range(t_r):
            o_ref[j, 0, :, :] = val[j * w:(j + 1) * w, :]


def _convt_bn_kernel(xw_ref, wt_ref, o_ref, st_ref):
    k9 = xw_ref.shape[1]          # 9 * cin
    ry_id = pl.program_id(1)
    x = xw_ref[...]
    for ry in range(2):
        @pl.when(ry_id == ry)
        def _(ry=ry):
            acc = jnp.dot(x, wt_ref[ry * k9:(ry + 1) * k9, :],
                          preferred_element_type=jnp.float32)
            _store_rows(o_ref, acc)           # raw f32 conv output, written once
            s = jnp.sum(acc, axis=0, keepdims=True)
            q = jnp.sum(acc * acc, axis=0, keepdims=True)
            st_ref[...] = jnp.concatenate([s, q], axis=0).reshape(st_ref.shape)


def _convt_act_kernel(xw_ref, wt_ref, o_ref, *, act):
    k9 = xw_ref.shape[1]
    ry_id = pl.program_id(1)
    x = xw_ref[...]
    for ry in range(2):
        @pl.when(ry_id == ry)
        def _(ry=ry):
            acc = jnp.dot(x, wt_ref[ry * k9:(ry + 1) * k9, :],
                          preferred_element_type=jnp.float32)
            if act == "tanh":
                acc = jnp.tanh(acc)
            elif act == "relu":
                acc = jnp.maximum(acc, 0.0)
            _store_rows(o_ref, acc.astype(o_ref.dtype))


def _gather_xw(x_nhwc):
    """(B,H,W,C) -> (B*H*W, 9*C), lane order (3x3 slot, channel)."""
    B, H, W, C = x_nhwc.shape
    xp = jnp.pad(x_nhwc, ((0, 0), (1, 1), (1, 1), (0, 0)))
    wins = [xp[:, oy:oy + H, ox:ox + W, :]
            for oy in range(3) for ox in range(3)]
    return jnp.concatenate(wins, axis=-1).reshape(B * H * W, 9 * C)


def _pick_rows(R, W, cin, cp, vmem_limit, block_m):
    """Image rows (width W) per tile; tm = t_r * W matmul rows (multiple of 8)."""
    budget = int(vmem_limit * 0.8)

    def fits(t_r):
        tm = t_r * W
        return (2 * tm * 9 * cin * 2            # xw tile, bf16, double buffered
                + 2 * tm * 2 * cp * 4           # out tile, f32, double buffered
                + 2 * 18 * cin * 2 * cp * 2     # resident weight (x2 headroom)
                + 4 * 2 * 2 * cp * 4) <= budget

    t_r = max(1, min(block_m // max(W, 1), R))
    if W % 8:
        t_r = min(t_r, 32)                      # unrolled stores for tiny W
    while (t_r * W) % 8:
        t_r += 1
    while t_r > 1 and not fits(t_r):
        t_r = max(1, t_r // 2)
        while (t_r * W) % 8:
            t_r += 1
    return t_r


def convt_stride2(x_nhwc, layer, *, vmem_limit, block_m=1024):
    """ConvTranspose2d(cin, cout, 4, stride=2, pad=1) (+BN+ReLU | +Tanh).

    Returns NHWC output with channels padded to layer['cp'] (padding is 0)."""
    B, H, W, cin = x_nhwc.shape
    assert cin == layer["cin"]
    cout, cp = layer["cout"], layer["cp"]

    # Thin 3x3-neighbourhood gather; XLA fuses it with the previous layer's
    # BN/ReLU epilogue so there is no standalone activation round trip.
    # TODO(synk): pull this halo gather into the kernel (manual halo DMA from
    # NHWC HBM) to remove the remaining ~9x read amplification on activations.
    xw = _gather_xw(x_nhwc.astype(jnp.bfloat16))          # (B*H*W, 9*cin) bf16

    R = B * H
    t_r = _pick_rows(R, W, cin, cp, vmem_limit, block_m)
    R_pad = _round_up(R, t_r)
    if R_pad != R:
        xw = jnp.pad(xw, ((0, (R_pad - R) * W), (0, 0)))  # zero rows: no BN impact
    n_tiles = R_pad // t_r
    tm = t_r * W

    in_specs = [
        pl.BlockSpec((tm, 9 * cin), lambda i, r: (i, 0)),
        pl.BlockSpec((18 * cin, 2 * cp), lambda i, r: (0, 0)),   # resident weight
    ]
    o_spec = pl.BlockSpec((t_r, 1, W, 2 * cp), lambda i, r: (i, r, 0, 0))
    cparams = pltpu.CompilerParams(
        dimension_semantics=("parallel", "arbitrary"),    # tiles shard across TCs
        vmem_limit_bytes=vmem_limit)

    if layer["bn"]:
        conv, stats = pl.pallas_call(
            _convt_bn_kernel,
            out_shape=(
                jax.ShapeDtypeStruct((R_pad, 2, W, 2 * cp), jnp.float32),
                jax.ShapeDtypeStruct((n_tiles, 2, 2, 2 * cp), jnp.float32)),
            grid=(n_tiles, 2),
            in_specs=in_specs,
            out_specs=[o_spec,
                       pl.BlockSpec((1, 1, 2, 2 * cp), lambda i, r: (i, r, 0, 0))],
            compiler_params=cparams,
        )(xw, layer["wt"])
        # Fold per-tile partials into batch statistics (tiny XLA reduction),
        # then apply scale/shift + ReLU; this elementwise epilogue fuses with
        # the next layer's gather (or the final reshape).
        n_stat = 4.0 * B * H * W
        s = stats[:, :, 0, :].sum(axis=(0, 1)).reshape(2, cp).sum(axis=0)
        q = stats[:, :, 1, :].sum(axis=(0, 1)).reshape(2, cp).sum(axis=0)
        mean = s / n_stat
        var = jnp.maximum(q / n_stat - mean * mean, 0.0)
        scale_c = layer["gamma"] * jax.lax.rsqrt(var + _EPS)
        shift_c = layer["beta"] - mean * scale_c
        scale = jnp.tile(scale_c, 2).reshape(1, 1, 1, 2 * cp)
        shift = jnp.tile(shift_c, 2).reshape(1, 1, 1, 2 * cp)
        y = jnp.maximum(conv * scale + shift, 0.0).astype(jnp.bfloat16)
    else:
        y = pl.pallas_call(
            functools.partial(_convt_act_kernel, act=layer["act"]),
            out_shape=jax.ShapeDtypeStruct((R_pad, 2, W, 2 * cp), jnp.bfloat16),
            grid=(n_tiles, 2),
            in_specs=in_specs,
            out_specs=o_spec,
            compiler_params=cparams,
        )(xw, layer["wt"])

    # Phase un-interleave is a pure reshape: (R, 2, W, 2*cp) == (B, H, 2, W, 2, cp).
    return y[:R].reshape(B, 2 * H, 2 * W, cp)


# ----------------------------------------------------------------------------
# Full forward pass (Pallas path)
# ----------------------------------------------------------------------------
def pallas_forward(z, label, params, cfg, *, block_m=1024):
    vmem_limit = params["vmem_limit"]
    onehot = jax.nn.one_hot(label, cfg["num_classes"], dtype=jnp.float32)
    x = jnp.concatenate([z, onehot], axis=1).astype(jnp.bfloat16)
    x = fused_head(x, params["head"], vmem_limit)          # (B, 4, 4, c1p) NHWC
    for layer in params["layers"]:
        x = convt_stride2(x, layer, vmem_limit=vmem_limit, block_m=block_m)
    x = x[..., :cfg["nc"]]
    return jnp.transpose(x, (0, 3, 1, 2)).astype(jnp.float32)   # NCHW


# ----------------------------------------------------------------------------
# One-time parameter preparation (polyphase weight packing, padding, bf16).
# ----------------------------------------------------------------------------
def prepare_params(raw, cfg):
    k = cfg["k"]
    layers = raw["layers"]

    head_layer = layers[0]
    assert head_layer["stride"] == 1 and head_layer["pad"] == 0
    W1 = np.asarray(head_layer["W"], np.float32)            # (k, c1, 4, 4)
    c1 = W1.shape[1]
    c1p = _round_up(c1, 128)
    wt1 = np.zeros((k, 4, 4, c1p), np.float32)
    wt1[..., :c1] = np.transpose(W1, (0, 2, 3, 1))
    gamma1 = np.ones((1, c1p), np.float32)
    beta1 = np.zeros((1, c1p), np.float32)
    gamma1[0, :c1] = np.asarray(head_layer["gamma"], np.float32)
    beta1[0, :c1] = np.asarray(head_layer["beta"], np.float32)
    head = dict(
        w_lin=jnp.asarray(np.asarray(raw["W_lin"], np.float32), jnp.bfloat16),
        b_lin=jnp.asarray(np.asarray(raw["b_lin"], np.float32).reshape(1, -1)),
        wt1=jnp.asarray(wt1.reshape(k, 16 * c1p), jnp.bfloat16),
        gamma=jnp.asarray(gamma1), beta=jnp.asarray(beta1),
        c1p=c1p)

    prepped = []
    cin_p = c1p                      # channels actually produced by prev layer
    for layer in layers[1:]:
        W = np.asarray(layer["W"], np.float32)               # (cin, cout, 4, 4)
        cin, cout = W.shape[0], W.shape[1]
        assert layer["stride"] == 2 and layer["pad"] == 1 and W.shape[2] == 4
        cp = _round_up(cout, 64)     # 2*cp lanes are a multiple of 128
        # Fused polyphase weight: rows = (ry, 3x3 slot, cin_p), cols = (rx, cout).
        wt = np.zeros((2, 9, cin_p, 2, cp), np.float32)
        for ry in range(2):
            for rx in range(2):
                for dy in range(2):
                    for dx in range(2):
                        slot = (ry + dy) * 3 + (rx + dx)
                        ky, kx = 3 - ry - 2 * dy, 3 - rx - 2 * dx
                        wt[ry, slot, :cin, rx, :cout] = W[:, :, ky, kx]
        gamma = np.ones((cp,), np.float32)
        beta = np.zeros((cp,), np.float32)
        if layer["bn"]:
            gamma[:cout] = np.asarray(layer["gamma"], np.float32)
            beta[:cout] = np.asarray(layer["beta"], np.float32)
        prepped.append(dict(
            wt=jnp.asarray(wt.reshape(2 * 9 * cin_p, 2 * cp), jnp.bfloat16),
            gamma=jnp.asarray(gamma), beta=jnp.asarray(beta),
            cin=cin_p, cout=cout, cp=cp, bn=layer["bn"], act=layer["act"]))
        cin_p = cp
    return dict(head=head, layers=prepped, vmem_limit=_vmem_limit_bytes())


# ----------------------------------------------------------------------------
# Pure-JAX reference (XLA conv).  Matmul operands are rounded to bf16 at the
# same points as the Pallas path so the comparison stays tight.
# ----------------------------------------------------------------------------
def reference_forward(z, label, raw, cfg):
    bf = lambda a: a.astype(jnp.bfloat16).astype(jnp.float32)
    onehot = jax.nn.one_hot(label, cfg["num_classes"], dtype=jnp.float32)
    x = jnp.concatenate([z, onehot], axis=1)
    h = bf(x) @ bf(raw["W_lin"]) + raw["b_lin"]
    x = h.reshape(-1, cfg["k"], 1, 1)
    for layer in raw["layers"]:
        W = bf(layer["W"])                                   # (cin, cout, K, K)
        K = W.shape[-1]
        s, p = layer["stride"], layer["pad"]
        Wref = jnp.transpose(W[:, :, ::-1, ::-1], (1, 0, 2, 3))
        x = jax.lax.conv_general_dilated(
            bf(x), Wref, window_strides=(1, 1),
            padding=[(K - 1 - p, K - 1 - p)] * 2,
            lhs_dilation=(s, s),
            dimension_numbers=("NCHW", "OIHW", "NCHW"))
        if layer["bn"]:
            mean = jnp.mean(x, axis=(0, 2, 3), keepdims=True)
            var = jnp.mean((x - mean) ** 2, axis=(0, 2, 3), keepdims=True)
            x = (x - mean) * jax.lax.rsqrt(var + 1e-5)
            x = (x * layer["gamma"].reshape(1, -1, 1, 1)
                 + layer["beta"].reshape(1, -1, 1, 1))
        if layer["act"] == "relu":
            x = jnp.maximum(x, 0.0)
        elif layer["act"] == "tanh":
            x = jnp.tanh(x)
    return x


# ----------------------------------------------------------------------------
# Deterministic parameters with the same shapes as the PyTorch module.
# ----------------------------------------------------------------------------
def init_raw_params(key, *, isize, nc, k, ngf, num_classes):
    assert isize % 16 == 0
    cngf, tisize = ngf // 2, 4
    while tisize != isize:
        cngf *= 2
        tisize *= 2

    keys = iter(jax.random.split(key, 32))

    def rnd(shape, scale=0.1):
        return jax.random.normal(next(keys), shape, jnp.float32) * scale

    params = {
        "W_lin": rnd((k + num_classes, k), 0.05),
        "b_lin": rnd((k,), 0.05),
    }
    layers = []
    # ConvTranspose2d(k, cngf, 4, 1, 0) + BN + ReLU   (1x1 -> 4x4)
    layers.append(dict(W=rnd((k, cngf, 4, 4)),
                       gamma=1.0 + rnd((cngf,)), beta=rnd((cngf,)),
                       stride=1, pad=0, bn=True, act="relu"))
    csize, c = 4, cngf
    while csize < isize // 2:
        layers.append(dict(W=rnd((c, c // 2, 4, 4)),
                           gamma=1.0 + rnd((c // 2,)), beta=rnd((c // 2,)),
                           stride=2, pad=1, bn=True, act="relu"))
        c //= 2
        csize *= 2
    layers.append(dict(W=rnd((c, nc, 4, 4)),
                       gamma=None, beta=None,
                       stride=2, pad=1, bn=False, act="tanh"))
    params["layers"] = layers
    return params


if __name__ == "__main__":
    cfg = dict(isize=16, nc=4, k=32, ngf=8, num_classes=10)
    B = 2

    key = jax.random.PRNGKey(0)
    kz, kl, kp = jax.random.split(key, 3)
    z = jax.random.normal(kz, (B, cfg["k"]), jnp.float32)
    label = jax.random.randint(kl, (B,), 0, cfg["num_classes"])
    raw = init_raw_params(kp, **cfg)
    params = prepare_params(raw, cfg)

    fwd = jax.jit(lambda zz, ll: pallas_forward(zz, ll, params, cfg))
    out = jax.block_until_ready(fwd(z, label))

    assert out.shape == (B, cfg["nc"], cfg["isize"], cfg["isize"])
    ref = reference_forward(z, label, raw, cfg)
    # bf16 matmul operands (f32 accumulation) -> slightly relaxed tolerance.
    np.testing.assert_allclose(np.asarray(out), np.asarray(ref),
                               atol=1e-2, rtol=1e-2)
    print("KERNEL_OK")
</pallas_src>

<mosaic_0001>
module attributes {stable_mosaic.version = 11 : i64} {
  func.func @_head_kernel(%arg0: i32, %arg1: memref<2x42xbf16, #tpu.memory_space<vmem>>, %arg2: memref<42x32xbf16, #tpu.memory_space<vmem>>, %arg3: memref<1x32xf32, #tpu.memory_space<vmem>>, %arg4: memref<32x2048xbf16, #tpu.memory_space<vmem>>, %arg5: memref<1x128xf32, #tpu.memory_space<vmem>>, %arg6: memref<1x128xf32, #tpu.memory_space<vmem>>, %arg7: memref<2x2048xbf16, #tpu.memory_space<vmem>>) attributes {dimension_semantics = [#tpu.dimension_semantics<arbitrary>], iteration_bounds = array<i64: 1>, scalar_prefetch = 0 : i64, scratch_operands = 0 : i64, tpu.core_type = #tpu.core_type<tc>, window_params = [{pipeline_mode = #tpu.pipeline_mode<synchronous>, transform_indices = @transform_0, window_bounds = array<i64: 2, 42>}, {pipeline_mode = #tpu.pipeline_mode<synchronous>, transform_indices = @transform_1, window_bounds = array<i64: 42, 32>}, {pipeline_mode = #tpu.pipeline_mode<synchronous>, transform_indices = @transform_2, window_bounds = array<i64: 1, 32>}, {pipeline_mode = #tpu.pipeline_mode<synchronous>, transform_indices = @transform_3, window_bounds = array<i64: 32, 2048>}, {pipeline_mode = #tpu.pipeline_mode<synchronous>, transform_indices = @transform_4, window_bounds = array<i64: 1, 128>}, {pipeline_mode = #tpu.pipeline_mode<synchronous>, transform_indices = @transform_5, window_bounds = array<i64: 1, 128>}, {pipeline_mode = #tpu.pipeline_mode<synchronous>, transform_indices = @transform_6, window_bounds = array<i64: 2, 2048>}]} {
    %c0 = arith.constant 0 : index
    %c0_0 = arith.constant 0 : index
    %0 = vector.load %arg1[%c0, %c0_0] : memref<2x42xbf16, #tpu.memory_space<vmem>>, vector<2x42xbf16>
    %c0_1 = arith.constant 0 : index
    %c0_2 = arith.constant 0 : index
    %1 = vector.load %arg2[%c0_1, %c0_2] : memref<42x32xbf16, #tpu.memory_space<vmem>>, vector<42x32xbf16>
    %cst = arith.constant dense<0.000000e+00> : vector<2x32xf32>
    %2 = tpu.matmul %0, %1, %cst {dimension_numbers = #tpu.dot_dimension_numbers<[1], [0], [0], [1], [0, 0, 1, 1], [], []>} : vector<2x42xbf16>, vector<42x32xbf16>, vector<2x32xf32> -> vector<2x32xf32>
    %c0_3 = arith.constant 0 : index
    %c0_4 = arith.constant 0 : index
    %3 = vector.load %arg3[%c0_3, %c0_4] : memref<1x32xf32, #tpu.memory_space<vmem>>, vector<1x32xf32>
    %4 = vector.broadcast %3 : vector<1x32xf32> to vector<2x32xf32>
    %5 = arith.addf %2, %4 : vector<2x32xf32>
    %6 = arith.truncf %5 : vector<2x32xf32> to vector<2x32xbf16>
    %c0_5 = arith.constant 0 : index
    %c0_6 = arith.constant 0 : index
    %7 = vector.load %arg4[%c0_5, %c0_6] : memref<32x2048xbf16, #tpu.memory_space<vmem>>, vector<32x2048xbf16>
    %cst_7 = arith.constant dense<0.000000e+00> : vector<2x2048xf32>
    %8 = tpu.matmul %6, %7, %cst_7 {dimension_numbers = #tpu.dot_dimension_numbers<[1], [0], [0], [1], [0, 0, 1, 1], [], []>} : vector<2x32xbf16>, vector<32x2048xbf16>, vector<2x2048xf32> -> vector<2x2048xf32>
    %cst_8 = arith.constant 0.000000e+00 : f32
    %9 = vector.broadcast %cst_8 : f32 to vector<1x128xf32>
    %cst_9 = arith.constant 0.000000e+00 : f32
    %10 = vector.broadcast %cst_9 : f32 to vector<1x128xf32>
    %11 = vector.extract_strided_slice %8 {offsets = [0, 0], sizes = [2, 128], strides = [1, 1]} : vector<2x2048xf32> to vector<2x128xf32>
    %cst_10 = arith.constant dense<0.000000e+00> : vector<128xf32>
    %12 = vector.multi_reduction <add>, %11, %cst_10 [0] : vector<2x128xf32> to vector<128xf32>
    %13 = vector.shape_cast %12 : vector<128xf32> to vector<1x128xf32>
    %14 = arith.addf %9, %13 : vector<1x128xf32>
    %15 = arith.mulf %11, %11 : vector<2x128xf32>
    %cst_11 = arith.constant dense<0.000000e+00> : vector<128xf32>
    %16 = vector.multi_reduction <add>, %15, %cst_11 [0] : vector<2x128xf32> to vector<128xf32>
    %17 = vector.shape_cast %16 : vector<128xf32> to vector<1x128xf32>
    %18 = arith.addf %10, %17 : vector<1x128xf32>
    %19 = vector.extract_strided_slice %8 {offsets = [0, 128], sizes = [2, 128], strides = [1, 1]} : vector<2x2048xf32> to vector<2x128xf32>
    %cst_12 = arith.constant dense<0.000000e+00> : vector<128xf32>
    %20 = vector.multi_reduction <add>, %19, %cst_12 [0] : vector<2x128xf32> to vector<128xf32>
    %21 = vector.shape_cast %20 : vector<128xf32> to vector<1x128xf32>
    %22 = arith.addf %14, %21 : vector<1x128xf32>
    %23 = arith.mulf %19, %19 : vector<2x128xf32>
    %cst_13 = arith.constant dense<0.000000e+00> : vector<128xf32>
    %24 = vector.multi_reduction <add>, %23, %cst_13 [0] : vector<2x128xf32> to vector<128xf32>
    %25 = vector.shape_cast %24 : vector<128xf32> to vector<1x128xf32>
    %26 = arith.addf %18, %25 : vector<1x128xf32>
    %27 = vector.extract_strided_slice %8 {offsets = [0, 256], sizes = [2, 128], strides = [1, 1]} : vector<2x2048xf32> to vector<2x128xf32>
    %cst_14 = arith.constant dense<0.000000e+00> : vector<128xf32>
    %28 = vector.multi_reduction <add>, %27, %cst_14 [0] : vector<2x128xf32> to vector<128xf32>
    %29 = vector.shape_cast %28 : vector<128xf32> to vector<1x128xf32>
    %30 = arith.addf %22, %29 : vector<1x128xf32>
    %31 = arith.mulf %27, %27 : vector<2x128xf32>
    %cst_15 = arith.constant dense<0.000000e+00> : vector<128xf32>
    %32 = vector.multi_reduction <add>, %31, %cst_15 [0] : vector<2x128xf32> to vector<128xf32>
    %33 = vector.shape_cast %32 : vector<128xf32> to vector<1x128xf32>
    %34 = arith.addf %26, %33 : vector<1x128xf32>
    %35 = vector.extract_strided_slice %8 {offsets = [0, 384], sizes = [2, 128], strides = [1, 1]} : vector<2x2048xf32> to vector<2x128xf32>
    %cst_16 = arith.constant dense<0.000000e+00> : vector<128xf32>
    %36 = vector.multi_reduction <add>, %35, %cst_16 [0] : vector<2x128xf32> to vector<128xf32>
    %37 = vector.shape_cast %36 : vector<128xf32> to vector<1x128xf32>
    %38 = arith.addf %30, %37 : vector<1x128xf32>
    %39 = arith.mulf %35, %35 : vector<2x128xf32>
    %cst_17 = arith.constant dense<0.000000e+00> : vector<128xf32>
    %40 = vector.multi_reduction <add>, %39, %cst_17 [0] : vector<2x128xf32> to vector<128xf32>
    %41 = vector.shape_cast %40 : vector<128xf32> to vector<1x128xf32>
    %42 = arith.addf %34, %41 : vector<1x128xf32>
    %43 = vector.extract_strided_slice %8 {offsets = [0, 512], sizes = [2, 128], strides = [1, 1]} : vector<2x2048xf32> to vector<2x128xf32>
    %cst_18 = arith.constant dense<0.000000e+00> : vector<128xf32>
    %44 = vector.multi_reduction <add>, %43, %cst_18 [0] : vector<2x128xf32> to vector<128xf32>
    %45 = vector.shape_cast %44 : vector<128xf32> to vector<1x128xf32>
    %46 = arith.addf %38, %45 : vector<1x128xf32>
    %47 = arith.mulf %43, %43 : vector<2x128xf32>
    %cst_19 = arith.constant dense<0.000000e+00> : vector<128xf32>
    %48 = vector.multi_reduction <add>, %47, %cst_19 [0] : vector<2x128xf32> to vector<128xf32>
    %49 = vector.shape_cast %48 : vector<128xf32> to vector<1x128xf32>
    %50 = arith.addf %42, %49 : vector<1x128xf32>
    %51 = vector.extract_strided_slice %8 {offsets = [0, 640], sizes = [2, 128], strides = [1, 1]} : vector<2x2048xf32> to vector<2x128xf32>
    %cst_20 = arith.constant dense<0.000000e+00> : vector<128xf32>
    %52 = vector.multi_reduction <add>, %51, %cst_20 [0] : vector<2x128xf32> to vector<128xf32>
    %53 = vector.shape_cast %52 : vector<128xf32> to vector<1x128xf32>
    %54 = arith.addf %46, %53 : vector<1x128xf32>
    %55 = arith.mulf %51, %51 : vector<2x128xf32>
    %cst_21 = arith.constant dense<0.000000e+00> : vector<128xf32>
    %56 = vector.multi_reduction <add>, %55, %cst_21 [0] : vector<2x128xf32> to vector<128xf32>
    %57 = vector.shape_cast %56 : vector<128xf32> to vector<1x128xf32>
    %58 = arith.addf %50, %57 : vector<1x128xf32>
    %59 = vector.extract_strided_slice %8 {offsets = [0, 768], sizes = [2, 128], strides = [1, 1]} : vector<2x2048xf32> to vector<2x128xf32>
    %cst_22 = arith.constant dense<0.000000e+00> : vector<128xf32>
    %60 = vector.multi_reduction <add>, %59, %cst_22 [0] : vector<2x128xf32> to vector<128xf32>
    %61 = vector.shape_cast %60 : vector<128xf32> to vector<1x128xf32>
    %62 = arith.addf %54, %61 : vector<1x128xf32>
    %63 = arith.mulf %59, %59 : vector<2x128xf32>
    %cst_23 = arith.constant dense<0.000000e+00> : vector<128xf32>
    %64 = vector.multi_reduction <add>, %63, %cst_23 [0] : vector<2x128xf32> to vector<128xf32>
    %65 = vector.shape_cast %64 : vector<128xf32> to vector<1x128xf32>
    %66 = arith.addf %58, %65 : vector<1x128xf32>
    %67 = vector.extract_strided_slice %8 {offsets = [0, 896], sizes = [2, 128], strides = [1, 1]} : vector<2x2048xf32> to vector<2x128xf32>
    %cst_24 = arith.constant dense<0.000000e+00> : vector<128xf32>
    %68 = vector.multi_reduction <add>, %67, %cst_24 [0] : vector<2x128xf32> to vector<128xf32>
    %69 = vector.shape_cast %68 : vector<128xf32> to vector<1x128xf32>
    %70 = arith.addf %62, %69 : vector<1x128xf32>
    %71 = arith.mulf %67, %67 : vector<2x128xf32>
    %cst_25 = arith.constant dense<0.000000e+00> : vector<128xf32>
    %72 = vector.multi_reduction <add>, %71, %cst_25 [0] : vector<2x128xf32> to vector<128xf32>
    %73 = vector.shape_cast %72 : vector<128xf32> to vector<1x128xf32>
    %74 = arith.addf %66, %73 : vector<1x128xf32>
    %75 = vector.extract_strided_slice %8 {offsets = [0, 1024], sizes = [2, 128], strides = [1, 1]} : vector<2x2048xf32> to vector<2x128xf32>
    %cst_26 = arith.constant dense<0.000000e+00> : vector<128xf32>
    %76 = vector.multi_reduction <add>, %75, %cst_26 [0] : vector<2x128xf32> to vector<128xf32>
    %77 = vector.shape_cast %76 : vector<128xf32> to vector<1x128xf32>
    %78 = arith.addf %70, %77 : vector<1x128xf32>
    %79 = arith.mulf %75, %75 : vector<2x128xf32>
    %cst_27 = arith.constant dense<0.000000e+00> : vector<128xf32>
    %80 = vector.multi_reduction <add>, %79, %cst_27 [0] : vector<2x128xf32> to vector<128xf32>
    %81 = vector.shape_cast %80 : vector<128xf32> to vector<1x128xf32>
    %82 = arith.addf %74, %81 : vector<1x128xf32>
    %83 = vector.extract_strided_slice %8 {offsets = [0, 1152], sizes = [2, 128], strides = [1, 1]} : vector<2x2048xf32> to vector<2x128xf32>
    %cst_28 = arith.constant dense<0.000000e+00> : vector<128xf32>
    %84 = vector.multi_reduction <add>, %83, %cst_28 [0] : vector<2x128xf32> to vector<128xf32>
    %85 = vector.shape_cast %84 : vector<128xf32> to vector<1x128xf32>
    %86 = arith.addf %78, %85 : vector<1x128xf32>
    %87 = arith.mulf %83, %83 : vector<2x128xf32>
    %cst_29 = arith.constant dense<0.000000e+00> : vector<128xf32>
    %88 = vector.multi_reduction <add>, %87, %cst_29 [0] : vector<2x128xf32> to vector<128xf32>
    %89 = vector.shape_cast %88 : vector<128xf32> to vector<1x128xf32>
    %90 = arith.addf %82, %89 : vector<1x128xf32>
    %91 = vector.extract_strided_slice %8 {offsets = [0, 1280], sizes = [2, 128], strides = [1, 1]} : vector<2x2048xf32> to vector<2x128xf32>
    %cst_30 = arith.constant dense<0.000000e+00> : vector<128xf32>
    %92 = vector.multi_reduction <add>, %91, %cst_30 [0] : vector<2x128xf32> to vector<128xf32>
    %93 = vector.shape_cast %92 : vector<128xf32> to vector<1x128xf32>
    %94 = arith.addf %86, %93 : vector<1x128xf32>
    %95 = arith.mulf %91, %91 : vector<2x128xf32>
    %cst_31 = arith.constant dense<0.000000e+00> : vector<128xf32>
    %96 = vector.multi_reduction <add>, %95, %cst_31 [0] : vector<2x128xf32> to vector<128xf32>
    %97 = vector.shape_cast %96 : vector<128xf32> to vector<1x128xf32>
    %98 = arith.addf %90, %97 : vector<1x128xf32>
    %99 = vector.extract_strided_slice %8 {offsets = [0, 1408], sizes = [2, 128], strides = [1, 1]} : vector<2x2048xf32> to vector<2x128xf32>
    %cst_32 = arith.constant dense<0.000000e+00> : vector<128xf32>
    %100 = vector.multi_reduction <add>, %99, %cst_32 [0] : vector<2x128xf32> to vector<128xf32>
    %101 = vector.shape_cast %100 : vector<128xf32> to vector<1x128xf32>
    %102 = arith.addf %94, %101 : vector<1x128xf32>
    %103 = arith.mulf %99, %99 : vector<2x128xf32>
    %cst_33 = arith.constant dense<0.000000e+00> : vector<128xf32>
    %104 = vector.multi_reduction <add>, %103, %cst_33 [0] : vector<2x128xf32> to vector<128xf32>
    %105 = vector.shape_cast %104 : vector<128xf32> to vector<1x128xf32>
    %106 = arith.addf %98, %105 : vector<1x128xf32>
    %107 = vector.extract_strided_slice %8 {offsets = [0, 1536], sizes = [2, 128], strides = [1, 1]} : vector<2x2048xf32> to vector<2x128xf32>
    %cst_34 = arith.constant dense<0.000000e+00> : vector<128xf32>
    %108 = vector.multi_reduction <add>, %107, %cst_34 [0] : vector<2x128xf32> to vector<128xf32>
    %109 = vector.shape_cast %108 : vector<128xf32> to vector<1x128xf32>
    %110 = arith.addf %102, %109 : vector<1x128xf32>
    %111 = arith.mulf %107, %107 : vector<2x128xf32>
    %cst_35 = arith.constant dense<0.000000e+00> : vector<128xf32>
    %112 = vector.multi_reduction <add>, %111, %cst_35 [0] : vector<2x128xf32> to vector<128xf32>
    %113 = vector.shape_cast %112 : vector<128xf32> to vector<1x128xf32>
    %114 = arith.addf %106, %113 : vector<1x128xf32>
    %115 = vector.extract_strided_slice %8 {offsets = [0, 1664], sizes = [2, 128], strides = [1, 1]} : vector<2x2048xf32> to vector<2x128xf32>
    %cst_36 = arith.constant dense<0.000000e+00> : vector<128xf32>
    %116 = vector.multi_reduction <add>, %115, %cst_36 [0] : vector<2x128xf32> to vector<128xf32>
    %117 = vector.shape_cast %116 : vector<128xf32> to vector<1x128xf32>
    %118 = arith.addf %110, %117 : vector<1x128xf32>
    %119 = arith.mulf %115, %115 : vector<2x128xf32>
    %cst_37 = arith.constant dense<0.000000e+00> : vector<128xf32>
    %120 = vector.multi_reduction <add>, %119, %cst_37 [0] : vector<2x128xf32> to vector<128xf32>
    %121 = vector.shape_cast %120 : vector<128xf32> to vector<1x128xf32>
    %122 = arith.addf %114, %121 : vector<1x128xf32>
    %123 = vector.extract_strided_slice %8 {offsets = [0, 1792], sizes = [2, 128], strides = [1, 1]} : vector<2x2048xf32> to vector<2x128xf32>
    %cst_38 = arith.constant dense<0.000000e+00> : vector<128xf32>
    %124 = vector.multi_reduction <add>, %123, %cst_38 [0] : vector<2x128xf32> to vector<128xf32>
    %125 = vector.shape_cast %124 : vector<128xf32> to vector<1x128xf32>
    %126 = arith.addf %118, %125 : vector<1x128xf32>
    %127 = arith.mulf %123, %123 : vector<2x128xf32>
    %cst_39 = arith.constant dense<0.000000e+00> : vector<128xf32>
    %128 = vector.multi_reduction <add>, %127, %cst_39 [0] : vector<2x128xf32> to vector<128xf32>
    %129 = vector.shape_cast %128 : vector<128xf32> to vector<1x128xf32>
    %130 = arith.addf %122, %129 : vector<1x128xf32>
    %131 = vector.extract_strided_slice %8 {offsets = [0, 1920], sizes = [2, 128], strides = [1, 1]} : vector<2x2048xf32> to vector<2x128xf32>
    %cst_40 = arith.constant dense<0.000000e+00> : vector<128xf32>
    %132 = vector.multi_reduction <add>, %131, %cst_40 [0] : vector<2x128xf32> to vector<128xf32>
    %133 = vector.shape_cast %132 : vector<128xf32> to vector<1x128xf32>
    %134 = arith.addf %126, %133 : vector<1x128xf32>
    %135 = arith.mulf %131, %131 : vector<2x128xf32>
    %cst_41 = arith.constant dense<0.000000e+00> : vector<128xf32>
    %136 = vector.multi_reduction <add>, %135, %cst_41 [0] : vector<2x128xf32> to vector<128xf32>
    %137 = vector.shape_cast %136 : vector<128xf32> to vector<1x128xf32>
    %138 = arith.addf %130, %137 : vector<1x128xf32>
    %cst_42 = arith.constant 3.200000e+01 : f32
    %139 = vector.broadcast %cst_42 : f32 to vector<1x128xf32>
    %140 = arith.divf %134, %139 : vector<1x128xf32>
    %cst_43 = arith.constant 3.200000e+01 : f32
    %141 = vector.broadcast %cst_43 : f32 to vector<1x128xf32>
    %142 = arith.divf %138, %141 : vector<1x128xf32>
    %143 = arith.mulf %140, %140 : vector<1x128xf32>
    %144 = arith.subf %142, %143 : vector<1x128xf32>
    %cst_44 = arith.constant 0.000000e+00 : f32
    %145 = vector.broadcast %cst_44 : f32 to vector<1x128xf32>
    %146 = arith.maximumf %144, %145 : vector<1x128xf32>
    %c0_45 = arith.constant 0 : index
    %c0_46 = arith.constant 0 : index
    %147 = vector.load %arg5[%c0_45, %c0_46] : memref<1x128xf32, #tpu.memory_space<vmem>>, vector<1x128xf32>
    %cst_47 = arith.constant 9.99999974E-6 : f32
    %148 = vector.broadcast %cst_47 : f32 to vector<1x128xf32>
    %149 = arith.addf %146, %148 : vector<1x128xf32>
    %150 = math.rsqrt %149 : vector<1x128xf32>
    %151 = arith.mulf %147, %150 : vector<1x128xf32>
    %c0_48 = arith.constant 0 : index
    %c0_49 = arith.constant 0 : index
    %152 = vector.load %arg6[%c0_48, %c0_49] : memref<1x128xf32, #tpu.memory_space<vmem>>, vector<1x128xf32>
    %153 = arith.mulf %140, %151 : vector<1x128xf32>
    %154 = arith.subf %152, %153 : vector<1x128xf32>
    %155 = vector.extract_strided_slice %8 {offsets = [0, 0], sizes = [2, 128], strides = [1, 1]} : vector<2x2048xf32> to vector<2x128xf32>
    %156 = vector.broadcast %151 : vector<1x128xf32> to vector<2x128xf32>
    %157 = arith.mulf %155, %156 : vector<2x128xf32>
    %158 = vector.broadcast %154 : vector<1x128xf32> to vector<2x128xf32>
    %159 = arith.addf %157, %158 : vector<2x128xf32>
    %cst_50 = arith.constant 0.000000e+00 : f32
    %160 = vector.broadcast %cst_50 : f32 to vector<2x128xf32>
    %161 = arith.maximumf %159, %160 : vector<2x128xf32>
    %162 = arith.truncf %161 : vector<2x128xf32> to vector<2x128xbf16>
    %c0_51 = arith.constant 0 : index
    %c0_52 = arith.constant 0 : index
    %163 = vector.load %arg7[%c0_51, %c0_52] : memref<2x2048xbf16, #tpu.memory_space<vmem>>, vector<2x128xbf16>
    tpu.vector_store %arg7[%c0_51, %c0_52], %162 {strides = array<i32>} : memref<2x2048xbf16, #tpu.memory_space<vmem>>, vector<2x128xbf16>,
    %164 = vector.extract_strided_slice %8 {offsets = [0, 128], sizes = [2, 128], strides = [1, 1]} : vector<2x2048xf32> to vector<2x128xf32>
    %165 = vector.broadcast %151 : vector<1x128xf32> to vector<2x128xf32>
    %166 = arith.mulf %164, %165 : vector<2x128xf32>
    %167 = vector.broadcast %154 : vector<1x128xf32> to vector<2x128xf32>
    %168 = arith.addf %166, %167 : vector<2x128xf32>
    %cst_53 = arith.constant 0.000000e+00 : f32
    %169 = vector.broadcast %cst_53 : f32 to vector<2x128xf32>
    %170 = arith.maximumf %168, %169 : vector<2x128xf32>
    %171 = arith.truncf %170 : vector<2x128xf32> to vector<2x128xbf16>
    %c0_54 = arith.constant 0 : index
    %c128 = arith.constant 128 : index
    %172 = vector.load %arg7[%c0_54, %c128] : memref<2x2048xbf16, #tpu.memory_space<vmem>>, vector<2x128xbf16>
    tpu.vector_store %arg7[%c0_54, %c128], %171 {strides = array<i32>} : memref<2x2048xbf16, #tpu.memory_space<vmem>>, vector<2x128xbf16>,
    %173 = vector.extract_strided_slice %8 {offsets = [0, 256], sizes = [2, 128], strides = [1, 1]} : vector<2x2048xf32> to vector<2x128xf32>
    %174 = vector.broadcast %151 : vector<1x128xf32> to vector<2x128xf32>
    %175 = arith.mulf %173, %174 : vector<2x128xf32>
    %176 = vector.broadcast %154 : vector<1x128xf32> to vector<2x128xf32>
    %177 = arith.addf %175, %176 : vector<2x128xf32>
    %cst_55 = arith.constant 0.000000e+00 : f32
    %178 = vector.broadcast %cst_55 : f32 to vector<2x128xf32>
    %179 = arith.maximumf %177, %178 : vector<2x128xf32>
    %180 = arith.truncf %179 : vector<2x128xf32> to vector<2x128xbf16>
    %c0_56 = arith.constant 0 : index
    %c256 = arith.constant 256 : index
    %181 = vector.load %arg7[%c0_56, %c256] : memref<2x2048xbf16, #tpu.memory_space<vmem>>, vector<2x128xbf16>
    tpu.vector_store %arg7[%c0_56, %c256], %180 {strides = array<i32>} : memref<2x2048xbf16, #tpu.memory_space<vmem>>, vector<2x128xbf16>,
    %182 = vector.extract_strided_slice %8 {offsets = [0, 384], sizes = [2, 128], strides = [1, 1]} : vector<2x2048xf32> to vector<2x128xf32>
    %183 = vector.broadcast %151 : vector<1x128xf32> to vector<2x128xf32>
    %184 = arith.mulf %182, %183 : vector<2x128xf32>
    %185 = vector.broadcast %154 : vector<1x128xf32> to vector<2x128xf32>
    %186 = arith.addf %184, %185 : vector<2x128xf32>
    %cst_57 = arith.constant 0.000000e+00 : f32
    %187 = vector.broadcast %cst_57 : f32 to vector<2x128xf32>
    %188 = arith.maximumf %186, %187 : vector<2x128xf32>
    %189 = arith.truncf %188 : vector<2x128xf32> to vector<2x128xbf16>
    %c0_58 = arith.constant 0 : index
    %c384 = arith.constant 384 : index
    %190 = vector.load %arg7[%c0_58, %c384] : memref<2x2048xbf16, #tpu.memory_space<vmem>>, vector<2x128xbf16>
    tpu.vector_store %arg7[%c0_58, %c384], %189 {strides = array<i32>} : memref<2x2048xbf16, #tpu.memory_space<vmem>>, vector<2x128xbf16>,
    %191 = vector.extract_strided_slice %8 {offsets = [0, 512], sizes = [2, 128], strides = [1, 1]} : vector<2x2048xf32> to vector<2x128xf32>
    %192 = vector.broadcast %151 : vector<1x128xf32> to vector<2x128xf32>
    %193 = arith.mulf %191, %192 : vector<2x128xf32>
    %194 = vector.broadcast %154 : vector<1x128xf32> to vector<2x128xf32>
    %195 = arith.addf %193, %194 : vector<2x128xf32>
    %cst_59 = arith.constant 0.000000e+00 : f32
    %196 = vector.broadcast %cst_59 : f32 to vector<2x128xf32>
    %197 = arith.maximumf %195, %196 : vector<2x128xf32>
    %198 = arith.truncf %197 : vector<2x128xf32> to vector<2x128xbf16>
    %c0_60 = arith.constant 0 : index
    %c512 = arith.constant 512 : index
    %199 = vector.load %arg7[%c0_60, %c512] : memref<2x2048xbf16, #tpu.memory_space<vmem>>, vector<2x128xbf16>
    tpu.vector_store %arg7[%c0_60, %c512], %198 {strides = array<i32>} : memref<2x2048xbf16, #tpu.memory_space<vmem>>, vector<2x128xbf16>,
    %200 = vector.extract_strided_slice %8 {offsets = [0, 640], sizes = [2, 128], strides = [1, 1]} : vector<2x2048xf32> to vector<2x128xf32>
    %201 = vector.broadcast %151 : vector<1x128xf32> to vector<2x128xf32>
    %202 = arith.mulf %200, %201 : vector<2x128xf32>
    %203 = vector.broadcast %154 : vector<1x128xf32> to vector<2x128xf32>
    %204 = arith.addf %202, %203 : vector<2x128xf32>
    %cst_61 = arith.constant 0.000000e+00 : f32
    %205 = vector.broadcast %cst_61 : f32 to vector<2x128xf32>
    %206 = arith.maximumf %204, %205 : vector<2x128xf32>
    %207 = arith.truncf %206 : vector<2x128xf32> to vector<2x128xbf16>
    %c0_62 = arith.constant 0 : index
    %c640 = arith.constant 640 : index
    %208 = vector.load %arg7[%c0_62, %c640] : memref<2x2048xbf16, #tpu.memory_space<vmem>>, vector<2x128xbf16>
    tpu.vector_store %arg7[%c0_62, %c640], %207 {strides = array<i32>} : memref<2x2048xbf16, #tpu.memory_space<vmem>>, vector<2x128xbf16>,
    %209 = vector.extract_strided_slice %8 {offsets = [0, 768], sizes = [2, 128], strides = [1, 1]} : vector<2x2048xf32> to vector<2x128xf32>
    %210 = vector.broadcast %151 : vector<1x128xf32> to vector<2x128xf32>
    %211 = arith.mulf %209, %210 : vector<2x128xf32>
    %212 = vector.broadcast %154 : vector<1x128xf32> to vector<2x128xf32>
    %213 = arith.addf %211, %212 : vector<2x128xf32>
    %cst_63 = arith.constant 0.000000e+00 : f32
    %214 = vector.broadcast %cst_63 : f32 to vector<2x128xf32>
    %215 = arith.maximumf %213, %214 : vector<2x128xf32>
    %216 = arith.truncf %215 : vector<2x128xf32> to vector<2x128xbf16>
    %c0_64 = arith.constant 0 : index
    %c768 = arith.constant 768 : index
    %217 = vector.load %arg7[%c0_64, %c768] : memref<2x2048xbf16, #tpu.memory_space<vmem>>, vector<2x128xbf16>
    tpu.vector_store %arg7[%c0_64, %c768], %216 {strides = array<i32>} : memref<2x2048xbf16, #tpu.memory_space<vmem>>, vector<2x128xbf16>,
    %218 = vector.extract_strided_slice %8 {offsets = [0, 896], sizes = [2, 128], strides = [1, 1]} : vector<2x2048xf32> to vector<2x128xf32>
    %219 = vector.broadcast %151 : vector<1x128xf32> to vector<2x128xf32>
    %220 = arith.mulf %218, %219 : vector<2x128xf32>
    %221 = vector.broadcast %154 : vector<1x128xf32> to vector<2x128xf32>
    %222 = arith.addf %220, %221 : vector<2x128xf32>
    %cst_65 = arith.constant 0.000000e+00 : f32
    %223 = vector.broadcast %cst_65 : f32 to vector<2x128xf32>
    %224 = arith.maximumf %222, %223 : vector<2x128xf32>
    %225 = arith.truncf %224 : vector<2x128xf32> to vector<2x128xbf16>
    %c0_66 = arith.constant 0 : index
    %c896 = arith.constant 896 : index
    %226 = vector.load %arg7[%c0_66, %c896] : memref<2x2048xbf16, #tpu.memory_space<vmem>>, vector<2x128xbf16>
    tpu.vector_store %arg7[%c0_66, %c896], %225 {strides = array<i32>} : memref<2x2048xbf16, #tpu.memory_space<vmem>>, vector<2x128xbf16>,
    %227 = vector.extract_strided_slice %8 {offsets = [0, 1024], sizes = [2, 128], strides = [1, 1]} : vector<2x2048xf32> to vector<2x128xf32>
    %228 = vector.broadcast %151 : vector<1x128xf32> to vector<2x128xf32>
    %229 = arith.mulf %227, %228 : vector<2x128xf32>
    %230 = vector.broadcast %154 : vector<1x128xf32> to vector<2x128xf32>
    %231 = arith.addf %229, %230 : vector<2x128xf32>
    %cst_67 = arith.constant 0.000000e+00 : f32
    %232 = vector.broadcast %cst_67 : f32 to vector<2x128xf32>
    %233 = arith.maximumf %231, %232 : vector<2x128xf32>
    %234 = arith.truncf %233 : vector<2x128xf32> to vector<2x128xbf16>
    %c0_68 = arith.constant 0 : index
    %c1024 = arith.constant 1024 : index
    %235 = vector.load %arg7[%c0_68, %c1024] : memref<2x2048xbf16, #tpu.memory_space<vmem>>, vector<2x128xbf16>
    tpu.vector_store %arg7[%c0_68, %c1024], %234 {strides = array<i32>} : memref<2x2048xbf16, #tpu.memory_space<vmem>>, vector<2x128xbf16>,
    %236 = vector.extract_strided_slice %8 {offsets = [0, 1152], sizes = [2, 128], strides = [1, 1]} : vector<2x2048xf32> to vector<2x128xf32>
    %237 = vector.broadcast %151 : vector<1x128xf32> to vector<2x128xf32>
    %238 = arith.mulf %236, %237 : vector<2x128xf32>
    %239 = vector.broadcast %154 : vector<1x128xf32> to vector<2x128xf32>
    %240 = arith.addf %238, %239 : vector<2x128xf32>
    %cst_69 = arith.constant 0.000000e+00 : f32
    %241 = vector.broadcast %cst_69 : f32 to vector<2x128xf32>
    %242 = arith.maximumf %240, %241 : vector<2x128xf32>
    %243 = arith.truncf %242 : vector<2x128xf32> to vector<2x128xbf16>
    %c0_70 = arith.constant 0 : index
    %c1152 = arith.constant 1152 : index
    %244 = vector.load %arg7[%c0_70, %c1152] : memref<2x2048xbf16, #tpu.memory_space<vmem>>, vector<2x128xbf16>
    tpu.vector_store %arg7[%c0_70, %c1152], %243 {strides = array<i32>} : memref<2x2048xbf16, #tpu.memory_space<vmem>>, vector<2x128xbf16>,
    %245 = vector.extract_strided_slice %8 {offsets = [0, 1280], sizes = [2, 128], strides = [1, 1]} : vector<2x2048xf32> to vector<2x128xf32>
    %246 = vector.broadcast %151 : vector<1x128xf32> to vector<2x128xf32>
    %247 = arith.mulf %245, %246 : vector<2x128xf32>
    %248 = vector.broadcast %154 : vector<1x128xf32> to vector<2x128xf32>
    %249 = arith.addf %247, %248 : vector<2x128xf32>
    %cst_71 = arith.constant 0.000000e+00 : f32
    %250 = vector.broadcast %cst_71 : f32 to vector<2x128xf32>
    %251 = arith.maximumf %249, %250 : vector<2x128xf32>
    %252 = arith.truncf %251 : vector<2x128xf32> to vector<2x128xbf16>
    %c0_72 = arith.constant 0 : index
    %c1280 = arith.constant 1280 : index
    %253 = vector.load %arg7[%c0_72, %c1280] : memref<2x2048xbf16, #tpu.memory_space<vmem>>, vector<2x128xbf16>
    tpu.vector_store %arg7[%c0_72, %c1280], %252 {strides = array<i32>} : memref<2x2048xbf16, #tpu.memory_space<vmem>>, vector<2x128xbf16>,
    %254 = vector.extract_strided_slice %8 {offsets = [0, 1408], sizes = [2, 128], strides = [1, 1]} : vector<2x2048xf32> to vector<2x128xf32>
    %255 = vector.broadcast %151 : vector<1x128xf32> to vector<2x128xf32>
    %256 = arith.mulf %254, %255 : vector<2x128xf32>
    %257 = vector.broadcast %154 : vector<1x128xf32> to vector<2x128xf32>
    %258 = arith.addf %256, %257 : vector<2x128xf32>
    %cst_73 = arith.constant 0.000000e+00 : f32
    %259 = vector.broadcast %cst_73 : f32 to vector<2x128xf32>
    %260 = arith.maximumf %258, %259 : vector<2x128xf32>
    %261 = arith.truncf %260 : vector<2x128xf32> to vector<2x128xbf16>
    %c0_74 = arith.constant 0 : index
    %c1408 = arith.constant 1408 : index
    %262 = vector.load %arg7[%c0_74, %c1408] : memref<2x2048xbf16, #tpu.memory_space<vmem>>, vector<2x128xbf16>
    tpu.vector_store %arg7[%c0_74, %c1408], %261 {strides = array<i32>} : memref<2x2048xbf16, #tpu.memory_space<vmem>>, vector<2x128xbf16>,
    %263 = vector.extract_strided_slice %8 {offsets = [0, 1536], sizes = [2, 128], strides = [1, 1]} : vector<2x2048xf32> to vector<2x128xf32>
    %264 = vector.broadcast %151 : vector<1x128xf32> to vector<2x128xf32>
    %265 = arith.mulf %263, %264 : vector<2x128xf32>
    %266 = vector.broadcast %154 : vector<1x128xf32> to vector<2x128xf32>
    %267 = arith.addf %265, %266 : vector<2x128xf32>
    %cst_75 = arith.constant 0.000000e+00 : f32
    %268 = vector.broadcast %cst_75 : f32 to vector<2x128xf32>
    %269 = arith.maximumf %267, %268 : vector<2x128xf32>
    %270 = arith.truncf %269 : vector<2x128xf32> to vector<2x128xbf16>
    %c0_76 = arith.constant 0 : index
    %c1536 = arith.constant 1536 : index
    %271 = vector.load %arg7[%c0_76, %c1536] : memref<2x2048xbf16, #tpu.memory_space<vmem>>, vector<2x128xbf16>
    tpu.vector_store %arg7[%c0_76, %c1536], %270 {strides = array<i32>} : memref<2x2048xbf16, #tpu.memory_space<vmem>>, vector<2x128xbf16>,
    %272 = vector.extract_strided_slice %8 {offsets = [0, 1664], sizes = [2, 128], strides = [1, 1]} : vector<2x2048xf32> to vector<2x128xf32>
    %273 = vector.broadcast %151 : vector<1x128xf32> to vector<2x128xf32>
    %274 = arith.mulf %272, %273 : vector<2x128xf32>
    %275 = vector.broadcast %154 : vector<1x128xf32> to vector<2x128xf32>
    %276 = arith.addf %274, %275 : vector<2x128xf32>
    %cst_77 = arith.constant 0.000000e+00 : f32
    %277 = vector.broadcast %cst_77 : f32 to vector<2x128xf32>
    %278 = arith.maximumf %276, %277 : vector<2x128xf32>
    %279 = arith.truncf %278 : vector<2x128xf32> to vector<2x128xbf16>
    %c0_78 = arith.constant 0 : index
    %c1664 = arith.constant 1664 : index
    %280 = vector.load %arg7[%c0_78, %c1664] : memref<2x2048xbf16, #tpu.memory_space<vmem>>, vector<2x128xbf16>
    tpu.vector_store %arg7[%c0_78, %c1664], %279 {strides = array<i32>} : memref<2x2048xbf16, #tpu.memory_space<vmem>>, vector<2x128xbf16>,
    %281 = vector.extract_strided_slice %8 {offsets = [0, 1792], sizes = [2, 128], strides = [1, 1]} : vector<2x2048xf32> to vector<2x128xf32>
    %282 = vector.broadcast %151 : vector<1x128xf32> to vector<2x128xf32>
    %283 = arith.mulf %281, %282 : vector<2x128xf32>
    %284 = vector.broadcast %154 : vector<1x128xf32> to vector<2x128xf32>
    %285 = arith.addf %283, %284 : vector<2x128xf32>
    %cst_79 = arith.constant 0.000000e+00 : f32
    %286 = vector.broadcast %cst_79 : f32 to vector<2x128xf32>
    %287 = arith.maximumf %285, %286 : vector<2x128xf32>
    %288 = arith.truncf %287 : vector<2x128xf32> to vector<2x128xbf16>
    %c0_80 = arith.constant 0 : index
    %c1792 = arith.constant 1792 : index
    %289 = vector.load %arg7[%c0_80, %c1792] : memref<2x2048xbf16, #tpu.memory_space<vmem>>, vector<2x128xbf16>
    tpu.vector_store %arg7[%c0_80, %c1792], %288 {strides = array<i32>} : memref<2x2048xbf16, #tpu.memory_space<vmem>>, vector<2x128xbf16>,
    %290 = vector.extract_strided_slice %8 {offsets = [0, 1920], sizes = [2, 128], strides = [1, 1]} : vector<2x2048xf32> to vector<2x128xf32>
    %291 = vector.broadcast %151 : vector<1x128xf32> to vector<2x128xf32>
    %292 = arith.mulf %290, %291 : vector<2x128xf32>
    %293 = vector.broadcast %154 : vector<1x128xf32> to vector<2x128xf32>
    %294 = arith.addf %292, %293 : vector<2x128xf32>
    %cst_81 = arith.constant 0.000000e+00 : f32
    %295 = vector.broadcast %cst_81 : f32 to vector<2x128xf32>
    %296 = arith.maximumf %294, %295 : vector<2x128xf32>
    %297 = arith.truncf %296 : vector<2x128xf32> to vector<2x128xbf16>
    %c0_82 = arith.constant 0 : index
    %c1920 = arith.constant 1920 : index
    %298 = vector.load %arg7[%c0_82, %c1920] : memref<2x2048xbf16, #tpu.memory_space<vmem>>, vector<2x128xbf16>
    tpu.vector_store %arg7[%c0_82, %c1920], %297 {strides = array<i32>} : memref<2x2048xbf16, #tpu.memory_space<vmem>>, vector<2x128xbf16>,
    return
  }
  func.func @transform_0(%arg0: i32) -> (i32, i32) {
    %c0_i32 = arith.constant 0 : i32
    %c0_i32_0 = arith.constant 0 : i32
    %c0_i32_1 = arith.constant 0 : i32
    return %c0_i32, %c0_i32_0 : i32, i32
  }
  func.func @transform_1(%arg0: i32) -> (i32, i32) {
    %c0_i32 = arith.constant 0 : i32
    %c0_i32_0 = arith.constant 0 : i32
    %c0_i32_1 = arith.constant 0 : i32
    return %c0_i32, %c0_i32_0 : i32, i32
  }
  func.func @transform_2(%arg0: i32) -> (i32, i32) {
    %c0_i32 = arith.constant 0 : i32
    %c0_i32_0 = arith.constant 0 : i32
    %c0_i32_1 = arith.constant 0 : i32
    return %c0_i32, %c0_i32_0 : i32, i32
  }
  func.func @transform_3(%arg0: i32) -> (i32, i32) {
    %c0_i32 = arith.constant 0 : i32
    %c0_i32_0 = arith.constant 0 : i32
    %c0_i32_1 = arith.constant 0 : i32
    return %c0_i32, %c0_i32_0 : i32, i32
  }
  func.func @transform_4(%arg0: i32) -> (i32, i32) {
    %c0_i32 = arith.constant 0 : i32
    %c0_i32_0 = arith.constant 0 : i32
    %c0_i32_1 = arith.constant 0 : i32
    return %c0_i32, %c0_i32_0 : i32, i32
  }
  func.func @transform_5(%arg0: i32) -> (i32, i32) {
    %c0_i32 = arith.constant 0 : i32
    %c0_i32_0 = arith.constant 0 : i32
    %c0_i32_1 = arith.constant 0 : i32
    return %c0_i32, %c0_i32_0 : i32, i32
  }
  func.func @transform_6(%arg0: i32) -> (i32, i32) {
    %c0_i32 = arith.constant 0 : i32
    %c0_i32_0 = arith.constant 0 : i32
    %c0_i32_1 = arith.constant 0 : i32
    return %c0_i32, %c0_i32_0 : i32, i32
  }
}

module attributes {stable_mosaic.version = 11 : i64} {
  func.func @_convt_bn_kernel(%arg0: i32, %arg1: i32, %arg2: memref<32x1152xbf16, #tpu.memory_space<vmem>>, %arg3: memref<2304x128xbf16, #tpu.memory_space<vmem>>, %arg4: memref<8x1x4x128xf32, #tpu.memory_space<vmem>>, %arg5: memref<1x1x2x128xf32, #tpu.memory_space<vmem>>) attributes {dimension_semantics = [#tpu.dimension_semantics<parallel>, #tpu.dimension_semantics<arbitrary>], iteration_bounds = array<i64: 1, 2>, scalar_prefetch = 0 : i64, scratch_operands = 0 : i64, tpu.core_type = #tpu.core_type<tc>, window_params = [{transform_indices = @transform_0, window_bounds = array<i64: 32, 1152>}, {pipeline_mode = #tpu.pipeline_mode<synchronous>, transform_indices = @transform_1, window_bounds = array<i64: 2304, 128>}, {transform_indices = @transform_2, window_bounds = array<i64: 8, 1, 4, 128>}, {transform_indices = @transform_3, window_bounds = array<i64: 1, 1, 2, 128>}]} {
    %c0 = arith.constant 0 : index
    %c0_0 = arith.constant 0 : index
    %0 = vector.load %arg2[%c0, %c0_0] : memref<32x1152xbf16, #tpu.memory_space<vmem>>, vector<32x1152xbf16>
    %c0_i32 = arith.constant 0 : i32
    %1 = arith.cmpi eq, %arg1, %c0_i32 : i32
    %2 = arith.extui %1 : i1 to i32
    %c0_i32_1 = arith.constant 0 : i32
    %3 = arith.cmpi ne, %2, %c0_i32_1 : i32
    scf.if %3 {
      %c0_3 = arith.constant 0 : index
      %c0_4 = arith.constant 0 : index
      %7 = vector.load %arg3[%c0_3, %c0_4] : memref<2304x128xbf16, #tpu.memory_space<vmem>>, vector<1152x128xbf16>
      %cst = arith.constant dense<0.000000e+00> : vector<32x128xf32>
      %8 = tpu.matmul %0, %7, %cst {dimension_numbers = #tpu.dot_dimension_numbers<[1], [0], [0], [1], [0, 0, 1, 1], [], []>} : vector<32x1152xbf16>, vector<1152x128xbf16>, vector<32x128xf32> -> vector<32x128xf32>
      %9 = vector.extract_strided_slice %8 {offsets = [0, 0], sizes = [4, 128], strides = [1, 1]} : vector<32x128xf32> to vector<4x128xf32>
      %c0_5 = arith.constant 0 : index
      %c0_6 = arith.constant 0 : index
      %c0_7 = arith.constant 0 : index
      %c0_8 = arith.constant 0 : index
      %10 = vector.load %arg4[%c0_5, %c0_6, %c0_7, %c0_8] : memref<8x1x4x128xf32, #tpu.memory_space<vmem>>, vector<1x1x4x128xf32>
      %11 = vector.shape_cast %10 : vector<1x1x4x128xf32> to vector<4x128xf32>
      %12 = vector.shape_cast %9 : vector<4x128xf32> to vector<1x1x4x128xf32>
      tpu.vector_store %arg4[%c0_5, %c0_6, %c0_7, %c0_8], %12 {strides = array<i32>} : memref<8x1x4x128xf32, #tpu.memory_space<vmem>>, vector<1x1x4x128xf32>,
      %13 = vector.extract_strided_slice %8 {offsets = [4, 0], sizes = [4, 128], strides = [1, 1]} : vector<32x128xf32> to vector<4x128xf32>
      %c1 = arith.constant 1 : index
      %c0_9 = arith.constant 0 : index
      %c0_10 = arith.constant 0 : index
      %c0_11 = arith.constant 0 : index
      %14 = vector.load %arg4[%c1, %c0_9, %c0_10, %c0_11] : memref<8x1x4x128xf32, #tpu.memory_space<vmem>>, vector<1x1x4x128xf32>
      %15 = vector.shape_cast %14 : vector<1x1x4x128xf32> to vector<4x128xf32>
      %16 = vector.shape_cast %13 : vector<4x128xf32> to vector<1x1x4x128xf32>
      tpu.vector_store %arg4[%c1, %c0_9, %c0_10, %c0_11], %16 {strides = array<i32>} : memref<8x1x4x128xf32, #tpu.memory_space<vmem>>, vector<1x1x4x128xf32>,
      %17 = vector.extract_strided_slice %8 {offsets = [8, 0], sizes = [4, 128], strides = [1, 1]} : vector<32x128xf32> to vector<4x128xf32>
      %c2 = arith.constant 2 : index
      %c0_12 = arith.constant 0 : index
      %c0_13 = arith.constant 0 : index
      %c0_14 = arith.constant 0 : index
      %18 = vector.load %arg4[%c2, %c0_12, %c0_13, %c0_14] : memref<8x1x4x128xf32, #tpu.memory_space<vmem>>, vector<1x1x4x128xf32>
      %19 = vector.shape_cast %18 : vector<1x1x4x128xf32> to vector<4x128xf32>
      %20 = vector.shape_cast %17 : vector<4x128xf32> to vector<1x1x4x128xf32>
      tpu.vector_store %arg4[%c2, %c0_12, %c0_13, %c0_14], %20 {strides = array<i32>} : memref<8x1x4x128xf32, #tpu.memory_space<vmem>>, vector<1x1x4x128xf32>,
      %21 = vector.extract_strided_slice %8 {offsets = [12, 0], sizes = [4, 128], strides = [1, 1]} : vector<32x128xf32> to vector<4x128xf32>
      %c3 = arith.constant 3 : index
      %c0_15 = arith.constant 0 : index
      %c0_16 = arith.constant 0 : index
      %c0_17 = arith.constant 0 : index
      %22 = vector.load %arg4[%c3, %c0_15, %c0_16, %c0_17] : memref<8x1x4x128xf32, #tpu.memory_space<vmem>>, vector<1x1x4x128xf32>
      %23 = vector.shape_cast %22 : vector<1x1x4x128xf32> to vector<4x128xf32>
      %24 = vector.shape_cast %21 : vector<4x128xf32> to vector<1x1x4x128xf32>
      tpu.vector_store %arg4[%c3, %c0_15, %c0_16, %c0_17], %24 {strides = array<i32>} : memref<8x1x4x128xf32, #tpu.memory_space<vmem>>, vector<1x1x4x128xf32>,
      %25 = vector.extract_strided_slice %8 {offsets = [16, 0], sizes = [4, 128], strides = [1, 1]} : vector<32x128xf32> to vector<4x128xf32>
      %c4 = arith.constant 4 : index
      %c0_18 = arith.constant 0 : index
      %c0_19 = arith.constant 0 : index
      %c0_20 = arith.constant 0 : index
      %26 = vector.load %arg4[%c4, %c0_18, %c0_19, %c0_20] : memref<8x1x4x128xf32, #tpu.memory_space<vmem>>, vector<1x1x4x128xf32>
      %27 = vector.shape_cast %26 : vector<1x1x4x128xf32> to vector<4x128xf32>
      %28 = vector.shape_cast %25 : vector<4x128xf32> to vector<1x1x4x128xf32>
      tpu.vector_store %arg4[%c4, %c0_18, %c0_19, %c0_20], %28 {strides = array<i32>} : memref<8x1x4x128xf32, #tpu.memory_space<vmem>>, vector<1x1x4x128xf32>,
      %29 = vector.extract_strided_slice %8 {offsets = [20, 0], sizes = [4, 128], strides = [1, 1]} : vector<32x128xf32> to vector<4x128xf32>
      %c5 = arith.constant 5 : index
      %c0_21 = arith.constant 0 : index
      %c0_22 = arith.constant 0 : index
      %c0_23 = arith.constant 0 : index
      %30 = vector.load %arg4[%c5, %c0_21, %c0_22, %c0_23] : memref<8x1x4x128xf32, #tpu.memory_space<vmem>>, vector<1x1x4x128xf32>
      %31 = vector.shape_cast %30 : vector<1x1x4x128xf32> to vector<4x128xf32>
      %32 = vector.shape_cast %29 : vector<4x128xf32> to vector<1x1x4x128xf32>
      tpu.vector_store %arg4[%c5, %c0_21, %c0_22, %c0_23], %32 {strides = array<i32>} : memref<8x1x4x128xf32, #tpu.memory_space<vmem>>, vector<1x1x4x128xf32>,
      %33 = vector.extract_strided_slice %8 {offsets = [24, 0], sizes = [4, 128], strides = [1, 1]} : vector<32x128xf32> to vector<4x128xf32>
      %c6 = arith.constant 6 : index
      %c0_24 = arith.constant 0 : index
      %c0_25 = arith.constant 0 : index
      %c0_26 = arith.constant 0 : index
      %34 = vector.load %arg4[%c6, %c0_24, %c0_25, %c0_26] : memref<8x1x4x128xf32, #tpu.memory_space<vmem>>, vector<1x1x4x128xf32>
      %35 = vector.shape_cast %34 : vector<1x1x4x128xf32> to vector<4x128xf32>
      %36 = vector.shape_cast %33 : vector<4x128xf32> to vector<1x1x4x128xf32>
      tpu.vector_store %arg4[%c6, %c0_24, %c0_25, %c0_26], %36 {strides = array<i32>} : memref<8x1x4x128xf32, #tpu.memory_space<vmem>>, vector<1x1x4x128xf32>,
      %37 = vector.extract_strided_slice %8 {offsets = [28, 0], sizes = [4, 128], strides = [1, 1]} : vector<32x128xf32> to vector<4x128xf32>
      %c7 = arith.constant 7 : index
      %c0_27 = arith.constant 0 : index
      %c0_28 = arith.constant 0 : index
      %c0_29 = arith.constant 0 : index
      %38 = vector.load %arg4[%c7, %c0_27, %c0_28, %c0_29] : memref<8x1x4x128xf32, #tpu.memory_space<vmem>>, vector<1x1x4x128xf32>
      %39 = vector.shape_cast %38 : vector<1x1x4x128xf32> to vector<4x128xf32>
      %40 = vector.shape_cast %37 : vector<4x128xf32> to vector<1x1x4x128xf32>
      tpu.vector_store %arg4[%c7, %c0_27, %c0_28, %c0_29], %40 {strides = array<i32>} : memref<8x1x4x128xf32, #tpu.memory_space<vmem>>, vector<1x1x4x128xf32>,
      %cst_30 = arith.constant dense<0.000000e+00> : vector<128xf32>
      %41 = vector.multi_reduction <add>, %8, %cst_30 [0] : vector<32x128xf32> to vector<128xf32>
      %42 = vector.shape_cast %41 : vector<128xf32> to vector<1x128xf32>
      %43 = arith.mulf %8, %8 : vector<32x128xf32>
      %cst_31 = arith.constant dense<0.000000e+00> : vector<128xf32>
      %44 = vector.multi_reduction <add>, %43, %cst_31 [0] : vector<32x128xf32> to vector<128xf32>
      %45 = vector.shape_cast %44 : vector<128xf32> to vector<1x128xf32>
      %46 = tpu.concatenate %42, %45 in 0 : vector<1x128xf32>, vector<1x128xf32> -> vector<2x128xf32>
      %47 = vector.shape_cast %46 : vector<2x128xf32> to vector<1x1x2x128xf32>
      %c0_32 = arith.constant 0 : index
      %c0_33 = arith.constant 0 : index
      %c0_34 = arith.constant 0 : index
      %c0_35 = arith.constant 0 : index
      %48 = vector.load %arg5[%c0_32, %c0_33, %c0_34, %c0_35] : memref<1x1x2x128xf32, #tpu.memory_space<vmem>>, vector<1x1x2x128xf32>
      tpu.vector_store %arg5[%c0_32, %c0_33, %c0_34, %c0_35], %47 {strides = array<i32>} : memref<1x1x2x128xf32, #tpu.memory_space<vmem>>, vector<1x1x2x128xf32>,
    } else {
    }
    %c1_i32 = arith.constant 1 : i32
    %4 = arith.cmpi eq, %arg1, %c1_i32 : i32
    %5 = arith.extui %4 : i1 to i32
    %c0_i32_2 = arith.constant 0 : i32
    %6 = arith.cmpi ne, %5, %c0_i32_2 : i32
    scf.if %6 {
      %c1152 = arith.constant 1152 : index
      %c0_3 = arith.constant 0 : index
      %7 = vector.load %arg3[%c1152, %c0_3] : memref<2304x128xbf16, #tpu.memory_space<vmem>>, vector<1152x128xbf16>
      %cst = arith.constant dense<0.000000e+00> : vector<32x128xf32>
      %8 = tpu.matmul %0, %7, %cst {dimension_numbers = #tpu.dot_dimension_numbers<[1], [0], [0], [1], [0, 0, 1, 1], [], []>} : vector<32x1152xbf16>, vector<1152x128xbf16>, vector<32x128xf32> -> vector<32x128xf32>
      %9 = vector.extract_strided_slice %8 {offsets = [0, 0], sizes = [4, 128], strides = [1, 1]} : vector<32x128xf32> to vector<4x128xf32>
      %c0_4 = arith.constant 0 : index
      %c0_5 = arith.constant 0 : index
      %c0_6 = arith.constant 0 : index
      %c0_7 = arith.constant 0 : index
      %10 = vector.load %arg4[%c0_4, %c0_5, %c0_6, %c0_7] : memref<8x1x4x128xf32, #tpu.memory_space<vmem>>, vector<1x1x4x128xf32>
      %11 = vector.shape_cast %10 : vector<1x1x4x128xf32> to vector<4x128xf32>
      %12 = vector.shape_cast %9 : vector<4x128xf32> to vector<1x1x4x128xf32>
      tpu.vector_store %arg4[%c0_4, %c0_5, %c0_6, %c0_7], %12 {strides = array<i32>} : memref<8x1x4x128xf32, #tpu.memory_space<vmem>>, vector<1x1x4x128xf32>,
      %13 = vector.extract_strided_slice %8 {offsets = [4, 0], sizes = [4, 128], strides = [1, 1]} : vector<32x128xf32> to vector<4x128xf32>
      %c1 = arith.constant 1 : index
      %c0_8 = arith.constant 0 : index
      %c0_9 = arith.constant 0 : index
      %c0_10 = arith.constant 0 : index
      %14 = vector.load %arg4[%c1, %c0_8, %c0_9, %c0_10] : memref<8x1x4x128xf32, #tpu.memory_space<vmem>>, vector<1x1x4x128xf32>
      %15 = vector.shape_cast %14 : vector<1x1x4x128xf32> to vector<4x128xf32>
      %16 = vector.shape_cast %13 : vector<4x128xf32> to vector<1x1x4x128xf32>
      tpu.vector_store %arg4[%c1, %c0_8, %c0_9, %c0_10], %16 {strides = array<i32>} : memref<8x1x4x128xf32, #tpu.memory_space<vmem>>, vector<1x1x4x128xf32>,
      %17 = vector.extract_strided_slice %8 {offsets = [8, 0], sizes = [4, 128], strides = [1, 1]} : vector<32x128xf32> to vector<4x128xf32>
      %c2 = arith.constant 2 : index
      %c0_11 = arith.constant 0 : index
      %c0_12 = arith.constant 0 : index
      %c0_13 = arith.constant 0 : index
      %18 = vector.load %arg4[%c2, %c0_11, %c0_12, %c0_13] : memref<8x1x4x128xf32, #tpu.memory_space<vmem>>, vector<1x1x4x128xf32>
      %19 = vector.shape_cast %18 : vector<1x1x4x128xf32> to vector<4x128xf32>
      %20 = vector.shape_cast %17 : vector<4x128xf32> to vector<1x1x4x128xf32>
      tpu.vector_store %arg4[%c2, %c0_11, %c0_12, %c0_13], %20 {strides = array<i32>} : memref<8x1x4x128xf32, #tpu.memory_space<vmem>>, vector<1x1x4x128xf32>,
      %21 = vector.extract_strided_slice %8 {offsets = [12, 0], sizes = [4, 128], strides = [1, 1]} : vector<32x128xf32> to vector<4x128xf32>
      %c3 = arith.constant 3 : index
      %c0_14 = arith.constant 0 : index
      %c0_15 = arith.constant 0 : index
      %c0_16 = arith.constant 0 : index
      %22 = vector.load %arg4[%c3, %c0_14, %c0_15, %c0_16] : memref<8x1x4x128xf32, #tpu.memory_space<vmem>>, vector<1x1x4x128xf32>
      %23 = vector.shape_cast %22 : vector<1x1x4x128xf32> to vector<4x128xf32>
      %24 = vector.shape_cast %21 : vector<4x128xf32> to vector<1x1x4x128xf32>
      tpu.vector_store %arg4[%c3, %c0_14, %c0_15, %c0_16], %24 {strides = array<i32>} : memref<8x1x4x128xf32, #tpu.memory_space<vmem>>, vector<1x1x4x128xf32>,
      %25 = vector.extract_strided_slice %8 {offsets = [16, 0], sizes = [4, 128], strides = [1, 1]} : vector<32x128xf32> to vector<4x128xf32>
      %c4 = arith.constant 4 : index
      %c0_17 = arith.constant 0 : index
      %c0_18 = arith.constant 0 : index
      %c0_19 = arith.constant 0 : index
      %26 = vector.load %arg4[%c4, %c0_17, %c0_18, %c0_19] : memref<8x1x4x128xf32, #tpu.memory_space<vmem>>, vector<1x1x4x128xf32>
      %27 = vector.shape_cast %26 : vector<1x1x4x128xf32> to vector<4x128xf32>
      %28 = vector.shape_cast %25 : vector<4x128xf32> to vector<1x1x4x128xf32>
      tpu.vector_store %arg4[%c4, %c0_17, %c0_18, %c0_19], %28 {strides = array<i32>} : memref<8x1x4x128xf32, #tpu.memory_space<vmem>>, vector<1x1x4x128xf32>,
      %29 = vector.extract_strided_slice %8 {offsets = [20, 0], sizes = [4, 128], strides = [1, 1]} : vector<32x128xf32> to vector<4x128xf32>
      %c5 = arith.constant 5 : index
      %c0_20 = arith.constant 0 : index
      %c0_21 = arith.constant 0 : index
      %c0_22 = arith.constant 0 : index
      %30 = vector.load %arg4[%c5, %c0_20, %c0_21, %c0_22] : memref<8x1x4x128xf32, #tpu.memory_space<vmem>>, vector<1x1x4x128xf32>
      %31 = vector.shape_cast %30 : vector<1x1x4x128xf32> to vector<4x128xf32>
      %32 = vector.shape_cast %29 : vector<4x128xf32> to vector<1x1x4x128xf32>
      tpu.vector_store %arg4[%c5, %c0_20, %c0_21, %c0_22], %32 {strides = array<i32>} : memref<8x1x4x128xf32, #tpu.memory_space<vmem>>, vector<1x1x4x128xf32>,
      %33 = vector.extract_strided_slice %8 {offsets = [24, 0], sizes = [4, 128], strides = [1, 1]} : vector<32x128xf32> to vector<4x128xf32>
      %c6 = arith.constant 6 : index
      %c0_23 = arith.constant 0 : index
      %c0_24 = arith.constant 0 : index
      %c0_25 = arith.constant 0 : index
      %34 = vector.load %arg4[%c6, %c0_23, %c0_24, %c0_25] : memref<8x1x4x128xf32, #tpu.memory_space<vmem>>, vector<1x1x4x128xf32>
      %35 = vector.shape_cast %34 : vector<1x1x4x128xf32> to vector<4x128xf32>
      %36 = vector.shape_cast %33 : vector<4x128xf32> to vector<1x1x4x128xf32>
      tpu.vector_store %arg4[%c6, %c0_23, %c0_24, %c0_25], %36 {strides = array<i32>} : memref<8x1x4x128xf32, #tpu.memory_space<vmem>>, vector<1x1x4x128xf32>,
      %37 = vector.extract_strided_slice %8 {offsets = [28, 0], sizes = [4, 128], strides = [1, 1]} : vector<32x128xf32> to vector<4x128xf32>
      %c7 = arith.constant 7 : index
      %c0_26 = arith.constant 0 : index
      %c0_27 = arith.constant 0 : index
      %c0_28 = arith.constant 0 : index
      %38 = vector.load %arg4[%c7, %c0_26, %c0_27, %c0_28] : memref<8x1x4x128xf32, #tpu.memory_space<vmem>>, vector<1x1x4x128xf32>
      %39 = vector.shape_cast %38 : vector<1x1x4x128xf32> to vector<4x128xf32>
      %40 = vector.shape_cast %37 : vector<4x128xf32> to vector<1x1x4x128xf32>
      tpu.vector_store %arg4[%c7, %c0_26, %c0_27, %c0_28], %40 {strides = array<i32>} : memref<8x1x4x128xf32, #tpu.memory_space<vmem>>, vector<1x1x4x128xf32>,
      %cst_29 = arith.constant dense<0.000000e+00> : vector<128xf32>
      %41 = vector.multi_reduction <add>, %8, %cst_29 [0] : vector<32x128xf32> to vector<128xf32>
      %42 = vector.shape_cast %41 : vector<128xf32> to vector<1x128xf32>
      %43 = arith.mulf %8, %8 : vector<32x128xf32>
      %cst_30 = arith.constant dense<0.000000e+00> : vector<128xf32>
      %44 = vector.multi_reduction <add>, %43, %cst_30 [0] : vector<32x128xf32> to vector<128xf32>
      %45 = vector.shape_cast %44 : vector<128xf32> to vector<1x128xf32>
      %46 = tpu.concatenate %42, %45 in 0 : vector<1x128xf32>, vector<1x128xf32> -> vector<2x128xf32>
      %47 = vector.shape_cast %46 : vector<2x128xf32> to vector<1x1x2x128xf32>
      %c0_31 = arith.constant 0 : index
      %c0_32 = arith.constant 0 : index
      %c0_33 = arith.constant 0 : index
      %c0_34 = arith.constant 0 : index
      %48 = vector.load %arg5[%c0_31, %c0_32, %c0_33, %c0_34] : memref<1x1x2x128xf32, #tpu.memory_space<vmem>>, vector<1x1x2x128xf32>
      tpu.vector_store %arg5[%c0_31, %c0_32, %c0_33, %c0_34], %47 {strides = array<i32>} : memref<1x1x2x128xf32, #tpu.memory_space<vmem>>, vector<1x1x2x128xf32>,
    } else {
    }
    return
  }
  func.func @transform_0(%arg0: i32, %arg1: i32) -> (i32, i32) {
    %c0_i32 = arith.constant 0 : i32
    %c0_i32_0 = arith.constant 0 : i32
    return %arg0, %c0_i32 : i32, i32
  }
  func.func @transform_1(%arg0: i32, %arg1: i32) -> (i32, i32) {
    %c0_i32 = arith.constant 0 : i32
    %c0_i32_0 = arith.constant 0 : i32
    %c0_i32_1 = arith.constant 0 : i32
    return %c0_i32, %c0_i32_0 : i32, i32
  }
  func.func @transform_2(%arg0: i32, %arg1: i32) -> (i32, i32, i32, i32) {
    %c0_i32 = arith.constant 0 : i32
    %c0_i32_0 = arith.constant 0 : i32
    %c0_i32_1 = arith.constant 0 : i32
    return %arg0, %arg1, %c0_i32, %c0_i32_0 : i32, i32, i32, i32
  }
  func.func @transform_3(%arg0: i32, %arg1: i32) -> (i32, i32, i32, i32) {
    %c0_i32 = arith.constant 0 : i32
    %c0_i32_0 = arith.constant 0 : i32
    %c0_i32_1 = arith.constant 0 : i32
    return %arg0, %arg1, %c0_i32, %c0_i32_0 : i32, i32, i32, i32
  }
}

module attributes {stable_mosaic.version = 11 : i64} {
  func.func @_convt_act_kernel(%arg0: i32, %arg1: i32, %arg2: memref<128x576xbf16, #tpu.memory_space<vmem>>, %arg3: memref<1152x128xbf16, #tpu.memory_space<vmem>>, %arg4: memref<16x1x8x128xbf16, #tpu.memory_space<vmem>>) attributes {dimension_semantics = [#tpu.dimension_semantics<parallel>, #tpu.dimension_semantics<arbitrary>], iteration_bounds = array<i64: 1, 2>, scalar_prefetch = 0 : i64, scratch_operands = 0 : i64, tpu.core_type = #tpu.core_type<tc>, window_params = [{transform_indices = @transform_0, window_bounds = array<i64: 128, 576>}, {pipeline_mode = #tpu.pipeline_mode<synchronous>, transform_indices = @transform_1, window_bounds = array<i64: 1152, 128>}, {transform_indices = @transform_2, window_bounds = array<i64: 16, 1, 8, 128>}]} {
    %c0 = arith.constant 0 : index
    %c0_0 = arith.constant 0 : index
    %0 = vector.load %arg2[%c0, %c0_0] : memref<128x576xbf16, #tpu.memory_space<vmem>>, vector<128x576xbf16>
    %c0_i32 = arith.constant 0 : i32
    %1 = arith.cmpi eq, %arg1, %c0_i32 : i32
    %2 = arith.extui %1 : i1 to i32
    %c0_i32_1 = arith.constant 0 : i32
    %3 = arith.cmpi ne, %2, %c0_i32_1 : i32
    scf.if %3 {
      %c0_3 = arith.constant 0 : index
      %c0_4 = arith.constant 0 : index
      %7 = vector.load %arg3[%c0_3, %c0_4] : memref<1152x128xbf16, #tpu.memory_space<vmem>>, vector<576x128xbf16>
      %cst = arith.constant dense<0.000000e+00> : vector<128x128xf32>
      %8 = tpu.matmul %0, %7, %cst {dimension_numbers = #tpu.dot_dimension_numbers<[1], [0], [0], [1], [0, 0, 1, 1], [], []>} : vector<128x576xbf16>, vector<576x128xbf16>, vector<128x128xf32> -> vector<128x128xf32>
      %9 = math.tanh %8 : vector<128x128xf32>
      %10 = arith.truncf %9 : vector<128x128xf32> to vector<128x128xbf16>
      %11 = vector.shape_cast %10 : vector<128x128xbf16> to vector<16x1x8x128xbf16>
      %c0_5 = arith.constant 0 : index
      %c0_6 = arith.constant 0 : index
      %c0_7 = arith.constant 0 : index
      %c0_8 = arith.constant 0 : index
      %12 = vector.load %arg4[%c0_5, %c0_6, %c0_7, %c0_8] : memref<16x1x8x128xbf16, #tpu.memory_space<vmem>>, vector<16x1x8x128xbf16>
      tpu.vector_store %arg4[%c0_5, %c0_6, %c0_7, %c0_8], %11 {strides = array<i32>} : memref<16x1x8x128xbf16, #tpu.memory_space<vmem>>, vector<16x1x8x128xbf16>,
    } else {
    }
    %c1_i32 = arith.constant 1 : i32
    %4 = arith.cmpi eq, %arg1, %c1_i32 : i32
    %5 = arith.extui %4 : i1 to i32
    %c0_i32_2 = arith.constant 0 : i32
    %6 = arith.cmpi ne, %5, %c0_i32_2 : i32
    scf.if %6 {
      %c576 = arith.constant 576 : index
      %c0_3 = arith.constant 0 : index
      %7 = vector.load %arg3[%c576, %c0_3] : memref<1152x128xbf16, #tpu.memory_space<vmem>>, vector<576x128xbf16>
      %cst = arith.constant dense<0.000000e+00> : vector<128x128xf32>
      %8 = tpu.matmul %0, %7, %cst {dimension_numbers = #tpu.dot_dimension_numbers<[1], [0], [0], [1], [0, 0, 1, 1], [], []>} : vector<128x576xbf16>, vector<576x128xbf16>, vector<128x128xf32> -> vector<128x128xf32>
      %9 = math.tanh %8 : vector<128x128xf32>
      %10 = arith.truncf %9 : vector<128x128xf32> to vector<128x128xbf16>
      %11 = vector.shape_cast %10 : vector<128x128xbf16> to vector<16x1x8x128xbf16>
      %c0_4 = arith.constant 0 : index
      %c0_5 = arith.constant 0 : index
      %c0_6 = arith.constant 0 : index
      %c0_7 = arith.constant 0 : index
      %12 = vector.load %arg4[%c0_4, %c0_5, %c0_6, %c0_7] : memref<16x1x8x128xbf16, #tpu.memory_space<vmem>>, vector<16x1x8x128xbf16>
      tpu.vector_store %arg4[%c0_4, %c0_5, %c0_6, %c0_7], %11 {strides = array<i32>} : memref<16x1x8x128xbf16, #tpu.memory_space<vmem>>, vector<16x1x8x128xbf16>,
    } else {
    }
    return
  }
  func.func @transform_0(%arg0: i32, %arg1: i32) -> (i32, i32) {
    %c0_i32 = arith.constant 0 : i32
    %c0_i32_0 = arith.constant 0 : i32
    return %arg0, %c0_i32 : i32, i32
  }
  func.func @transform_1(%arg0: i32, %arg1: i32) -> (i32, i32) {
    %c0_i32 = arith.constant 0 : i32
    %c0_i32_0 = arith.constant 0 : i32
    %c0_i32_1 = arith.constant 0 : i32
    return %c0_i32, %c0_i32_0 : i32, i32
  }
  func.func @transform_2(%arg0: i32, %arg1: i32) -> (i32, i32, i32, i32) {
    %c0_i32 = arith.constant 0 : i32
    %c0_i32_0 = arith.constant 0 : i32
    %c0_i32_1 = arith.constant 0 : i32
    return %arg0, %arg1, %c0_i32, %c0_i32_0 : i32, i32, i32, i32
  }
}

</mosaic_0001>

<bundles_post_ra>
// kernel: tile.18
= control target key start
LH: loop header
LB: loop body
LE: loop exit
PB: predicated region body
PF: predicated region fallthrough
CT: control target
= control target key end

     0   :  { %s22_s0 = inlined_call_operand.vmem [shape: f32[64], index: 0, kind: input, shape index: {}]   ;;  %s23_s1 = inlined_call_operand.vmem [shape: f32[2,64], index: 1, kind: output, shape index: {}]  }
   0x1   :  { %v4_v0 = vld [vmem:[%s22_s0] ss:$0 sm:$0xff] }
   0x2   :  { %5 = vst [vmem:[%s23_s1] sm:$0x3] %v4_v0 }

// kernel: _lambda_.3
= control target key start
LH: loop header
LB: loop body
LE: loop exit
PB: predicated region body
PF: predicated region fallthrough
CT: control target
= control target key end

     0   :  { %11 = vsyncpa [#allocation3], 0  ;;  %s1645_s0 = inlined_call_operand.vmem [shape: bf16[2,42], index: 0, kind: input, shape index: {}]   ;;  %s1646_s1 = inlined_call_operand.hbm [shape: bf16[42,32], index: 1, kind: input, shape index: {}]   ;;  %s1647_s2 = inlined_call_operand.hbm [shape: f32[1,32], index: 2, kind: input, shape index: {}]   ;;  %s1648_s3 = inlined_call_operand.vmem [shape: bf16[32,2048], index: 3, kind: input, shape index: {}]   ;;  %s1649_s4 = inlined_call_operand.hbm [shape: f32[1,128], index: 4, kind: input, shape index: {}]   ;;  %s1650_s5 = inlined_call_operand.hbm [shape: f32[1,128], index: 5, kind: input, shape index: {}]   ;;  %s1651_s6 = inlined_call_operand.vmem [shape: bf16[2,2048], index: 6, kind: output, shape index: {}]  }
   0x1   :  { %12 = vsyncpa [#allocation5], 0 }
   0x2   :  { %13 = vsyncpa [#allocation8], 0  ;;  %s1229_s21 = smov [#allocation4]   ;;  %s1230_s23 = smov [#allocation2]  }
   0x3   :  { %s34_s22 = sshll.u32 %s1229_s21, 4  ;;  %s21_s24 = sshll.u32 %s1230_s23, 4  ;;  %s35_s22 = int_to_ptr.vmem [resolvable:$true] %s34_s22  ;;  %s1273_s24 = int_to_ptr.vmem [resolvable:$true] %s21_s24 }
   0x4   :  { %s1135_s27 = scalar_lea.hbm %s1647_s2, 16 }
   0x5   :  { %p1136_p0 = scmp.ne.s32.totalorder %s1647_s2, %s1135_s27  ;;  %p1139_p1 = scmp.lt.u32.totalorder %s1135_s27, %s1647_s2 }
   0x7   :  { %p1141_p2 = pnand %p1139_p1, %p1136_p0 }
   0x9   :  { %1144 = shalt.err (!%p1141_p2)
}
   0xa   :  { %s1145_s8 = scalar_lea.vmem %s35_s22, 16  ;;  %s1149_s9 = scalar_lea.vmem %s35_s22, 32 }
   0xb   :  { %p1146_p3 = scmp.ne.s32.totalorder %s35_s22, %s1145_s8  ;;  %p1150_p4 = scmp.lt.s32.totalorder %s35_s22, %s35_s22 }
   0xc   :  { %p1151_p5 = scmp.lt.s32.totalorder %s1149_s9, %s1145_s8 }
   0xe   :  { %p1152_p6 = por %p1151_p5, %p1150_p4 }
  0x10   :  { %p1153_p7 = pnand %p1152_p6, %p1146_p3 }
  0x12   :  { %1156 = shalt.err (!%p1153_p7)
}
  0x13   :  { %37 = dma.hbm_to_vmem [thread:$0]  %s1647_s2, 16, %s35_s22, [#allocation5]  }
  0x14   :  { %s1157_s14 = scalar_lea.hbm %s1646_s1, 384 }
  0x15   :  { %p1158_p8 = scmp.ne.s32.totalorder %s1646_s1, %s1157_s14  ;;  %p1161_p9 = scmp.lt.u32.totalorder %s1157_s14, %s1646_s1 }
  0x17   :  { %p1163_p10 = pnand %p1161_p9, %p1158_p8 }
  0x19   :  { %1166 = shalt.err (!%p1163_p10)
}
  0x1a   :  { %s1167_s19 = scalar_lea.vmem %s1273_s24, 384  ;;  %p1172_p12 = scmp.lt.s32.totalorder %s1273_s24, %s1273_s24 }
  0x1b   :  { %p1168_p11 = scmp.ne.s32.totalorder %s1273_s24, %s1167_s19  ;;  %p1173_p13 = scmp.lt.s32.totalorder %s1167_s19, %s1167_s19 }
  0x1d   :  { %p1174_p0 = por %p1173_p13, %p1172_p12 }
  0x1f   :  { %p1175_p1 = pnand %p1174_p0, %p1168_p11 }
  0x21   :  { %1178 = shalt.err (!%p1175_p1)
}
  0x22   :  { %s1231_s2 = smov 64   ;;  %s1232_s20 = smov 4  }
  0x23   :  { %27 = dma.hbm_to_vmem [thread:$0]  %s1646_s1, 384, %s1273_s24, [#allocation3], %s1231_s2, %s1231_s2, %s1232_s20  }
  0x24   :  { %s1233_s23 = smov [#allocation6]   ;;  %s1234_s26 = smov [#allocation7]  }
  0x25   :  { %s46_s25 = sshll.u32 %s1233_s23, 4  ;;  %s56_s27 = sshll.u32 %s1234_s26, 4  ;;  %s47_s25 = int_to_ptr.vmem [resolvable:$true] %s46_s25  ;;  %s57_s27 = int_to_ptr.vmem [resolvable:$true] %s56_s27 }
  0x26   :  { %s1179_s30 = scalar_lea.hbm %s1649_s4, 16 }
  0x27   :  { %p1180_p2 = scmp.ne.s32.totalorder %s1649_s4, %s1179_s30  ;;  %p1183_p3 = scmp.lt.u32.totalorder %s1179_s30, %s1649_s4 }
  0x29   :  { %p1185_p4 = pnand %p1183_p3, %p1180_p2 }
  0x2b   :  { %1188 = shalt.err (!%p1185_p4)
}
  0x2c   :  { %s1189_s1 = scalar_lea.vmem %s47_s25, 16  ;;  %s1193_s24 = scalar_lea.vmem %s47_s25, 32 }
  0x2d   :  { %p1190_p5 = scmp.ne.s32.totalorder %s47_s25, %s1189_s1  ;;  %p1194_p6 = scmp.lt.s32.totalorder %s47_s25, %s47_s25 }
  0x2e   :  { %p1195_p7 = scmp.lt.s32.totalorder %s1193_s24, %s1189_s1 }
  0x30   :  { %p1196_p8 = por %p1195_p7, %p1194_p6 }
  0x32   :  { %p1197_p9 = pnand %p1196_p8, %p1190_p5 }
  0x34   :  { %1200 = shalt.err (!%p1197_p9)
}
  0x35   :  { %49 = dma.hbm_to_vmem [thread:$0]  %s1649_s4, 16, %s47_s25, [#allocation5]  }
  0x36   :  { %s1201_s15 = scalar_lea.hbm %s1650_s5, 16 }
  0x37   :  { %p1202_p10 = scmp.ne.s32.totalorder %s1650_s5, %s1201_s15  ;;  %p1205_p11 = scmp.lt.u32.totalorder %s1201_s15, %s1650_s5 }
  0x39   :  { %p1207_p12 = pnand %p1205_p11, %p1202_p10 }
  0x3b   :  { %1210 = shalt.err (!%p1207_p12)
}
  0x3c   :  { %s1211_s2 = scalar_lea.vmem %s57_s27, 16  ;;  %s1215_s20 = scalar_lea.vmem %s57_s27, 32 }
  0x3d   :  { %p1212_p13 = scmp.ne.s32.totalorder %s57_s27, %s1211_s2  ;;  %p1216_p0 = scmp.lt.s32.totalorder %s57_s27, %s57_s27 }
  0x3e   :  { %p1217_p1 = scmp.lt.s32.totalorder %s1215_s20, %s1211_s2 }
  0x40   :  { %p1218_p2 = por %p1217_p1, %p1216_p0 }
  0x42   :  { %p1219_p3 = pnand %p1218_p2, %p1212_p13 }
  0x44   :  { %1222 = shalt.err (!%p1219_p3)
}
  0x45   :  { %59 = dma.hbm_to_vmem [thread:$0]  %s1650_s5, 16, %s57_s27, [#allocation8]  }
  0x46   :  { %1223 = dma.done.wait [#allocation3], 384  }
  0x47   :  { %1224 = vsyncadd [#allocation3], 4294966912 }
  0x48   :  { %1225 = dma.done.wait [#allocation5], 32  }
  0x49   :  { %1226 = vsyncadd [#allocation5], 4294967264 }
  0x4a   :  { %1227 = dma.done.wait [#allocation8], 16  }
  0x4b   :  { %1228 = vsyncadd [#allocation8], 4294967280  ;;  %v1235_v0 = vmov 0.0   ;;  %vm1236_vm0 = vmmov 0   ;;  %v1130_v1 = vld [vmem:[#allocation2] sm:$0xff]   ;;  %v1131_v2 = vld [vmem:[#allocation2 + $0x8] sm:$0xff]  }
  0x4c   :  { %1111 = vmatprep.subr.bf16.mxu0 %v1235_v0  ;;  %1117 = vmatprep.mubr.msk.bf16.mxu0 %vm1236_vm0, %v1235_v0  ;;  %v1132_v3 = vld [vmem:[#allocation2 + $0x10] sm:$0x1f]   ;;  %v153_v4 = vld [vmem:[%s1648_s3] sm:$0xff]  ;;  %vm108_vm1 = vcmask 1044480   ;;  %vm104_vm2 = vcmask 343040   ;;  %v154_v22 = vld [vmem:[%s1648_s3 + $0x8] sm:$0xff] }
  0x4d   :  { %1112 = vmatpush3.bf16.msra.mxu0 %v1130_v1  ;;  %v161_v5 = vld [vmem:[%s1648_s3 + $0x40] sm:$0xff]  ;;  %v155_v8 = vld [vmem:[%s1648_s3 + $0x10] sm:$0xff]  ;;  %v110_v10 = vsel %vm108_vm1, %v1132_v3, 0  ;;  %v162_v23 = vld [vmem:[%s1648_s3 + $0x48] sm:$0xff]  ;;  %v1237_v28 = vmov 0   ;;  %vm345_vm3 = vcmask 261120  }
  0x4e   :  { %1113 = vmatprep.subr.bf16.mxu0 %v1235_v0  ;;  %v1068_v6 = vcombine.high %v153_v4, %v161_v5  ;;  %v1067_v7 = vcombine.low %v153_v4, %v161_v5  ;;  %v163_v9 = vld [vmem:[%s1648_s3 + $0x50] sm:$0xff]  ;;  %v73_v12 = vld [vmem:[%s1645_s0] sm:$0x1]  ;;  %v1069_v25 = vcombine.low %v154_v22, %v162_v23  ;;  %v1070_v26 = vcombine.high %v154_v22, %v162_v23  ;;  %v1062_v31 = vld [vmem:[#allocation4] ss:$0 sm:$0xff] }
  0x4f   :  { %v1072_v11 = vcombine.high %v155_v8, %v163_v9  ;;  %v1071_v13 = vcombine.low %v155_v8, %v163_v9  ;;  %v169_v14 = vld [vmem:[%s1648_s3 + $0x80] sm:$0xff]  ;;  %v171_v16 = vld [vmem:[%s1648_s3 + $0x90] sm:$0xff]  ;;  %381 = vmatprep.mubr.bf16.mxu1 %v1237_v28  ;;  %v170_v32 = vld [vmem:[%s1648_s3 + $0x88] sm:$0xff]  ;;  %vm677_vm4 = vcmask 1041408  }
  0x50   :  { %349 = vmatprep.subr.bf16.mxu1 %v1068_v6  ;;  %v177_v15 = vld [vmem:[%s1648_s3 + $0xc0] sm:$0xff]  ;;  %v179_v18 = vld [vmem:[%s1648_s3 + $0xd0] sm:$0xff]  ;;  %v178_v34 = vld [vmem:[%s1648_s3 + $0xc8] sm:$0xff] }
  0x51   :  { %1114 = vmatpush3.bf16.msra.mxu0 %v1131_v2  ;;  %350 = vmatpush1.bf16.msra.mxu1 %v1067_v7  ;;  %v1084_v17 = vcombine.high %v169_v14, %v177_v15  ;;  %v1083_v19 = vcombine.low %v169_v14, %v177_v15  ;;  %v1087_v20 = vcombine.low %v171_v16, %v179_v18  ;;  %v157_v24 = vld [vmem:[%s1648_s3 + $0x20] sm:$0xff]  ;;  %v156_v44 = vld [vmem:[%s1648_s3 + $0x18] sm:$0xff]  ;;  %v159_v46 = vld [vmem:[%s1648_s3 + $0x30] sm:$0xff] }
  0x52   :  { %1115 = vmatprep.subr.bf16.mxu0 %v1235_v0  ;;  %v1088_v21 = vcombine.high %v171_v16, %v179_v18  ;;  %v165_v27 = vld [vmem:[%s1648_s3 + $0x60] sm:$0xff]  ;;  %v1086_v42 = vcombine.high %v170_v32, %v178_v34  ;;  %v164_v45 = vld [vmem:[%s1648_s3 + $0x58] sm:$0xff]  ;;  %v167_v47 = vld [vmem:[%s1648_s3 + $0x70] sm:$0xff]  ;;  %v1085_v48 = vcombine.low %v170_v32, %v178_v34 }
  0x53   :  { %351 = vmatprep.subr.bf16.mxu1 %v1084_v17  ;;  %v1075_v29 = vcombine.low %v157_v24, %v165_v27  ;;  %v1076_v30 = vcombine.high %v157_v24, %v165_v27  ;;  %v173_v35 = vld [vmem:[%s1648_s3 + $0xa0] sm:$0xff]  ;;  %v1074_v50 = vcombine.high %v156_v44, %v164_v45  ;;  %v1080_v51 = vcombine.high %v159_v46, %v167_v47  ;;  %v172_v52 = vld [vmem:[%s1648_s3 + $0x98] sm:$0xff]  ;;  %v175_v54 = vld [vmem:[%s1648_s3 + $0xb0] sm:$0xff] }
  0x54   :  { %v181_v36 = vld [vmem:[%s1648_s3 + $0xe0] sm:$0xff]  ;;  %v180_v53 = vld [vmem:[%s1648_s3 + $0xd8] sm:$0xff]  ;;  %v183_v55 = vld [vmem:[%s1648_s3 + $0xf0] sm:$0xff]  ;;  %v1073_v56 = vcombine.low %v156_v44, %v164_v45  ;;  %v1079_v57 = vcombine.low %v159_v46, %v167_v47 }
  0x55   :  { %1116 = vmatpush3.bf16.msra.mxu0 %v110_v10  ;;  %352 = vmatpush1.bf16.msra.mxu1 %v1083_v19  ;;  %v1092_v43 = vcombine.high %v173_v35, %v181_v36  ;;  %v1091_v49 = vcombine.low %v173_v35, %v181_v36  ;;  %v1090_v58 = vcombine.high %v172_v52, %v180_v53  ;;  %v158_v60 = vld [vmem:[%s1648_s3 + $0x28] sm:$0xff]  ;;  %v160_v5 = vld [vmem:[%s1648_s3 + $0x38] sm:$0xff] }
  0x56   :  { %431 = vmatprep.subr.bf16.mxu0 %v1072_v11  ;;  %390 = vmatprep.subr.bf16.mxu1 %v1070_v26  ;;  %v1096_v59 = vcombine.high %v175_v54, %v183_v55  ;;  %v166_v61 = vld [vmem:[%s1648_s3 + $0x68] sm:$0xff]  ;;  %v1089_v62 = vcombine.low %v172_v52, %v180_v53  ;;  %v1095_v63 = vcombine.low %v175_v54, %v183_v55  ;;  %v168_v6 = vld [vmem:[%s1648_s3 + $0x78] sm:$0xff] }
  0x57   :  { %v1078_v0 = vcombine.high %v158_v60, %v166_v61  ;;  %v174_v1 = vld [vmem:[%s1648_s3 + $0xa8] sm:$0xff]  ;;  %v1077_v3 = vcombine.low %v158_v60, %v166_v61  ;;  %v1082_v8 = vcombine.high %v160_v5, %v168_v6  ;;  %v176_v9 = vld [vmem:[%s1648_s3 + $0xb8] sm:$0xff]  ;;  %v1081_v11 = vcombine.low %v160_v5, %v168_v6 }
  0x58   :  { %1118 = vmatmul.mubr.msk.bf16.vlgmr.msra.gmra.mrb[0].mxu0 %vm104_vm2, %v73_v12  ;;  %v182_v2 = vld [vmem:[%s1648_s3 + $0xe8] sm:$0xff]  ;;  %v184_v10 = vld [vmem:[%s1648_s3 + $0xf8] sm:$0xff] }
  0x59   :  { %432 = vmatpush1.bf16.msra.mxu0 %v1071_v13  ;;  %463 = vmatprep.mubr.bf16.mxu0 %v1237_v28  ;;  %v1094_v4 = vcombine.high %v174_v1, %v182_v2  ;;  %v1093_v7 = vcombine.low %v174_v1, %v182_v2  ;;  %v1098_v12 = vcombine.high %v176_v9, %v184_v10 }
  0x5a   :  { %433 = vmatprep.subr.bf16.mxu0 %v1088_v21  ;;  %v1097_v13 = vcombine.low %v176_v9, %v184_v10 }
  0x5d   :  { %434 = vmatpush1.bf16.msra.mxu0 %v1087_v20 }
  0x5e   :  { %513 = vmatprep.subr.bf16.mxu0 %v1076_v30 }
 0x12b   :  { %v146_v33 = vpop.f32.mrb[0].mxu0 }
 0x12c   :  { %v147_v37 = vadd.f32 %v1062_v31, %v146_v33  ;;  %v1119_v38 = vpop.f32.mrb[1].mxu0 }
 0x12d   :  { %v149_v39 = vpop.f32.mrb[2].mxu0 }
 0x12e   :  { %v1381_v40 = vpack.c.bf16 %v147_v37, %v147_v37  ;;  %v1120_v41 = vpop.f32.mrb[3].mxu0 }
 0x130   :  { %1099 = vmatmul.mubr.msk.bf16.vlgmr.msra.gmra.mrb[0].mxu1 %vm345_vm3, %v1381_v40  ;;  %1101 = vmatmul.mubr.msk.bf16.vlgmr.msra.gmra.mrb[4].mxu0 %vm345_vm3, %v1381_v40 }
 0x131   :  { %391 = vmatpush1.bf16.msra.mxu1 %v1069_v25  ;;  %514 = vmatpush1.bf16.msra.mxu0 %v1075_v29 }
 0x132   :  { %392 = vmatprep.subr.bf16.mxu1 %v1086_v42  ;;  %515 = vmatprep.subr.bf16.mxu0 %v1092_v43 }
 0x133   :  { %422 = vmatprep.mubr.bf16.mxu1 %v1237_v28  ;;  %545 = vmatprep.mubr.bf16.mxu0 %v1237_v28 }
 0x135   :  { %393 = vmatpush1.bf16.msra.mxu1 %v1085_v48  ;;  %516 = vmatpush1.bf16.msra.mxu0 %v1091_v49 }
 0x136   :  { %472 = vmatprep.subr.bf16.mxu1 %v1074_v50  ;;  %595 = vmatprep.subr.bf16.mxu0 %v1080_v51 }
 0x138   :  { %1100 = vmatmul.mubr.msk.bf16.vlgmr.msra.gmra.mrb[4].mxu1 %vm345_vm3, %v1381_v40  ;;  %1103 = vmatmul.mubr.msk.bf16.vlgmr.msra.gmra.mrb[8].mxu0 %vm345_vm3, %v1381_v40 }
 0x139   :  { %473 = vmatpush1.bf16.msra.mxu1 %v1073_v56  ;;  %596 = vmatpush1.bf16.msra.mxu0 %v1079_v57 }
 0x13a   :  { %474 = vmatprep.subr.bf16.mxu1 %v1090_v58  ;;  %597 = vmatprep.subr.bf16.mxu0 %v1096_v59 }
 0x13b   :  { %504 = vmatprep.mubr.bf16.mxu1 %v1237_v28  ;;  %627 = vmatprep.mubr.bf16.mxu0 %v1237_v28 }
 0x13d   :  { %475 = vmatpush1.bf16.msra.mxu1 %v1089_v62  ;;  %598 = vmatpush1.bf16.msra.mxu0 %v1095_v63 }
 0x13e   :  { %554 = vmatprep.subr.bf16.mxu1 %v1078_v0 }
 0x140   :  { %1102 = vmatmul.mubr.msk.bf16.vlgmr.msra.gmra.mrb[8].mxu1 %vm345_vm3, %v1381_v40  ;;  %1105 = vmatmul.mubr.msk.bf16.vlgmr.msra.gmra.mrb[12].mxu0 %vm345_vm3, %v1381_v40 }
 0x141   :  { %555 = vmatpush1.bf16.msra.mxu1 %v1077_v3  ;;  %586 = vmatprep.mubr.bf16.mxu1 %v1237_v28 }
 0x142   :  { %556 = vmatprep.subr.bf16.mxu1 %v1094_v4 }
 0x145   :  { %557 = vmatpush1.bf16.msra.mxu1 %v1093_v7 }
 0x146   :  { %636 = vmatprep.subr.bf16.mxu1 %v1082_v8 }
 0x148   :  { %1104 = vmatmul.mubr.msk.bf16.vlgmr.msra.gmra.mrb[12].mxu1 %vm345_vm3, %v1381_v40 }
 0x149   :  { %637 = vmatpush1.bf16.msra.mxu1 %v1081_v11  ;;  %668 = vmatprep.mubr.bf16.mxu1 %v1237_v28 }
 0x14a   :  { %638 = vmatprep.subr.bf16.mxu1 %v1098_v12 }
 0x14d   :  { %639 = vmatpush1.bf16.msra.mxu1 %v1097_v13 }
 0x150   :  { %1106 = vmatmul.mubr.msk.bf16.vlgmr.msra.gmra.mrb[16].mxu1 %vm345_vm3, %v1381_v40 }
 0x203   :  { %v1453_v14 = vpop.f32.mrb[0].mxu1  ;;  %v1455_v15 = vpop.f32.mrb[4].mxu0 }
 0x204   :  { %v678_v16 = vsel %vm677_vm4, %v1453_v14, 0.0  ;;  %v686_v17 = vmul.f32 %v1453_v14, %v1453_v14  ;;  %v746_v18 = vsel %vm677_vm4, %v1455_v15, 0.0  ;;  %v754_v19 = vmul.f32 %v1455_v15, %v1455_v15  ;;  %v1465_v20 = vpop.f32.mrb[1].mxu1  ;;  %v1467_v21 = vpop.f32.mrb[5].mxu0 }
 0x205   :  { %v679_v22 = vrot.slane %v678_v16, 4  ;;  %v747_v23 = vrot.slane %v746_v18, 4  ;;  %v695_v24 = vsel %vm677_vm4, %v1465_v20, 0.0  ;;  %v703_v25 = vmul.f32 %v1465_v20, %v1465_v20  ;;  %v387_v26 = vpop.f32.mrb[2].mxu1  ;;  %v469_v27 = vpop.f32.mrb[6].mxu0 }
 0x206   :  { %v687_v28 = vsel %vm677_vm4, %v686_v17, 0.0  ;;  %v755_v29 = vsel %vm677_vm4, %v754_v19, 0.0  ;;  %v696_v30 = vrot.slane %v695_v24, 4  ;;  %v763_v31 = vsel %vm677_vm4, %v1467_v21, 0.0  ;;  %v388_v32 = vpop.f32.mrb[3].mxu1  ;;  %v470_v33 = vpop.f32.mrb[7].mxu0 }
 0x207   :  { %v680_v34 = vadd.f32 %v679_v22, %v678_v16  ;;  %v688_v35 = vrot.slane %v687_v28, 4  ;;  %v748_v36 = vadd.f32 %v747_v23, %v746_v18  ;;  %v756_v37 = vrot.slane %v755_v29, 4 }
 0x208   :  { %v697_v38 = vadd.f32 %v696_v30, %v695_v24  ;;  %v704_v39 = vsel %vm677_vm4, %v703_v25, 0.0  ;;  %v764_v40 = vrot.slane %v763_v31, 4  ;;  %v771_v41 = vmul.f32 %v1467_v21, %v1467_v21 }
 0x209   :  { %v681_v42 = vrot.slane %v680_v34, 2  ;;  %v689_v43 = vadd.f32 %v688_v35, %v687_v28  ;;  %v749_v44 = vrot.slane %v748_v36, 2  ;;  %v757_v45 = vadd.f32 %v756_v37, %v755_v29 }
 0x20a   :  { %v698_v46 = vrot.slane %v697_v38, 2  ;;  %v705_v47 = vrot.slane %v704_v39, 4  ;;  %v765_v48 = vadd.f32 %v764_v40, %v763_v31  ;;  %v772_v49 = vsel %vm677_vm4, %v771_v41, 0.0 }
 0x20b   :  { %v682_v50 = vadd.f32 %v681_v42, %v680_v34  ;;  %v690_v51 = vrot.slane %v689_v43, 2  ;;  %v750_v52 = vadd.f32 %v749_v44, %v748_v36  ;;  %v1481_v53 = vpop.f32.mrb[4].mxu1  ;;  %v1483_v54 = vpop.f32.mrb[8].mxu0  ;;  %v758_v55 = vrot.slane %v757_v45, 2 }
 0x20c   :  { %v699_v56 = vadd.f32 %v698_v46, %v697_v38  ;;  %v706_v57 = vadd.f32 %v705_v47, %v704_v39  ;;  %v773_v58 = vrot.slane %v772_v49, 4  ;;  %v1485_v59 = vpop.f32.mrb[5].mxu1  ;;  %v1487_v60 = vpop.f32.mrb[9].mxu0  ;;  %v766_v0 = vrot.slane %v765_v48, 2 }
 0x20d   :  { %v683_v61 = vrot.slane %v682_v50, 1  ;;  %v691_v62 = vadd.f32 %v690_v51, %v689_v43  ;;  %v751_v63 = vrot.slane %v750_v52, 1  ;;  %v428_v1 = vpop.f32.mrb[6].mxu1  ;;  %v551_v2 = vpop.f32.mrb[10].mxu0  ;;  %v759_v10 = vadd.f32 %v758_v55, %v757_v45 }
 0x20e   :  { %v700_v3 = vrot.slane %v699_v56, 1  ;;  %v707_v4 = vrot.slane %v706_v57, 2  ;;  %v774_v5 = vadd.f32 %v773_v58, %v772_v49  ;;  %v429_v6 = vpop.f32.mrb[7].mxu1  ;;  %v552_v7 = vpop.f32.mrb[11].mxu0  ;;  %v1491_v16 = vadd.f32 %v766_v0, %v765_v48 }
 0x20f   :  { %v684_v8 = vadd.f32 %v683_v61, %v682_v50  ;;  %v692_v9 = vrot.slane %v691_v62, 1  ;;  %v1489_v13 = vadd.f32 %v751_v63, %v750_v52  ;;  %v712_v17 = vsel %vm677_vm4, %v1481_v53, 0.0 }
 0x210   :  { %v701_v11 = vadd.f32 %v700_v3, %v699_v56  ;;  %v708_v12 = vadd.f32 %v707_v4, %v706_v57  ;;  %v720_v18 = vmul.f32 %v1481_v53, %v1481_v53  ;;  %v775_v24 = vrot.slane %v774_v5, 2 }
 0x211   :  { %v693_v19 = vadd.f32 %v692_v9, %v691_v62  ;;  %v713_v25 = vrot.slane %v712_v17, 4  ;;  %v814_v27 = vsel %vm677_vm4, %v1483_v54, 0.0  ;;  %v822_v28 = vmul.f32 %v1483_v54, %v1483_v54 }
 0x212   :  { %v1497_v22 = vadd.f32 %v701_v11, %v684_v8  ;;  %v709_v23 = vrot.slane %v708_v12, 1  ;;  %v721_v26 = vsel %vm677_vm4, %v720_v18, 0.0  ;;  %v760_v31 = vrot.slane %v759_v10, 1 }
 0x213   :  { %v1504_v29 = vpop.f32.mrb[8].mxu1  ;;  %v1506_v30 = vpop.f32.mrb[12].mxu0  ;;  %v722_v33 = vrot.slane %v721_v26, 4  ;;  %v815_v34 = vrot.slane %v814_v27, 4  ;;  %v714_v37 = vadd.f32 %v713_v25, %v712_v17  ;;  %v823_v38 = vsel %vm677_vm4, %v822_v28, 0.0 }
 0x214   :  { %v710_v32 = vadd.f32 %v709_v23, %v708_v12  ;;  %v1508_v35 = vpop.f32.mrb[9].mxu1  ;;  %v1510_v36 = vpop.f32.mrb[13].mxu0  ;;  %v729_v39 = vsel %vm677_vm4, %v1485_v59, 0.0  ;;  %v737_v40 = vmul.f32 %v1485_v59, %v1485_v59  ;;  %v776_v44 = vadd.f32 %v775_v24, %v774_v5 }
 0x215   :  { %v510_v41 = vpop.f32.mrb[10].mxu1  ;;  %v633_v42 = vpop.f32.mrb[14].mxu0  ;;  %v723_v45 = vadd.f32 %v722_v33, %v721_v26  ;;  %v816_v46 = vadd.f32 %v815_v34, %v814_v27  ;;  %v715_v49 = vrot.slane %v714_v37, 2  ;;  %v824_v50 = vrot.slane %v823_v38, 4 }
 0x216   :  { %v711_v43 = vadd.f32 %v710_v32, %v693_v19  ;;  %v511_v47 = vpop.f32.mrb[11].mxu1  ;;  %v634_v48 = vpop.f32.mrb[15].mxu0  ;;  %v730_v51 = vrot.slane %v729_v39, 4  ;;  %v738_v52 = vsel %vm677_vm4, %v737_v40, 0.0  ;;  %v831_v58 = vsel %vm677_vm4, %v1487_v60, 0.0 }
 0x217   :  { %v724_v55 = vrot.slane %v723_v45, 2  ;;  %v817_v56 = vrot.slane %v816_v46, 2  ;;  %v739_v57 = vrot.slane %v738_v52, 4  ;;  %v716_v61 = vadd.f32 %v715_v49, %v714_v37 }
 0x218   :  { %v825_v62 = vadd.f32 %v824_v50, %v823_v38  ;;  %v731_v63 = vadd.f32 %v730_v51, %v729_v39  ;;  %v832_v0 = vrot.slane %v831_v58, 4  ;;  %v768_v1 = vrot.slane %v1491_v16, 1 }
 0x219   :  { %v725_v2 = vadd.f32 %v724_v55, %v723_v45  ;;  %v740_v3 = vadd.f32 %v739_v57, %v738_v52  ;;  %v839_v4 = vmul.f32 %v1487_v60, %v1487_v60  ;;  %v717_v5 = vrot.slane %v716_v61, 1 }
 0x21a   :  { %v826_v6 = vrot.slane %v825_v62, 2  ;;  %v732_v7 = vrot.slane %v731_v63, 2  ;;  %v833_v8 = vadd.f32 %v832_v0, %v831_v58  ;;  %v761_v11 = vadd.f32 %v760_v31, %v759_v10 }
 0x21b   :  { %v1523_v9 = vpop.f32.mrb[12].mxu1  ;;  %v726_v12 = vrot.slane %v725_v2, 1  ;;  %v741_v17 = vrot.slane %v740_v3, 2  ;;  %v840_v18 = vsel %vm677_vm4, %v839_v4, 0.0  ;;  %v777_v23 = vrot.slane %v776_v44, 1 }
 0x21c   :  { %v1526_v19 = vpop.f32.mrb[13].mxu1  ;;  %v718_v24 = vadd.f32 %v717_v5, %v716_v61  ;;  %v818_v25 = vadd.f32 %v817_v56, %v816_v46  ;;  %v733_v26 = vadd.f32 %v732_v7, %v731_v63  ;;  %v834_v33 = vrot.slane %v833_v8, 2 }
 0x21d   :  { %v592_v27 = vpop.f32.mrb[14].mxu1  ;;  %v727_v28 = vadd.f32 %v726_v12, %v725_v2  ;;  %v742_v32 = vadd.f32 %v741_v17, %v740_v3  ;;  %v841_v34 = vrot.slane %v840_v18, 4  ;;  %v769_v38 = vadd.f32 %v768_v1, %v1491_v16 }
 0x21e   :  { %v593_v37 = vpop.f32.mrb[15].mxu1  ;;  %v719_v10 = vadd.f32 %v718_v24, %v1497_v22  ;;  %v827_v31 = vadd.f32 %v826_v6, %v825_v62  ;;  %v734_v39 = vrot.slane %v733_v26, 1  ;;  %v780_v45 = vsel %vm677_vm4, %v1504_v29, 0.0 }
 0x21f   :  { %v728_v40 = vadd.f32 %v727_v28, %v711_v43  ;;  %v743_v41 = vrot.slane %v742_v32, 1  ;;  %v842_v42 = vadd.f32 %v841_v34, %v840_v18  ;;  %v778_v46 = vadd.f32 %v777_v23, %v776_v44 }
 0x220   :  { %v819_v47 = vrot.slane %v818_v25, 1  ;;  %v735_v48 = vadd.f32 %v734_v39, %v733_v26  ;;  %v781_v49 = vrot.slane %v780_v45, 4  ;;  %v835_v51 = vadd.f32 %v834_v33, %v833_v8 }
 0x221   :  { %v744_v50 = vadd.f32 %v743_v41, %v742_v32  ;;  %v788_v52 = vmul.f32 %v1504_v29, %v1504_v29  ;;  %v882_v16 = vsel %vm677_vm4, %v1506_v30, 0.0  ;;  %v828_v22 = vrot.slane %v827_v31, 1 }
 0x222   :  { %v736_v55 = vadd.f32 %v735_v48, %v719_v10  ;;  %v782_v43 = vadd.f32 %v781_v49, %v780_v45  ;;  %v883_v56 = vrot.slane %v882_v16, 4  ;;  %v843_v61 = vrot.slane %v842_v42, 2 }
 0x223   :  { %v1536_v57 = vpop.f32.mrb[16].mxu1  ;;  %v745_v58 = vadd.f32 %v744_v50, %v728_v40  ;;  %v789_v44 = vsel %vm677_vm4, %v788_v52, 0.0  ;;  %v890_v62 = vmul.f32 %v1506_v30, %v1506_v30  ;;  %v1544_v5 = vadd.f32 %v819_v47, %v818_v25 }
 0x224   :  { %v1541_v63 = vpop.f32.mrb[17].mxu1  ;;  %v753_v0 = vadd.f32 %v1489_v13, %v736_v55  ;;  %v783_v1 = vrot.slane %v782_v43, 2  ;;  %v790_v2 = vrot.slane %v789_v44, 4  ;;  %v884_v3 = vadd.f32 %v883_v56, %v882_v16 }
 0x225   :  { %v674_v4 = vpop.f32.mrb[18].mxu1  ;;  %v762_v6 = vadd.f32 %v761_v11, %v745_v58  ;;  %v836_v7 = vrot.slane %v835_v51, 1  ;;  %v797_v8 = vsel %vm677_vm4, %v1508_v35, 0.0  ;;  %v891_v24 = vsel %vm677_vm4, %v890_v62, 0.0 }
 0x226   :  { %v675_v12 = vpop.f32.mrb[19].mxu1  ;;  %v770_v17 = vadd.f32 %v769_v38, %v753_v0  ;;  %v784_v18 = vadd.f32 %v783_v1, %v782_v43  ;;  %v791_v23 = vadd.f32 %v790_v2, %v789_v44  ;;  %v1549_v26 = vadd.f32 %v828_v22, %v827_v31 }
 0x227   :  { %v779_v13 = vadd.f32 %v778_v46, %v762_v6  ;;  %v885_v27 = vrot.slane %v884_v3, 2  ;;  %v798_v28 = vrot.slane %v797_v8, 4  ;;  %v844_v32 = vadd.f32 %v843_v61, %v842_v42 }
 0x228   :  { %v785_v33 = vrot.slane %v784_v18, 1  ;;  %v792_v25 = vrot.slane %v791_v23, 2  ;;  %v805_v11 = vmul.f32 %v1508_v35, %v1508_v35  ;;  %v892_v34 = vrot.slane %v891_v24, 4 }
 0x229   :  { %v799_v37 = vadd.f32 %v798_v28, %v797_v8  ;;  %v899_v38 = vsel %vm677_vm4, %v1510_v36, 0.0  ;;  %v907_v10 = vmul.f32 %v1510_v36, %v1510_v36  ;;  %v837_v39 = vadd.f32 %v836_v7, %v835_v51 }
 0x22a   :  { %v786_v31 = vadd.f32 %v785_v33, %v784_v18  ;;  %v793_v40 = vadd.f32 %v792_v25, %v791_v23  ;;  %v806_v41 = vsel %vm677_vm4, %v805_v11, 0.0  ;;  %v886_v45 = vadd.f32 %v885_v27, %v884_v3 }
 0x22b   :  { %v800_v42 = vrot.slane %v799_v37, 2  ;;  %v807_v46 = vrot.slane %v806_v41, 4  ;;  %v900_v47 = vrot.slane %v899_v38, 4  ;;  %v845_v48 = vrot.slane %v844_v32, 1 }
 0x22c   :  { %v787_v49 = vadd.f32 %v786_v31, %v770_v17  ;;  %v794_v50 = vrot.slane %v793_v40, 1  ;;  %v908_v52 = vsel %vm677_vm4, %v907_v10, 0.0  ;;  %v893_v16 = vadd.f32 %v892_v34, %v891_v24 }
 0x22d   :  { %v801_v22 = vadd.f32 %v800_v42, %v799_v37  ;;  %v808_v55 = vadd.f32 %v807_v46, %v806_v41  ;;  %v901_v43 = vadd.f32 %v900_v47, %v899_v38  ;;  %v909_v58 = vrot.slane %v908_v52, 4 }
 0x22e   :  { %v795_v56 = vadd.f32 %v794_v50, %v793_v40  ;;  %v848_v51 = vsel %vm677_vm4, %v1523_v9, 0.0  ;;  %v856_v61 = vmul.f32 %v1523_v9, %v1523_v9  ;;  %v887_v44 = vrot.slane %v886_v45, 1 }
 0x22f   :  { %v802_v62 = vrot.slane %v801_v22, 1  ;;  %v809_v0 = vrot.slane %v808_v55, 2  ;;  %v902_v1 = vrot.slane %v901_v43, 2  ;;  %v910_v3 = vadd.f32 %v909_v58, %v908_v52 }
 0x230   :  { %v796_v2 = vadd.f32 %v795_v56, %v779_v13  ;;  %v849_v4 = vrot.slane %v848_v51, 4  ;;  %v857_v6 = vsel %vm677_vm4, %v856_v61, 0.0  ;;  %v846_v7 = vadd.f32 %v845_v48, %v844_v32 }
 0x231   :  { %v894_v8 = vrot.slane %v893_v16, 2  ;;  %v803_v12 = vadd.f32 %v802_v62, %v801_v22  ;;  %v810_v17 = vadd.f32 %v809_v0, %v808_v55  ;;  %v903_v18 = vadd.f32 %v902_v1, %v901_v43 }
 0x232   :  { %v850_v23 = vadd.f32 %v849_v4, %v848_v51  ;;  %v858_v24 = vrot.slane %v857_v6, 4  ;;  %v865_v27 = vsel %vm677_vm4, %v1526_v19, 0.0  ;;  %v888_v28 = vadd.f32 %v887_v44, %v886_v45 }
 0x233   :  { %v804_v33 = vadd.f32 %v803_v12, %v787_v49  ;;  %v811_v25 = vrot.slane %v810_v17, 1  ;;  %v866_v11 = vrot.slane %v865_v27, 4  ;;  %v911_v34 = vrot.slane %v910_v3, 2 }
 0x234   :  { %v851_v13 = vrot.slane %v850_v23, 2  ;;  %v859_v37 = vadd.f32 %v858_v24, %v857_v6  ;;  %v873_v38 = vmul.f32 %v1526_v19, %v1526_v19  ;;  %v895_v32 = vadd.f32 %v894_v8, %v893_v16 }
 0x235   :  { %v812_v10 = vadd.f32 %v811_v25, %v810_v17  ;;  %v821_v31 = vadd.f32 %v1544_v5, %v804_v33  ;;  %v867_v40 = vadd.f32 %v866_v11, %v865_v27  ;;  %v904_v41 = vrot.slane %v903_v18, 1 }
 0x236   :  { %v852_v42 = vadd.f32 %v851_v13, %v850_v23  ;;  %v860_v46 = vrot.slane %v859_v37, 2  ;;  %v874_v47 = vsel %vm677_vm4, %v873_v38, 0.0  ;;  %v912_v52 = vadd.f32 %v911_v34, %v910_v3 }
 0x237   :  { %v813_v45 = vadd.f32 %v812_v10, %v796_v2  ;;  %v838_v48 = vadd.f32 %v837_v39, %v821_v31  ;;  %v868_v49 = vrot.slane %v867_v40, 2  ;;  %v875_v50 = vrot.slane %v874_v47, 4 }
 0x238   :  { %v853_v22 = vrot.slane %v852_v42, 1  ;;  %v861_v55 = vadd.f32 %v860_v46, %v859_v37  ;;  %v916_v43 = vsel %vm677_vm4, %v1536_v57, 0.0  ;;  %v924_v44 = vmul.f32 %v1536_v57, %v1536_v57 }
 0x239   :  { %v830_v16 = vadd.f32 %v1549_v26, %v813_v45  ;;  %v869_v56 = vadd.f32 %v868_v49, %v867_v40  ;;  %v876_v5 = vadd.f32 %v875_v50, %v874_v47  ;;  %v917_v58 = vrot.slane %v916_v43, 4 }
 0x23a   :  { %v854_v51 = vadd.f32 %v853_v22, %v852_v42  ;;  %v862_v61 = vrot.slane %v861_v55, 1  ;;  %v933_v39 = vsel %vm677_vm4, %v1541_v63, 0.0  ;;  %v925_v6 = vsel %vm677_vm4, %v924_v44, 0.0 }
 0x23b   :  { %v847_v62 = vadd.f32 %v846_v7, %v830_v16  ;;  %v870_v0 = vrot.slane %v869_v56, 1  ;;  %v877_v1 = vrot.slane %v876_v5, 2  ;;  %v918_v2 = vadd.f32 %v917_v58, %v916_v43 }
 0x23c   :  { %v855_v3 = vadd.f32 %v854_v51, %v838_v48  ;;  %v863_v4 = vadd.f32 %v862_v61, %v861_v55  ;;  %v934_v26 = vrot.slane %v933_v39, 4  ;;  %v926_v23 = vrot.slane %v925_v6, 4 }
 0x23d   :  { %v871_v8 = vadd.f32 %v870_v0, %v869_v56  ;;  %v878_v12 = vadd.f32 %v877_v1, %v876_v5  ;;  %v919_v17 = vrot.slane %v918_v2, 2  ;;  %v896_v24 = vrot.slane %v895_v32, 1 }
 0x23e   :  { %v864_v27 = vadd.f32 %v863_v4, %v847_v62  ;;  %v935_v33 = vadd.f32 %v934_v26, %v933_v39  ;;  %v941_v25 = vmul.f32 %v1541_v63, %v1541_v63  ;;  %v927_v13 = vadd.f32 %v926_v23, %v925_v6  ;;  %v956_v23 = vld [vmem:[#allocation6] sm:$0x1] }
 0x23f   :  { %v872_v11 = vadd.f32 %v871_v8, %v855_v3  ;;  %v879_v7 = vrot.slane %v878_v12, 1  ;;  %v920_v34 = vadd.f32 %v919_v17, %v918_v2  ;;  %v905_v37 = vadd.f32 %v904_v41, %v903_v18 }
 0x240   :  { %v913_v38 = vrot.slane %v912_v52, 1  ;;  %v936_v10 = vrot.slane %v935_v33, 2  ;;  %v942_v31 = vsel %vm677_vm4, %v941_v25, 0.0  ;;  %v928_v47 = vrot.slane %v927_v13, 2  ;;  %v960_v25 = vld [vmem:[#allocation7] sm:$0x1] }
 0x241   :  { %v880_v40 = vadd.f32 %v879_v7, %v878_v12  ;;  %v889_v42 = vadd.f32 %v888_v28, %v872_v11  ;;  %v921_v46 = vrot.slane %v920_v34, 1  ;;  %v897_v45 = vadd.f32 %v896_v24, %v895_v32 }
 0x242   :  { %v937_v48 = vadd.f32 %v936_v10, %v935_v33  ;;  %v943_v49 = vrot.slane %v942_v31, 4  ;;  %v929_v43 = vadd.f32 %v928_v47, %v927_v13  ;;  %v914_v5 = vadd.f32 %v913_v38, %v912_v52 }
 0x243   :  { %v881_v50 = vadd.f32 %v880_v40, %v864_v27  ;;  %v906_v22 = vadd.f32 %v905_v37, %v889_v42  ;;  %v922_v55 = vadd.f32 %v921_v46, %v920_v34  ;;  %v964_v52 = vlaneseq }
 0x244   :  { %v938_v16 = vrot.slane %v937_v48, 1  ;;  %v944_v56 = vadd.f32 %v943_v49, %v942_v31  ;;  %v930_v41 = vrot.slane %v929_v43, 1 }
 0x245   :  { %v898_v58 = vadd.f32 %v897_v45, %v881_v50  ;;  %v923_v18 = vadd.f32 %v922_v55, %v906_v22  ;;  %v965_v17 = vshrl.u32 %v964_v52, 7 }
 0x246   :  { %v939_v51 = vadd.f32 %v938_v16, %v937_v48  ;;  %v945_v61 = vrot.slane %v944_v56, 2  ;;  %v931_v39 = vadd.f32 %v930_v41, %v929_v43 }
 0x247   :  { %v915_v44 = vadd.f32 %v914_v5, %v898_v58  ;;  %v966_v24 = vsub.s32 0, %v965_v17 }
 0x248   :  { %v940_v28 = vadd.f32 %v939_v51, %v923_v18  ;;  %v946_v62 = vadd.f32 %v945_v61, %v944_v56 }
 0x249   :  { %v932_v0 = vadd.f32 %v931_v39, %v915_v44 }
 0x24a   :  { %v947_v32 = vrot.slane %v946_v62, 1  ;;  %v951_v1 = vmul.f32 0.03125, %v940_v28 }
 0x24c   :  { %v948_v2 = vadd.f32 %v947_v32, %v946_v62  ;;  %v953_v4 = vmul.f32 %v951_v1, %v951_v1 }
 0x24e   :  { %v949_v3 = vadd.f32 %v948_v2, %v932_v0 }
 0x250   :  { %v952_v6 = vmul.f32 0.03125, %v949_v3 }
 0x252   :  { %v954_v26 = vsub.f32 %v952_v6, %v953_v4 }
 0x254   :  { %v955_v8 = vmax.f32 %v954_v26, 0.0 }
 0x256   :  { %v957_v12 = vadd.f32 1e-05, %v955_v8 }
 0x258   :  { %1133 = vrsqrt.f32 %v957_v12 }
 0x262   :  { %v1134_v27 = vpop.eup %1133 }
 0x263   :  { %v959_v33 = vmul.f32 %v1134_v27, %v956_v23 }
 0x265   :  { %v961_v11 = vmul.f32 %v959_v33, %v951_v1  ;;  %v967_v7 = vrot.slane %v959_v33, %v966_v24 }
 0x267   :  { %v962_v34 = vsub.f32 %v960_v25, %v961_v11  ;;  %v969_v13 = vmul.f32 %v967_v7, %v1453_v14  ;;  %v980_v37 = vmul.f32 %v967_v7, %v1465_v20  ;;  %v985_v38 = vmul.f32 %v967_v7, %v1481_v53 }
 0x268   :  { %v990_v10 = vmul.f32 %v967_v7, %v1485_v59  ;;  %v995_v31 = vmul.f32 %v967_v7, %v1455_v15  ;;  %v1000_v40 = vmul.f32 %v967_v7, %v1467_v21  ;;  %v1005_v42 = vmul.f32 %v967_v7, %v1504_v29 }
 0x269   :  { %v974_v46 = vrot.slane %v962_v34, %v966_v24  ;;  %v1010_v47 = vmul.f32 %v967_v7, %v1508_v35  ;;  %v1015_v45 = vmul.f32 %v967_v7, %v1483_v54  ;;  %v1020_v48 = vmul.f32 %v967_v7, %v1487_v60 }
 0x26a   :  { %v1025_v14 = vmul.f32 %v967_v7, %v1523_v9  ;;  %v1030_v20 = vmul.f32 %v967_v7, %v1526_v19  ;;  %v1035_v53 = vmul.f32 %v967_v7, %v1506_v30  ;;  %v1040_v59 = vmul.f32 %v967_v7, %v1510_v36 }
 0x26b   :  { %v976_v15 = vadd.f32 %v974_v46, %v969_v13  ;;  %v981_v49 = vadd.f32 %v980_v37, %v974_v46  ;;  %v986_v21 = vadd.f32 %v985_v38, %v974_v46  ;;  %v991_v50 = vadd.f32 %v990_v10, %v974_v46 }
 0x26c   :  { %v996_v29 = vadd.f32 %v995_v31, %v974_v46  ;;  %v1001_v22 = vadd.f32 %v1000_v40, %v974_v46  ;;  %v1006_v55 = vadd.f32 %v1005_v42, %v974_v46  ;;  %v1011_v35 = vadd.f32 %v1010_v47, %v974_v46 }
 0x26d   :  { %v977_v43 = vmax.f32 %v976_v15, 0.0  ;;  %v982_v54 = vmax.f32 %v981_v49, 0.0  ;;  %v987_v16 = vmax.f32 %v986_v21, 0.0  ;;  %v992_v60 = vmax.f32 %v991_v50, 0.0 }
 0x26e   :  { %v997_v56 = vmax.f32 %v996_v29, 0.0  ;;  %v1002_v9 = vmax.f32 %v1001_v22, 0.0  ;;  %v1007_v5 = vmax.f32 %v1006_v55, 0.0  ;;  %v1012_v19 = vmax.f32 %v1011_v35, 0.0 }
 0x26f   :  { %v978_v58 = vpack.c.bf16 %v977_v43, %v977_v43  ;;  %v983_v30 = vpack.c.bf16 %v982_v54, %v982_v54  ;;  %v988_v18 = vpack.c.bf16 %v987_v16, %v987_v16  ;;  %v993_v36 = vpack.c.bf16 %v992_v60, %v992_v60 }
 0x270   :  { %v998_v41 = vpack.c.bf16 %v997_v56, %v997_v56  ;;  %v1003_v51 = vpack.c.bf16 %v1002_v9, %v1002_v9  ;;  %v1008_v61 = vpack.c.bf16 %v1007_v5, %v1007_v5  ;;  %v1013_v44 = vpack.c.bf16 %v1012_v19, %v1012_v19 }
 0x271   :  { %979 = vst [vmem:[%s1651_s6] sm:$0x1] %v978_v58  ;;  %984 = vst [vmem:[%s1651_s6 + $0x1] sm:$0x1] %v983_v30  ;;  %v1016_v39 = vadd.f32 %v1015_v45, %v974_v46  ;;  %v1021_v28 = vadd.f32 %v1020_v48, %v974_v46  ;;  %v1026_v62 = vadd.f32 %v1025_v14, %v974_v46 }
 0x272   :  { %989 = vst [vmem:[%s1651_s6 + $0x2] sm:$0x1] %v988_v18  ;;  %994 = vst [vmem:[%s1651_s6 + $0x3] sm:$0x1] %v993_v36  ;;  %v1031_v0 = vadd.f32 %v1030_v20, %v974_v46  ;;  %v1036_v32 = vadd.f32 %v1035_v53, %v974_v46  ;;  %v1041_v1 = vadd.f32 %v1040_v59, %v974_v46 }
 0x273   :  { %999 = vst [vmem:[%s1651_s6 + $0x4] sm:$0x1] %v998_v41  ;;  %1004 = vst [vmem:[%s1651_s6 + $0x5] sm:$0x1] %v1003_v51  ;;  %v1045_v2 = vmul.f32 %v967_v7, %v1536_v57  ;;  %v1050_v3 = vmul.f32 %v967_v7, %v1541_v63  ;;  %v1017_v4 = vmax.f32 %v1016_v39, 0.0  ;;  %v1022_v6 = vmax.f32 %v1021_v28, 0.0 }
 0x274   :  { %1009 = vst [vmem:[%s1651_s6 + $0x6] sm:$0x1] %v1008_v61  ;;  %1014 = vst [vmem:[%s1651_s6 + $0x7] sm:$0x1] %v1013_v44  ;;  %v1027_v26 = vmax.f32 %v1026_v62, 0.0  ;;  %v1032_v8 = vmax.f32 %v1031_v0, 0.0 }
 0x275   :  { %v1037_v12 = vmax.f32 %v1036_v32, 0.0  ;;  %v1042_v52 = vmax.f32 %v1041_v1, 0.0  ;;  %v1046_v17 = vadd.f32 %v1045_v2, %v974_v46  ;;  %v1051_v23 = vadd.f32 %v1050_v3, %v974_v46 }
 0x276   :  { %v1018_v24 = vpack.c.bf16 %v1017_v4, %v1017_v4  ;;  %v1023_v27 = vpack.c.bf16 %v1022_v6, %v1022_v6  ;;  %v1028_v33 = vpack.c.bf16 %v1027_v26, %v1027_v26  ;;  %v1033_v25 = vpack.c.bf16 %v1032_v8, %v1032_v8 }
 0x277   :  { %v1038_v11 = vpack.c.bf16 %v1037_v12, %v1037_v12  ;;  %v1043_v34 = vpack.c.bf16 %v1042_v52, %v1042_v52  ;;  %v1047_v13 = vmax.f32 %v1046_v17, 0.0  ;;  %v1052_v37 = vmax.f32 %v1051_v23, 0.0 }
 0x278   :  { %1019 = vst [vmem:[%s1651_s6 + $0x8] sm:$0x1] %v1018_v24  ;;  %1024 = vst [vmem:[%s1651_s6 + $0x9] sm:$0x1] %v1023_v27 }
 0x279   :  { %1029 = vst [vmem:[%s1651_s6 + $0xa] sm:$0x1] %v1028_v33  ;;  %1034 = vst [vmem:[%s1651_s6 + $0xb] sm:$0x1] %v1033_v25  ;;  %v1048_v57 = vpack.c.bf16 %v1047_v13, %v1047_v13  ;;  %v1053_v63 = vpack.c.bf16 %v1052_v37, %v1052_v37 }
 0x27a   :  { %1039 = vst [vmem:[%s1651_s6 + $0xc] sm:$0x1] %v1038_v11  ;;  %1044 = vst [vmem:[%s1651_s6 + $0xd] sm:$0x1] %v1043_v34 }
 0x27b   :  { %1049 = vst [vmem:[%s1651_s6 + $0xe] sm:$0x1] %v1048_v57  ;;  %1054 = vst [vmem:[%s1651_s6 + $0xf] sm:$0x1] %v1053_v63 }
 0x27c   :  { %1059 = vsyncpa [#allocation3], 1 }
 0x27d   :  { %1060 = vsyncpa [#allocation5], 1 }
 0x27e   :  { %1061 = vsyncpa [#allocation8], 1 }

// kernel: _lambda_.4
= control target key start
LH: loop header
LB: loop body
LE: loop exit
PB: predicated region body
PF: predicated region fallthrough
CT: control target
= control target key end

     0   :  { %s3066_s12 = smov 0   ;;  %s3068_s13 = smov 0   ;;  %s3760_s0 = inlined_call_operand.vmem [shape: bf16[32,1152], index: 0, kind: input, shape index: {}]   ;;  %s3761_s1 = inlined_call_operand.vmem [shape: bf16[2304,128], index: 1, kind: input, shape index: {}]   ;;  %s3762_s2 = inlined_call_operand.vmem [shape: f32[8,2,4,128], index: 2, kind: output, shape index: {0}]   ;;  %s3763_s3 = inlined_call_operand.vmem [shape: f32[1,2,2,128], index: 3, kind: output, shape index: {1}]  }
   0x1   :  { %s3070_s14 = smov 0   ;;  %s3072_s15 = smov 0  }
   0x2   :  { %s3074_s16 = smov 0  }
   0x3 LB: > { %s2331_s17 = sadd.s32 4294967295, %s3044_s16   ;;  %s23_s18 = sadd.s32 1, %s3040_s15  ;;  %s3044_s16 = sphi %s3074_s16, %s14_s16   ;;  %s3040_s15 = sphi %s3072_s15, %s3768_s15   ;;  %s3036_s14 = sphi %s3070_s14, %s3767_s14   ;;  %s3032_s13 = sphi %s3068_s13, %s3766_s13   ;;  %s3028_s12 = sphi %s3066_s12, %s3765_s12  }
   0x4   : > { %p24_p0 = scmp.ge.s32.totalorder %s23_s18, 2  ;;  %s82_s19 = sadd.s32 1, %s3032_s13 }
   0x5   : > { %p92_p1 = scmp.ne.s32.totalorder %s3032_s13, %s3028_s12  ;;  %p93_p2 = scmp.eq.s32.totalorder %s2331_s17, 1 }
   0x6   : > { %s3770_s18 = smov (%p24_p0, %s23_s18), 0  ;;  %p2335_p4 = scmp.ge.s32.totalorder %s3044_s16, 1 }
   0x7   : > { %p3095_p3 = por %p93_p2, %p92_p1  ;;  %s78_s21 = ssub.s32 %s3040_s15, %s3770_s18 }
   0x8   : > { %p158_p5 = scmp.lt.s32.totalorder %s3044_s16, 3  ;;  %p80_p6 = scmp.eq.s32.totalorder %s78_s21, 0 }
   0xa   : > { %p159_p7 = pnand %p2335_p4, %p158_p5 }
   0xb   : > { %s3104_s22 = scalar_select %p80_p6, %s3032_s13, %s82_s19  }
   0xc   : > { %162 = sbr.rel (%p159_p7) target bundleno = 702 (0x2be), region = 28  ;;  %s177_s23 = sand.u32 (!%p159_p7), 1, %s3028_s12   ;;  %v3110_v0 = vld [vmem:[%s3760_s0] sm:$0xff] (!%p159_p7)  ;;  %v3115_v1 = vld [vmem:[%s3760_s0 + $0x8] sm:$0xff] (!%p159_p7)  ;;  %v3120_v2 = vld [vmem:[%s3760_s0 + $0x10] sm:$0xff] (!%p159_p7) }
   0xd   : > { %p200_p8 = scmp.lt.s32.totalorder (!%p159_p7), %s3036_s14, 1  ;;  %s2336_s30 = sshll.u32 (!%p159_p7), %s177_s23, 5  ;;  %v3125_v3 = vld [vmem:[%s3760_s0 + $0x18] sm:$0xff] (!%p159_p7)  ;;  %v3130_v4 = vld [vmem:[%s3760_s0 + $0x20] sm:$0xf] (!%p159_p7)  ;;  %v3135_v5 = vld [vmem:[%s3760_s0 + $0x24] sm:$0xff] (!%p159_p7) }
   0xe   : > { %v3140_v6 = vld [vmem:[%s3760_s0 + $0x2c] sm:$0xff] (!%p159_p7)  ;;  %v3145_v7 = vld [vmem:[%s3760_s0 + $0x34] sm:$0xff] (!%p159_p7)  ;;  %v3150_v8 = vld [vmem:[%s3760_s0 + $0x3c] sm:$0xff] (!%p159_p7)  ;;  %s3213_s5 = scalar_lea.vmem (!%p159_p7), [#allocation2], %s2336_s30  ;;  %p2338_p9 = scmp.ne.s32.totalorder (!%p159_p7), %s3036_s14, 0 }
   0xf   : > { %v3156_v9 = vld [vmem:[%s3760_s0 + $0x44] sm:$0xf] (!%p159_p7)  ;;  %v3161_v10 = vld [vmem:[%s3760_s0 + $0x48] sm:$0xff] (!%p159_p7)  ;;  %v3166_v11 = vld [vmem:[%s3760_s0 + $0x50] sm:$0xff] (!%p159_p7) }
  0x10   : > { %v3171_v12 = vld [vmem:[%s3760_s0 + $0x58] sm:$0xff] (!%p159_p7)  ;;  %v3176_v13 = vld [vmem:[%s3760_s0 + $0x60] sm:$0xff] (!%p159_p7)  ;;  %v3181_v14 = vld [vmem:[%s3760_s0 + $0x68] sm:$0xf] (!%p159_p7) }
  0x11   : > { %v3186_v15 = vld [vmem:[%s3760_s0 + $0x6c] sm:$0xff] (!%p159_p7)  ;;  %v3191_v16 = vld [vmem:[%s3760_s0 + $0x74] sm:$0xff] (!%p159_p7)  ;;  %v3196_v17 = vld [vmem:[%s3760_s0 + $0x7c] sm:$0xff] (!%p159_p7) }
  0x12   : > { %v3206_v18 = vld [vmem:[%s3760_s0 + $0x84] sm:$0xff] (!%p159_p7)  ;;  %v3211_v19 = vld [vmem:[%s3760_s0 + $0x8c] sm:$0xf] (!%p159_p7) }
  0x13   : > { %s201_s23 = scalar_select %p200_p8, %s3036_s14, 1 }
  0x14   : > { %230 = sbr.rel (%p2338_p9) target bundleno = 357 (0x165), region = 32  ;;  %v2862_v20 = vld [vmem:[%s3761_s1 + $0x40] sm:$0xff] (!%p2338_p9)   ;;  %v2340_v21 = vcombine.high (!%p2338_p9), %v3110_v0, %v3135_v5  ;;  %v2342_v22 = vcombine.high (!%p2338_p9), %v3115_v1, %v3140_v6  ;;  %v2866_v26 = vld [vmem:[%s3761_s1 + $0x48] sm:$0xff] (!%p2338_p9)   ;;  %v2870_v30 = vld [vmem:[%s3761_s1 + $0x50] sm:$0xff] (!%p2338_p9)   ;;  %v2339_v54 = vcombine.low (!%p2338_p9), %v3110_v0, %v3135_v5  ;;  %v2341_v55 = vcombine.low (!%p2338_p9), %v3115_v1, %v3140_v6 }
  0x15   : > { %s2337_s10 = sshll.u32 %s201_s23, 1  ;;  %v2863_v23 = vld [vmem:[%s3761_s1 + $0xc0] sm:$0xff] (!%p2338_p9)   ;;  %2538 = vmatprep.subr.bf16.mxu0 (!%p2338_p9), %v2862_v20  ;;  %v2867_v27 = vld [vmem:[%s3761_s1 + $0xc8] sm:$0xff] (!%p2338_p9)   ;;  %v2871_v31 = vld [vmem:[%s3761_s1 + $0xd0] sm:$0xff] (!%p2338_p9)   ;;  %v2349_v58 = vcombine.high (!%p2338_p9), %v3161_v10, %v3186_v15  ;;  %v2351_v61 = vcombine.high (!%p2338_p9), %v3166_v11, %v3191_v16  ;;  %vm1181_vm0 = vcmask (!%p2338_p9), 1040384  }
  0x16   : > { %s3201_s27 = scalar_lea.vmem %s3763_s3, %s2337_s10  ;;  %v2864_v24 = vld [vmem:[%s3761_s1] sm:$0xff] (!%p2338_p9)   ;;  %931 = vmatprep.mubr.bf16.mxu0 (!%p2338_p9), %v2340_v21  ;;  %2566 = vmatprep.subr.bf16.mxu1 (!%p2338_p9), %v2863_v23  ;;  %v2868_v28 = vld [vmem:[%s3761_s1 + $0x8] sm:$0xff] (!%p2338_p9)   ;;  %v2872_v32 = vld [vmem:[%s3761_s1 + $0x10] sm:$0xff] (!%p2338_p9)  }
  0x17   : > { %v2865_v25 = vld [vmem:[%s3761_s1 + $0x80] sm:$0xff] (!%p2338_p9)   ;;  %980 = vmatprep.mubr.bf16.mxu1 (!%p2338_p9), %v2342_v22  ;;  %2539 = vmatpush3.bf16.msra.mxu0 (!%p2338_p9), %v2864_v24  ;;  %v2869_v29 = vld [vmem:[%s3761_s1 + $0x88] sm:$0xff] (!%p2338_p9)   ;;  %v2873_v33 = vld [vmem:[%s3761_s1 + $0x90] sm:$0xff] (!%p2338_p9)   ;;  %v2348_v22 = vcombine.low (!%p2338_p9), %v3161_v10, %v3186_v15 }
  0x18   : > { %2567 = vmatpush3.bf16.msra.mxu1 (!%p2338_p9), %v2865_v25  ;;  %2540 = vmatprep.subr.bf16.mxu0 (!%p2338_p9), %v2866_v26  ;;  %v2874_v34 = vld [vmem:[%s3761_s1 + $0x58] sm:$0xff] (!%p2338_p9)   ;;  %v2878_v38 = vld [vmem:[%s3761_s1 + $0x60] sm:$0xff] (!%p2338_p9)   ;;  %v2882_v42 = vld [vmem:[%s3761_s1 + $0x68] sm:$0xff] (!%p2338_p9)   ;;  %v2350_v25 = vcombine.low (!%p2338_p9), %v3166_v11, %v3191_v16  ;;  %v2344_v26 = vcombine.high (!%p2338_p9), %v3120_v2, %v3145_v7 }
  0x19   : > { %2568 = vmatprep.subr.bf16.mxu1 (!%p2338_p9), %v2867_v27  ;;  %v2875_v35 = vld [vmem:[%s3761_s1 + $0xd8] sm:$0xff] (!%p2338_p9)   ;;  %v2879_v39 = vld [vmem:[%s3761_s1 + $0xe0] sm:$0xff] (!%p2338_p9)   ;;  %v2883_v43 = vld [vmem:[%s3761_s1 + $0xe8] sm:$0xff] (!%p2338_p9)  }
  0x1a   : > { %v2876_v36 = vld [vmem:[%s3761_s1 + $0x18] sm:$0xff] (!%p2338_p9)   ;;  %v2880_v40 = vld [vmem:[%s3761_s1 + $0x20] sm:$0xff] (!%p2338_p9)   ;;  %v2884_v44 = vld [vmem:[%s3761_s1 + $0x28] sm:$0xff] (!%p2338_p9)  }
  0x1b   : > { %2541 = vmatpush3.bf16.msra.mxu0 %v2868_v28  ;;  %v2877_v37 = vld [vmem:[%s3761_s1 + $0x98] sm:$0xff]   ;;  %v2881_v41 = vld [vmem:[%s3761_s1 + $0xa0] sm:$0xff]   ;;  %v2885_v45 = vld [vmem:[%s3761_s1 + $0xa8] sm:$0xff]  }
  0x1c   : > { %2569 = vmatpush3.bf16.msra.mxu1 %v2869_v29  ;;  %2542 = vmatprep.subr.bf16.mxu0 %v2870_v30  ;;  %v2886_v46 = vld [vmem:[%s3761_s1 + $0x70] sm:$0xff]   ;;  %v2890_v50 = vld [vmem:[%s3761_s1 + $0x78] sm:$0xff]   ;;  %v2894_v56 = vld [vmem:[%s3761_s1 + $0x140] sm:$0xff]   ;;  %v2346_v29 = vcombine.high %v3125_v3, %v3150_v8 }
  0x1d   : > { %2570 = vmatprep.subr.bf16.mxu1 %v2871_v31  ;;  %v2887_v47 = vld [vmem:[%s3761_s1 + $0xf0] sm:$0xff]   ;;  %v2891_v51 = vld [vmem:[%s3761_s1 + $0xf8] sm:$0xff]   ;;  %v2895_v57 = vld [vmem:[%s3761_s1 + $0x100] sm:$0xff]  }
  0x1e   : > { %v2888_v48 = vld [vmem:[%s3761_s1 + $0x30] sm:$0xff]   ;;  %v2892_v52 = vld [vmem:[%s3761_s1 + $0x38] sm:$0xff]   ;;  %v2896_v59 = vld [vmem:[%s3761_s1 + $0x1c0] sm:$0xff]  }
  0x1f   : > { %2543 = vmatpush3.bf16.msra.mxu0 %v2872_v32  ;;  %v2889_v49 = vld [vmem:[%s3761_s1 + $0xb0] sm:$0xff]   ;;  %v2893_v53 = vld [vmem:[%s3761_s1 + $0xb8] sm:$0xff]   ;;  %v2897_v60 = vld [vmem:[%s3761_s1 + $0x180] sm:$0xff]  }
  0x20   : > { %2571 = vmatpush3.bf16.msra.mxu1 %v2873_v33  ;;  %2544 = vmatprep.subr.bf16.mxu0 %v2874_v34  ;;  %v2898_v62 = vld [vmem:[%s3761_s1 + $0x148] sm:$0xff]   ;;  %v2902_v23 = vld [vmem:[%s3761_s1 + $0x150] sm:$0xff]   ;;  %v2906_v30 = vld [vmem:[%s3761_s1 + $0x158] sm:$0xff]  }
  0x21   : > { %2572 = vmatprep.subr.bf16.mxu1 %v2875_v35  ;;  %v2899_v63 = vld [vmem:[%s3761_s1 + $0x108] sm:$0xff]   ;;  %v2903_v24 = vld [vmem:[%s3761_s1 + $0x110] sm:$0xff]   ;;  %v2907_v31 = vld [vmem:[%s3761_s1 + $0x118] sm:$0xff]  }
  0x22   : > { %v2900_v20 = vld [vmem:[%s3761_s1 + $0x1c8] sm:$0xff]   ;;  %v2904_v27 = vld [vmem:[%s3761_s1 + $0x1d0] sm:$0xff]   ;;  %v2908_v32 = vld [vmem:[%s3761_s1 + $0x1d8] sm:$0xff]  }
  0x23   : > { %2545 = vmatpush3.bf16.msra.mxu0 %v2876_v36  ;;  %v2901_v21 = vld [vmem:[%s3761_s1 + $0x188] sm:$0xff]   ;;  %v2905_v28 = vld [vmem:[%s3761_s1 + $0x190] sm:$0xff]   ;;  %v2909_v33 = vld [vmem:[%s3761_s1 + $0x198] sm:$0xff]  }
  0x24   : > { %2573 = vmatpush3.bf16.msra.mxu1 %v2877_v37  ;;  %2546 = vmatprep.subr.bf16.mxu0 %v2878_v38  ;;  %v2910_v34 = vld [vmem:[%s3761_s1 + $0x160] sm:$0xff]   ;;  %v2914_v38 = vld [vmem:[%s3761_s1 + $0x168] sm:$0xff]  }
  0x25   : > { %2574 = vmatprep.subr.bf16.mxu1 %v2879_v39  ;;  %v2911_v35 = vld [vmem:[%s3761_s1 + $0x120] sm:$0xff]   ;;  %v2915_v39 = vld [vmem:[%s3761_s1 + $0x128] sm:$0xff]  }
  0x26   : > { %v2912_v36 = vld [vmem:[%s3761_s1 + $0x1e0] sm:$0xff]  }
  0x27   : > { %2547 = vmatpush3.bf16.msra.mxu0 %v2880_v40  ;;  %v2913_v37 = vld [vmem:[%s3761_s1 + $0x1a0] sm:$0xff]   ;;  %v2916_v40 = vld [vmem:[%s3761_s1 + $0x1e8] sm:$0xff]  }
  0x28   : > { %2575 = vmatpush3.bf16.msra.mxu1 %v2881_v41  ;;  %2548 = vmatprep.subr.bf16.mxu0 %v2882_v42  ;;  %v2917_v41 = vld [vmem:[%s3761_s1 + $0x1a8] sm:$0xff]   ;;  %v2918_v42 = vld [vmem:[%s3761_s1 + $0x170] sm:$0xff]  }
  0x29   : > { %2576 = vmatprep.subr.bf16.mxu1 %v2883_v43  ;;  %v2919_v43 = vld [vmem:[%s3761_s1 + $0x130] sm:$0xff]  }
  0x2b   : > { %2549 = vmatpush3.bf16.msra.mxu0 %v2884_v44  ;;  %v2920_v44 = vld [vmem:[%s3761_s1 + $0x1f0] sm:$0xff]  }
  0x2c   : > { %2577 = vmatpush3.bf16.msra.mxu1 %v2885_v45  ;;  %2550 = vmatprep.subr.bf16.mxu0 %v2886_v46  ;;  %v2921_v45 = vld [vmem:[%s3761_s1 + $0x1b0] sm:$0xff]   ;;  %v2922_v46 = vld [vmem:[%s3761_s1 + $0x178] sm:$0xff]  }
  0x2d   : > { %2578 = vmatprep.subr.bf16.mxu1 %v2887_v47  ;;  %v2923_v47 = vld [vmem:[%s3761_s1 + $0x138] sm:$0xff]  }
  0x2f   : > { %2551 = vmatpush3.bf16.msra.mxu0 %v2888_v48  ;;  %v2924_v48 = vld [vmem:[%s3761_s1 + $0x1f8] sm:$0xff]  }
  0x30   : > { %2579 = vmatpush3.bf16.msra.mxu1 %v2889_v49  ;;  %2552 = vmatprep.subr.bf16.mxu0 %v2890_v50  ;;  %v2925_v49 = vld [vmem:[%s3761_s1 + $0x1b8] sm:$0xff]   ;;  %v2343_v50 = vcombine.low %v3120_v2, %v3145_v7 }
  0x31   : > { %2580 = vmatprep.subr.bf16.mxu1 %v2891_v51  ;;  %v2926_v51 = vld [vmem:[%s3761_s1 + $0x200] sm:$0xff]  }
  0x33   : > { %2553 = vmatpush3.bf16.msra.mxu0 %v2892_v52  ;;  %v2353_v52 = vcombine.high %v3171_v12, %v3196_v17 }
  0x34   : > { %2581 = vmatpush3.bf16.msra.mxu1 %v2893_v53  ;;  %2594 = vmatprep.subr.bf16.mxu0 %v2894_v56  ;;  %v2345_v53 = vcombine.low %v3125_v3, %v3150_v8  ;;  %v2928_v56 = vld [vmem:[%s3761_s1 + $0x210] sm:$0xff]  }
  0x35   : > { %2622 = vmatprep.subr.bf16.mxu1 %v2896_v59  ;;  %v2354_v59 = vcombine.low %v3176_v13, %v3206_v18 }
  0x36   : > { %932 = vmatmul.mubr.bf16.vlgmr.msra.gmra.mrb[0].mxu0 %v2339_v54  ;;  %v2927_v54 = vld [vmem:[%s3761_s1 + $0x208] sm:$0xff]  }
  0x37   : > { %981 = vmatmul.mubr.bf16.vlgmr.msra.gmra.mrb[0].mxu1 %v2341_v55  ;;  %2595 = vmatpush3.bf16.msra.mxu0 %v2895_v57  ;;  %v2355_v55 = vcombine.high %v3176_v13, %v3206_v18  ;;  %v2352_v57 = vcombine.low %v3171_v12, %v3196_v17 }
  0x38   : > { %939 = vmatprep.mubr.bf16.mxu0 %v2349_v58  ;;  %2623 = vmatpush3.bf16.msra.mxu1 %v2897_v60  ;;  %v2347_v58 = vcombine.low %v3130_v4, %v3156_v9  ;;  %v2929_v60 = vld [vmem:[%s3761_s1 + $0x218] sm:$0xff]  }
  0x39   : > { %2596 = vmatprep.subr.bf16.mxu0 %v2898_v62  ;;  %988 = vmatprep.mubr.bf16.mxu1 %v2351_v61  ;;  %v2930_v61 = vld [vmem:[%s3761_s1 + $0x220] sm:$0xff]   ;;  %v2931_v62 = vld [vmem:[%s3761_s1 + $0x228] sm:$0xff]  }
  0x3a   : > { %2624 = vmatprep.subr.bf16.mxu1 %v2900_v20  ;;  %v2933_v20 = vld [vmem:[%s3761_s1 + $0x238] sm:$0xff]  }
  0x3b   : > { %2597 = vmatpush3.bf16.msra.mxu0 %v2899_v63  ;;  %v2932_v63 = vld [vmem:[%s3761_s1 + $0x230] sm:$0xff]  }
  0x3c   : > { %2625 = vmatpush3.bf16.msra.mxu1 %v2901_v21  ;;  %2598 = vmatprep.subr.bf16.mxu0 %v2902_v23  ;;  %v2356_v21 = vcombine.low %v3181_v14, %v3211_v19 }
  0x3d   : > { %2626 = vmatprep.subr.bf16.mxu1 %v2904_v27 }
  0x3e   : > { %940 = vmatmul.mubr.bf16.gmra.mrb[4].mxu0 %v2348_v22 }
  0x3f   : > { %2599 = vmatpush3.bf16.msra.mxu0 %v2903_v24  ;;  %989 = vmatmul.mubr.bf16.gmra.mrb[4].mxu1 %v2350_v25 }
  0x40   : > { %1029 = vmatprep.mubr.bf16.mxu0 %v2344_v26  ;;  %2627 = vmatpush3.bf16.msra.mxu1 %v2905_v28 }
  0x41   : > { %2600 = vmatprep.subr.bf16.mxu0 %v2906_v30  ;;  %1078 = vmatprep.mubr.bf16.mxu1 %v2346_v29 }
  0x42   : > { %2628 = vmatprep.subr.bf16.mxu1 %v2908_v32 }
  0x43   : > { %2601 = vmatpush3.bf16.msra.mxu0 %v2907_v31 }
  0x44   : > { %2629 = vmatpush3.bf16.msra.mxu1 %v2909_v33  ;;  %2602 = vmatprep.subr.bf16.mxu0 %v2910_v34 }
  0x45   : > { %2630 = vmatprep.subr.bf16.mxu1 %v2912_v36 }
  0x47   : > { %2603 = vmatpush3.bf16.msra.mxu0 %v2911_v35 }
  0x48   : > { %2631 = vmatpush3.bf16.msra.mxu1 %v2913_v37  ;;  %2604 = vmatprep.subr.bf16.mxu0 %v2914_v38 }
  0x49   : > { %2632 = vmatprep.subr.bf16.mxu1 %v2916_v40 }
  0x4b   : > { %2605 = vmatpush3.bf16.msra.mxu0 %v2915_v39 }
  0x4c   : > { %2633 = vmatpush3.bf16.msra.mxu1 %v2917_v41  ;;  %2606 = vmatprep.subr.bf16.mxu0 %v2918_v42 }
  0x4d   : > { %2634 = vmatprep.subr.bf16.mxu1 %v2920_v44 }
  0x4f   : > { %2607 = vmatpush3.bf16.msra.mxu0 %v2919_v43 }
  0x50   : > { %2635 = vmatpush3.bf16.msra.mxu1 %v2921_v45  ;;  %2608 = vmatprep.subr.bf16.mxu0 %v2922_v46 }
  0x51   : > { %2636 = vmatprep.subr.bf16.mxu1 %v2924_v48 }
  0x53   : > { %2609 = vmatpush3.bf16.msra.mxu0 %v2923_v47 }
  0x54   : > { %2637 = vmatpush3.bf16.msra.mxu1 %v2925_v49  ;;  %2782 = vmatprep.subr.bf16.mxu0 %v2926_v51 }
  0x56   : > { %1030 = vmatmul.mubr.bf16.vlgmr.msra.gmra.mrb[8].mxu0 %v2343_v50 }
  0x57   : > { %2783 = vmatpush3.bf16.msra.mxu0 %v2926_v51  ;;  %1037 = vmatprep.mubr.bf16.mxu0 %v2353_v52 }
  0x58   : > { %1079 = vmatmul.mubr.bf16.vlgmr.msra.gmra.mrb[8].mxu1 %v2345_v53  ;;  %2784 = vmatprep.subr.bf16.mxu0 %v2927_v54 }
  0x59   : > { %1086 = vmatprep.mubr.bf16.mxu1 %v2355_v55 }
  0x5b   : > { %2785 = vmatpush3.bf16.msra.mxu0 %v2927_v54 }
  0x5c   : > { %2786 = vmatprep.subr.bf16.mxu0 %v2928_v56 }
  0x5e   : > { %1038 = vmatmul.mubr.bf16.gmra.mrb[12].mxu0 %v2352_v57 }
  0x5f   : > { %2787 = vmatpush3.bf16.msra.mxu0 %v2928_v56  ;;  %2798 = vmatprep.mubr.bf16.mxu0 %v2347_v58 }
  0x60   : > { %1087 = vmatmul.mubr.bf16.gmra.mrb[12].mxu1 %v2354_v59  ;;  %2788 = vmatprep.subr.bf16.mxu0 %v2929_v60 }
  0x63   : > { %2789 = vmatpush3.bf16.msra.mxu0 %v2929_v60 }
  0x64   : > { %2790 = vmatprep.subr.bf16.mxu0 %v2930_v61 }
  0x67   : > { %2791 = vmatpush3.bf16.msra.mxu0 %v2930_v61 }
  0x68   : > { %2792 = vmatprep.subr.bf16.mxu0 %v2931_v62 }
  0x6b   : > { %2793 = vmatpush3.bf16.msra.mxu0 %v2931_v62 }
  0x6c   : > { %2794 = vmatprep.subr.bf16.mxu0 %v2932_v63 }
  0x6f   : > { %2795 = vmatpush3.bf16.msra.mxu0 %v2932_v63 }
  0x70   : > { %2796 = vmatprep.subr.bf16.mxu0 %v2933_v20 }
  0x73   : > { %2797 = vmatpush3.bf16.msra.mxu0 %v2933_v20 }
  0x76   : > { %2799 = vmatmul.mubr.bf16.vlgmr.msra.gmra.mrb[16].mxu0 %v2356_v21 }
 0x109   : > { %v2554_v22 = vpop.f32.mrb[0].mxu0 }
 0x10a   : > { %v2582_v23 = vpop.f32.mrb[0].mxu1  ;;  %v2555_v24 = vpop.f32.mrb[1].mxu0 }
 0x10b   : > { %v2556_v25 = vadd.f32 %v2555_v24, %v2554_v22  ;;  %v2583_v26 = vpop.f32.mrb[1].mxu1  ;;  %v2557_v27 = vpop.f32.mrb[2].mxu0 }
 0x10c   : > { %v2584_v28 = vadd.f32 %v2583_v26, %v2582_v23  ;;  %v2585_v29 = vpop.f32.mrb[2].mxu1  ;;  %v2558_v30 = vpop.f32.mrb[3].mxu0 }
 0x10d   : > { %v2559_v31 = vadd.f32 %v2558_v30, %v2557_v27  ;;  %v2586_v32 = vpop.f32.mrb[3].mxu1 }
 0x10e   : > { %v983_v33 = vadd.f32 %v2584_v28, %v2556_v25  ;;  %v2587_v34 = vadd.f32 %v2586_v32, %v2585_v29 }
 0x110   : > { %v986_v35 = vadd.f32 %v2587_v34, %v2559_v31 }
 0x111   : > { %v2560_v36 = vpop.f32.mrb[4].mxu0 }
 0x112   : > { %v2561_v37 = vpop.f32.mrb[5].mxu0  ;;  %v2588_v38 = vpop.f32.mrb[4].mxu1 }
 0x113   : > { %v2562_v39 = vadd.f32 %v2561_v37, %v2560_v36  ;;  %v2563_v40 = vpop.f32.mrb[6].mxu0  ;;  %v2589_v41 = vpop.f32.mrb[5].mxu1 }
 0x114   : > { %v2564_v42 = vpop.f32.mrb[7].mxu0  ;;  %v2590_v43 = vadd.f32 %v2589_v41, %v2588_v38  ;;  %v2591_v44 = vpop.f32.mrb[6].mxu1 }
 0x115   : > { %v2565_v45 = vadd.f32 %v2564_v42, %v2563_v40  ;;  %v2592_v46 = vpop.f32.mrb[7].mxu1 }
 0x116   : > { %v991_v47 = vadd.f32 %v2590_v43, %v2562_v39  ;;  %v2593_v48 = vadd.f32 %v2592_v46, %v2591_v44 }
 0x118   : > { %v994_v49 = vadd.f32 %v2593_v48, %v2565_v45 }
 0x129   : > { %v2610_v50 = vpop.f32.mrb[8].mxu0 }
 0x12a   : > { %v2611_v51 = vpop.f32.mrb[9].mxu0 }
 0x12b   : > { %v2612_v52 = vadd.f32 %v2611_v51, %v2610_v50  ;;  %v2613_v53 = vpop.f32.mrb[10].mxu0  ;;  %v2638_v54 = vpop.f32.mrb[8].mxu1 }
 0x12c   : > { %v2614_v55 = vpop.f32.mrb[11].mxu0  ;;  %v2639_v56 = vpop.f32.mrb[9].mxu1 }
 0x12d   : > { %v1032_v57 = vadd.f32 %v2612_v52, %v983_v33  ;;  %v2615_v58 = vadd.f32 %v2614_v55, %v2613_v53  ;;  %v2640_v59 = vadd.f32 %v2639_v56, %v2638_v54  ;;  %v2641_v60 = vpop.f32.mrb[10].mxu1 }
 0x12e   : > { %v2642_v61 = vpop.f32.mrb[11].mxu1 }
 0x12f   : > { %v1035_v62 = vadd.f32 %v2615_v58, %v986_v35  ;;  %v2643_v63 = vadd.f32 %v2642_v61, %v2641_v60  ;;  %v1081_v20 = vadd.f32 %v2640_v59, %v1032_v57 }
 0x131   : > { %v2616_v21 = vpop.f32.mrb[12].mxu0  ;;  %v1084_v22 = vadd.f32 %v2643_v63, %v1035_v62 }
 0x132   : > { %v2617_v23 = vpop.f32.mrb[13].mxu0 }
 0x133   : > { %v2618_v24 = vadd.f32 %v2617_v23, %v2616_v21  ;;  %v2619_v25 = vpop.f32.mrb[14].mxu0  ;;  %v2644_v26 = vpop.f32.mrb[12].mxu1 }
 0x134   : > { %v2620_v27 = vpop.f32.mrb[15].mxu0  ;;  %v2645_v28 = vpop.f32.mrb[13].mxu1 }
 0x135   : > { %v1040_v29 = vadd.f32 %v2618_v24, %v991_v47  ;;  %v2621_v30 = vadd.f32 %v2620_v27, %v2619_v25  ;;  %v2646_v31 = vadd.f32 %v2645_v28, %v2644_v26  ;;  %v2647_v32 = vpop.f32.mrb[14].mxu1 }
 0x136   : > { %v2648_v33 = vpop.f32.mrb[15].mxu1 }
 0x137   : > { %v1043_v34 = vadd.f32 %v2621_v30, %v994_v49  ;;  %v2649_v35 = vadd.f32 %v2648_v33, %v2647_v32  ;;  %v1089_v36 = vadd.f32 %v2646_v31, %v1040_v29 }
 0x139   : > { %v1092_v37 = vadd.f32 %v2649_v35, %v1043_v34 }
 0x149   : > { %v2800_v38 = vpop.f32.mrb[16].mxu0 }
 0x14a   : > { %v1138_v39 = vadd.f32 %v2800_v38, %v1089_v36  ;;  %v1129_v40 = vpop.f32.mrb[17].mxu0 }
 0x14b   : > { %v1130_v41 = vadd.f32 %v1129_v40, %v1081_v20  ;;  %v2801_v42 = vpop.f32.mrb[18].mxu0 }
 0x14c   : > { %2432 = vst [vmem:[%s3213_s5 + $0x10] sm:$0xff] %v1138_v39   ;;  %v1141_v43 = vadd.f32 %v2801_v42, %v1092_v37  ;;  %v1132_v44 = vpop.f32.mrb[19].mxu0  ;;  %v1170_v49 = vmul.f32 %v1138_v39, %v1138_v39 }
 0x14d   : > { %1144 = vst [vmem:[%s3213_s5] sm:$0xff] %v1130_v41   ;;  %v1133_v45 = vadd.f32 %v1132_v44, %v1084_v22  ;;  %v1168_v46 = vmul.f32 %v1130_v41, %v1130_v41 }
 0x14e   : > { %2434 = vst [vmem:[%s3213_s5 + $0x18] sm:$0xff] %v1141_v43   ;;  %v1171_v52 = vmul.f32 %v1141_v43, %v1141_v43 }
 0x14f   : > { %2430 = vst [vmem:[%s3213_s5 + $0x8] sm:$0xff] %v1133_v45   ;;  %v1159_v47 = vadd.f32 %v1133_v45, %v1130_v41  ;;  %v1169_v48 = vmul.f32 %v1133_v45, %v1133_v45 }
 0x151   : > { %v1160_v50 = vadd.f32 %v1159_v47, %v1138_v39  ;;  %v1172_v51 = vadd.f32 %v1169_v48, %v1168_v46 }
 0x153   : > { %v1161_v53 = vadd.f32 %v1160_v50, %v1141_v43  ;;  %v1173_v54 = vadd.f32 %v1172_v51, %v1170_v49 }
 0x155   : > { %v1162_v55 = vrot.slane %v1161_v53, 4  ;;  %v1174_v56 = vadd.f32 %v1173_v54, %v1171_v52 }
 0x157   : > { %v1163_v57 = vadd.f32 %v1162_v55, %v1161_v53  ;;  %v1175_v58 = vrot.slane %v1174_v56, 4 }
 0x159   : > { %v1164_v59 = vrot.slane %v1163_v57, 2  ;;  %v1176_v60 = vadd.f32 %v1175_v58, %v1174_v56 }
 0x15b   : > { %v1165_v61 = vadd.f32 %v1164_v59, %v1163_v57  ;;  %v1177_v62 = vrot.slane %v1176_v60, 2 }
 0x15d   : > { %v1166_v63 = vrot.slane %v1165_v61, 1  ;;  %v1178_v20 = vadd.f32 %v1177_v62, %v1176_v60 }
 0x15f   : > { %v1179_v21 = vrot.slane %v1178_v20, 1  ;;  %v1167_v22 = vadd.f32 %v1166_v63, %v1165_v61 }
 0x161   : > { %v1180_v23 = vadd.f32 %v1179_v21, %v1178_v20 }
 0x163   : > { %v1182_v24 = vsel %vm1181_vm0, %v1167_v22, %v1180_v23 }
 0x164   : > { %1183 = vst [vmem:[%s3201_s27] sm:$0x3] %v1182_v24 }
 0x165 PF: > { %p2436_p10 = scmp.ne.s32.totalorder %s3036_s14, 1 }
 0x166   : > { %v2934_v25 = vld [vmem:[%s3761_s1 + $0x280] sm:$0xff] (!%p2436_p10)   ;;  %v2438_v26 = vcombine.high (!%p2436_p10), %v3110_v0, %v3135_v5  ;;  %v2440_v27 = vcombine.high (!%p2436_p10), %v3115_v1, %v3140_v6  ;;  %v2938_v31 = vld [vmem:[%s3761_s1 + $0x288] sm:$0xff] (!%p2436_p10)   ;;  %v2942_v35 = vld [vmem:[%s3761_s1 + $0x290] sm:$0xff] (!%p2436_p10)   ;;  %v2437_v59 = vcombine.low (!%p2436_p10), %v3110_v0, %v3135_v5  ;;  %v2439_v60 = vcombine.low (!%p2436_p10), %v3115_v1, %v3140_v6 }
 0x167   : > { %1187 = sbr.rel (%p2436_p10) target bundleno = 695 (0x2b7), region = 36  ;;  %v2935_v28 = vld [vmem:[%s3761_s1 + $0x300] sm:$0xff] (!%p2436_p10)   ;;  %2660 = vmatprep.subr.bf16.mxu0 (!%p2436_p10), %v2934_v25  ;;  %v2939_v32 = vld [vmem:[%s3761_s1 + $0x308] sm:$0xff] (!%p2436_p10)   ;;  %v2943_v36 = vld [vmem:[%s3761_s1 + $0x310] sm:$0xff] (!%p2436_p10)   ;;  %v2447_v63 = vcombine.high (!%p2436_p10), %v3161_v10, %v3186_v15  ;;  %v2449_v5 = vcombine.high (!%p2436_p10), %v3166_v11, %v3191_v16  ;;  %v2446_v23 = vcombine.low (!%p2436_p10), %v3161_v10, %v3186_v15  ;;  %vm2138_vm1 = vcmask (!%p2436_p10), 1040384  }
 0x168   : > { %v2936_v29 = vld [vmem:[%s3761_s1 + $0x240] sm:$0xff] (!%p2436_p10)   ;;  %1888 = vmatprep.mubr.bf16.mxu0 (!%p2436_p10), %v2438_v26  ;;  %2688 = vmatprep.subr.bf16.mxu1 (!%p2436_p10), %v2935_v28  ;;  %v2940_v33 = vld [vmem:[%s3761_s1 + $0x248] sm:$0xff] (!%p2436_p10)   ;;  %v2944_v37 = vld [vmem:[%s3761_s1 + $0x250] sm:$0xff] (!%p2436_p10)   ;;  %v2448_v26 = vcombine.low (!%p2436_p10), %v3166_v11, %v3191_v16  ;;  %v2444_v28 = vcombine.high (!%p2436_p10), %v3125_v3, %v3150_v8 }
 0x169   : > { %v2937_v30 = vld [vmem:[%s3761_s1 + $0x2c0] sm:$0xff] (!%p2436_p10)   ;;  %1937 = vmatprep.mubr.bf16.mxu1 (!%p2436_p10), %v2440_v27  ;;  %2661 = vmatpush3.bf16.msra.mxu0 (!%p2436_p10), %v2936_v29  ;;  %v2941_v34 = vld [vmem:[%s3761_s1 + $0x2c8] sm:$0xff] (!%p2436_p10)   ;;  %v2945_v38 = vld [vmem:[%s3761_s1 + $0x2d0] sm:$0xff] (!%p2436_p10)   ;;  %v2442_v27 = vcombine.high (!%p2436_p10), %v3120_v2, %v3145_v7 }
 0x16a   : > { %2689 = vmatpush3.bf16.msra.mxu1 (!%p2436_p10), %v2937_v30  ;;  %2662 = vmatprep.subr.bf16.mxu0 (!%p2436_p10), %v2938_v31  ;;  %v2946_v39 = vld [vmem:[%s3761_s1 + $0x298] sm:$0xff] (!%p2436_p10)   ;;  %v2950_v43 = vld [vmem:[%s3761_s1 + $0x2a0] sm:$0xff] (!%p2436_p10)   ;;  %v2954_v47 = vld [vmem:[%s3761_s1 + $0x2a8] sm:$0xff] (!%p2436_p10)  }
 0x16b   : > { %2690 = vmatprep.subr.bf16.mxu1 (!%p2436_p10), %v2939_v32  ;;  %v2947_v40 = vld [vmem:[%s3761_s1 + $0x318] sm:$0xff] (!%p2436_p10)   ;;  %v2951_v44 = vld [vmem:[%s3761_s1 + $0x320] sm:$0xff] (!%p2436_p10)   ;;  %v2955_v48 = vld [vmem:[%s3761_s1 + $0x328] sm:$0xff] (!%p2436_p10)  }
 0x16c   : > { %v2948_v41 = vld [vmem:[%s3761_s1 + $0x258] sm:$0xff] (!%p2436_p10)   ;;  %v2952_v45 = vld [vmem:[%s3761_s1 + $0x260] sm:$0xff] (!%p2436_p10)   ;;  %v2956_v49 = vld [vmem:[%s3761_s1 + $0x268] sm:$0xff] (!%p2436_p10)  }
 0x16d   : > { %2663 = vmatpush3.bf16.msra.mxu0 (!%p2436_p10), %v2940_v33  ;;  %v2949_v42 = vld [vmem:[%s3761_s1 + $0x2d8] sm:$0xff] (!%p2436_p10)   ;;  %v2953_v46 = vld [vmem:[%s3761_s1 + $0x2e0] sm:$0xff] (!%p2436_p10)   ;;  %v2957_v50 = vld [vmem:[%s3761_s1 + $0x2e8] sm:$0xff] (!%p2436_p10)  }
 0x16e   : > { %2691 = vmatpush3.bf16.msra.mxu1 %v2941_v34  ;;  %2664 = vmatprep.subr.bf16.mxu0 %v2942_v35  ;;  %v2958_v51 = vld [vmem:[%s3761_s1 + $0x2b0] sm:$0xff]   ;;  %v2962_v55 = vld [vmem:[%s3761_s1 + $0x2b8] sm:$0xff]   ;;  %v2966_v61 = vld [vmem:[%s3761_s1 + $0x380] sm:$0xff]  }
 0x16f   : > { %2692 = vmatprep.subr.bf16.mxu1 %v2943_v36  ;;  %v2959_v52 = vld [vmem:[%s3761_s1 + $0x330] sm:$0xff]   ;;  %v2963_v56 = vld [vmem:[%s3761_s1 + $0x338] sm:$0xff]   ;;  %v2967_v62 = vld [vmem:[%s3761_s1 + $0x340] sm:$0xff]  }
 0x170   : > { %v2960_v53 = vld [vmem:[%s3761_s1 + $0x270] sm:$0xff]   ;;  %v2964_v57 = vld [vmem:[%s3761_s1 + $0x278] sm:$0xff]   ;;  %v2968_v0 = vld [vmem:[%s3761_s1 + $0x400] sm:$0xff]  }
 0x171   : > { %2665 = vmatpush3.bf16.msra.mxu0 %v2944_v37  ;;  %v2961_v54 = vld [vmem:[%s3761_s1 + $0x2f0] sm:$0xff]   ;;  %v2965_v58 = vld [vmem:[%s3761_s1 + $0x2f8] sm:$0xff]   ;;  %v2969_v1 = vld [vmem:[%s3761_s1 + $0x3c0] sm:$0xff]  }
 0x172   : > { %2693 = vmatpush3.bf16.msra.mxu1 %v2945_v38  ;;  %2666 = vmatprep.subr.bf16.mxu0 %v2946_v39  ;;  %v2970_v6 = vld [vmem:[%s3761_s1 + $0x388] sm:$0xff]   ;;  %v2974_v24 = vld [vmem:[%s3761_s1 + $0x390] sm:$0xff]   ;;  %v2978_v11 = vld [vmem:[%s3761_s1 + $0x398] sm:$0xff]  }
 0x173   : > { %2694 = vmatprep.subr.bf16.mxu1 %v2947_v40  ;;  %v2971_v20 = vld [vmem:[%s3761_s1 + $0x348] sm:$0xff]   ;;  %v2975_v25 = vld [vmem:[%s3761_s1 + $0x350] sm:$0xff]   ;;  %v2979_v16 = vld [vmem:[%s3761_s1 + $0x358] sm:$0xff]  }
 0x174   : > { %v2972_v21 = vld [vmem:[%s3761_s1 + $0x408] sm:$0xff]   ;;  %v2976_v10 = vld [vmem:[%s3761_s1 + $0x410] sm:$0xff]   ;;  %v2980_v29 = vld [vmem:[%s3761_s1 + $0x418] sm:$0xff]  }
 0x175   : > { %2667 = vmatpush3.bf16.msra.mxu0 %v2948_v41  ;;  %v2973_v22 = vld [vmem:[%s3761_s1 + $0x3c8] sm:$0xff]   ;;  %v2977_v15 = vld [vmem:[%s3761_s1 + $0x3d0] sm:$0xff]   ;;  %v2981_v30 = vld [vmem:[%s3761_s1 + $0x3d8] sm:$0xff]  }
 0x176   : > { %2695 = vmatpush3.bf16.msra.mxu1 %v2949_v42  ;;  %2668 = vmatprep.subr.bf16.mxu0 %v2950_v43  ;;  %v2982_v31 = vld [vmem:[%s3761_s1 + $0x3a0] sm:$0xff]   ;;  %v2986_v35 = vld [vmem:[%s3761_s1 + $0x3a8] sm:$0xff]   ;;  %v2990_v39 = vld [vmem:[%s3761_s1 + $0x3b0] sm:$0xff]  }
 0x177   : > { %2696 = vmatprep.subr.bf16.mxu1 %v2951_v44  ;;  %v2983_v32 = vld [vmem:[%s3761_s1 + $0x360] sm:$0xff]   ;;  %v2987_v36 = vld [vmem:[%s3761_s1 + $0x368] sm:$0xff]   ;;  %v2991_v40 = vld [vmem:[%s3761_s1 + $0x370] sm:$0xff]  }
 0x178   : > { %v2984_v33 = vld [vmem:[%s3761_s1 + $0x420] sm:$0xff]   ;;  %v2988_v37 = vld [vmem:[%s3761_s1 + $0x428] sm:$0xff]   ;;  %v2992_v41 = vld [vmem:[%s3761_s1 + $0x430] sm:$0xff]  }
 0x179   : > { %2669 = vmatpush3.bf16.msra.mxu0 %v2952_v45  ;;  %v2985_v34 = vld [vmem:[%s3761_s1 + $0x3e0] sm:$0xff]   ;;  %v2989_v38 = vld [vmem:[%s3761_s1 + $0x3e8] sm:$0xff]   ;;  %v2993_v42 = vld [vmem:[%s3761_s1 + $0x3f0] sm:$0xff]  }
 0x17a   : > { %2697 = vmatpush3.bf16.msra.mxu1 %v2953_v46  ;;  %2670 = vmatprep.subr.bf16.mxu0 %v2954_v47  ;;  %v2994_v43 = vld [vmem:[%s3761_s1 + $0x3b8] sm:$0xff]   ;;  %v2441_v47 = vcombine.low %v3120_v2, %v3145_v7  ;;  %v2453_v2 = vcombine.high %v3176_v13, %v3206_v18  ;;  %v3000_v7 = vld [vmem:[%s3761_s1 + $0x450] sm:$0xff]  }
 0x17b   : > { %2698 = vmatprep.subr.bf16.mxu1 %v2955_v48  ;;  %v2995_v44 = vld [vmem:[%s3761_s1 + $0x378] sm:$0xff]   ;;  %v2998_v48 = vld [vmem:[%s3761_s1 + $0x440] sm:$0xff]  }
 0x17c   : > { %v2996_v45 = vld [vmem:[%s3761_s1 + $0x438] sm:$0xff]  }
 0x17d   : > { %2671 = vmatpush3.bf16.msra.mxu0 %v2956_v49  ;;  %v2997_v46 = vld [vmem:[%s3761_s1 + $0x3f8] sm:$0xff]   ;;  %v2451_v49 = vcombine.high %v3171_v12, %v3196_v17 }
 0x17e   : > { %2699 = vmatpush3.bf16.msra.mxu1 %v2957_v50  ;;  %2672 = vmatprep.subr.bf16.mxu0 %v2958_v51  ;;  %v2443_v50 = vcombine.low %v3125_v3, %v3150_v8  ;;  %v2999_v51 = vld [vmem:[%s3761_s1 + $0x448] sm:$0xff]   ;;  %v2450_v3 = vcombine.low %v3171_v12, %v3196_v17  ;;  %v2445_v8 = vcombine.low %v3130_v4, %v3156_v9  ;;  %v3002_v12 = vld [vmem:[%s3761_s1 + $0x460] sm:$0xff]   ;;  %v3004_v9 = vld [vmem:[%s3761_s1 + $0x470] sm:$0xff]  }
 0x17f   : > { %2700 = vmatprep.subr.bf16.mxu1 %v2959_v52  ;;  %v2452_v52 = vcombine.low %v3176_v13, %v3206_v18  ;;  %v3003_v4 = vld [vmem:[%s3761_s1 + $0x468] sm:$0xff]   ;;  %v3005_v13 = vld [vmem:[%s3761_s1 + $0x478] sm:$0xff]   ;;  %v2454_v17 = vcombine.low %v3181_v14, %v3211_v19 }
 0x181   : > { %2673 = vmatpush3.bf16.msra.mxu0 %v2960_v53  ;;  %v3001_v53 = vld [vmem:[%s3761_s1 + $0x458] sm:$0xff]  }
 0x182   : > { %2701 = vmatpush3.bf16.msra.mxu1 %v2961_v54  ;;  %2674 = vmatprep.subr.bf16.mxu0 %v2962_v55 }
 0x183   : > { %2702 = vmatprep.subr.bf16.mxu1 %v2963_v56 }
 0x185   : > { %2675 = vmatpush3.bf16.msra.mxu0 %v2964_v57 }
 0x186   : > { %2703 = vmatpush3.bf16.msra.mxu1 %v2965_v58  ;;  %2716 = vmatprep.subr.bf16.mxu0 %v2966_v61 }
 0x187   : > { %2744 = vmatprep.subr.bf16.mxu1 %v2968_v0 }
 0x188   : > { %1889 = vmatmul.mubr.bf16.vlgmr.msra.gmra.mrb[0].mxu0 %v2437_v59 }
 0x189   : > { %1938 = vmatmul.mubr.bf16.vlgmr.msra.gmra.mrb[0].mxu1 %v2439_v60  ;;  %2717 = vmatpush3.bf16.msra.mxu0 %v2967_v62 }
 0x18a   : > { %1896 = vmatprep.mubr.bf16.mxu0 %v2447_v63  ;;  %2745 = vmatpush3.bf16.msra.mxu1 %v2969_v1 }
 0x18b   : > { %2718 = vmatprep.subr.bf16.mxu0 %v2970_v6  ;;  %1945 = vmatprep.mubr.bf16.mxu1 %v2449_v5 }
 0x18c   : > { %2746 = vmatprep.subr.bf16.mxu1 %v2972_v21 }
 0x18d   : > { %2719 = vmatpush3.bf16.msra.mxu0 %v2971_v20 }
 0x18e   : > { %2747 = vmatpush3.bf16.msra.mxu1 %v2973_v22  ;;  %2720 = vmatprep.subr.bf16.mxu0 %v2974_v24 }
 0x18f   : > { %2748 = vmatprep.subr.bf16.mxu1 %v2976_v10 }
 0x190   : > { %1897 = vmatmul.mubr.bf16.gmra.mrb[4].mxu0 %v2446_v23 }
 0x191   : > { %2721 = vmatpush3.bf16.msra.mxu0 %v2975_v25  ;;  %1946 = vmatmul.mubr.bf16.gmra.mrb[4].mxu1 %v2448_v26 }
 0x192   : > { %1986 = vmatprep.mubr.bf16.mxu0 %v2442_v27  ;;  %2749 = vmatpush3.bf16.msra.mxu1 %v2977_v15 }
 0x193   : > { %2722 = vmatprep.subr.bf16.mxu0 %v2978_v11  ;;  %2035 = vmatprep.mubr.bf16.mxu1 %v2444_v28 }
 0x194   : > { %2750 = vmatprep.subr.bf16.mxu1 %v2980_v29 }
 0x195   : > { %2723 = vmatpush3.bf16.msra.mxu0 %v2979_v16 }
 0x196   : > { %2751 = vmatpush3.bf16.msra.mxu1 %v2981_v30  ;;  %2724 = vmatprep.subr.bf16.mxu0 %v2982_v31 }
 0x197   : > { %2752 = vmatprep.subr.bf16.mxu1 %v2984_v33 }
 0x199   : > { %2725 = vmatpush3.bf16.msra.mxu0 %v2983_v32 }
 0x19a   : > { %2753 = vmatpush3.bf16.msra.mxu1 %v2985_v34  ;;  %2726 = vmatprep.subr.bf16.mxu0 %v2986_v35 }
 0x19b   : > { %2754 = vmatprep.subr.bf16.mxu1 %v2988_v37 }
 0x19d   : > { %2727 = vmatpush3.bf16.msra.mxu0 %v2987_v36 }
 0x19e   : > { %2755 = vmatpush3.bf16.msra.mxu1 %v2989_v38  ;;  %2728 = vmatprep.subr.bf16.mxu0 %v2990_v39 }
 0x19f   : > { %2756 = vmatprep.subr.bf16.mxu1 %v2992_v41 }
 0x1a1   : > { %2729 = vmatpush3.bf16.msra.mxu0 %v2991_v40 }
 0x1a2   : > { %2757 = vmatpush3.bf16.msra.mxu1 %v2993_v42  ;;  %2730 = vmatprep.subr.bf16.mxu0 %v2994_v43 }
 0x1a3   : > { %2758 = vmatprep.subr.bf16.mxu1 %v2996_v45 }
 0x1a5   : > { %2731 = vmatpush3.bf16.msra.mxu0 %v2995_v44 }
 0x1a6   : > { %2759 = vmatpush3.bf16.msra.mxu1 %v2997_v46  ;;  %2802 = vmatprep.subr.bf16.mxu0 %v2998_v48 }
 0x1a8   : > { %1987 = vmatmul.mubr.bf16.vlgmr.msra.gmra.mrb[8].mxu0 %v2441_v47 }
 0x1a9   : > { %2803 = vmatpush3.bf16.msra.mxu0 %v2998_v48  ;;  %1994 = vmatprep.mubr.bf16.mxu0 %v2451_v49 }
 0x1aa   : > { %2036 = vmatmul.mubr.bf16.vlgmr.msra.gmra.mrb[8].mxu1 %v2443_v50  ;;  %2804 = vmatprep.subr.bf16.mxu0 %v2999_v51 }
 0x1ab   : > { %2043 = vmatprep.mubr.bf16.mxu1 %v2453_v2 }
 0x1ad   : > { %2805 = vmatpush3.bf16.msra.mxu0 %v2999_v51 }
 0x1ae   : > { %2806 = vmatprep.subr.bf16.mxu0 %v3000_v7 }
 0x1b0   : > { %1995 = vmatmul.mubr.bf16.gmra.mrb[12].mxu0 %v2450_v3 }
 0x1b1   : > { %2807 = vmatpush3.bf16.msra.mxu0 %v3000_v7  ;;  %2818 = vmatprep.mubr.bf16.mxu0 %v2445_v8 }
 0x1b2   : > { %2044 = vmatmul.mubr.bf16.gmra.mrb[12].mxu1 %v2452_v52  ;;  %2808 = vmatprep.subr.bf16.mxu0 %v3001_v53 }
 0x1b5   : > { %2809 = vmatpush3.bf16.msra.mxu0 %v3001_v53 }
 0x1b6   : > { %2810 = vmatprep.subr.bf16.mxu0 %v3002_v12 }
 0x1b9   : > { %2811 = vmatpush3.bf16.msra.mxu0 %v3002_v12 }
 0x1ba   : > { %2812 = vmatprep.subr.bf16.mxu0 %v3003_v4 }
 0x1bd   : > { %2813 = vmatpush3.bf16.msra.mxu0 %v3003_v4 }
 0x1be   : > { %2814 = vmatprep.subr.bf16.mxu0 %v3004_v9 }
 0x1c1   : > { %2815 = vmatpush3.bf16.msra.mxu0 %v3004_v9 }
 0x1c2   : > { %2816 = vmatprep.subr.bf16.mxu0 %v3005_v13 }
 0x1c5   : > { %2817 = vmatpush3.bf16.msra.mxu0 %v3005_v13 }
 0x1c8   : > { %2819 = vmatmul.mubr.bf16.vlgmr.msra.gmra.mrb[16].mxu0 %v2454_v17 }
 0x25b   : > { %v2676_v18 = vpop.f32.mrb[0].mxu0 }
 0x25c   : > { %v2704_v54 = vpop.f32.mrb[0].mxu1  ;;  %v2677_v55 = vpop.f32.mrb[1].mxu0 }
 0x25d   : > { %v2678_v56 = vadd.f32 %v2677_v55, %v2676_v18  ;;  %v2705_v57 = vpop.f32.mrb[1].mxu1  ;;  %v2679_v58 = vpop.f32.mrb[2].mxu0 }
 0x25e   : > { %v2706_v59 = vadd.f32 %v2705_v57, %v2704_v54  ;;  %v2707_v60 = vpop.f32.mrb[2].mxu1  ;;  %v2680_v61 = vpop.f32.mrb[3].mxu0 }
 0x25f   : > { %v2681_v62 = vadd.f32 %v2680_v61, %v2679_v58  ;;  %v2708_v63 = vpop.f32.mrb[3].mxu1 }
 0x260   : > { %v1940_v0 = vadd.f32 %v2706_v59, %v2678_v56  ;;  %v2709_v1 = vadd.f32 %v2708_v63, %v2707_v60 }
 0x262   : > { %v1943_v5 = vadd.f32 %v2709_v1, %v2681_v62 }
 0x263   : > { %v2682_v6 = vpop.f32.mrb[4].mxu0 }
 0x264   : > { %v2683_v20 = vpop.f32.mrb[5].mxu0  ;;  %v2710_v21 = vpop.f32.mrb[4].mxu1 }
 0x265   : > { %v2684_v14 = vadd.f32 %v2683_v20, %v2682_v6  ;;  %v2685_v19 = vpop.f32.mrb[6].mxu0  ;;  %v2711_v22 = vpop.f32.mrb[5].mxu1 }
 0x266   : > { %v2686_v23 = vpop.f32.mrb[7].mxu0  ;;  %v2712_v24 = vadd.f32 %v2711_v22, %v2710_v21  ;;  %v2713_v25 = vpop.f32.mrb[6].mxu1 }
 0x267   : > { %v2687_v26 = vadd.f32 %v2686_v23, %v2685_v19  ;;  %v2714_v27 = vpop.f32.mrb[7].mxu1 }
 0x268   : > { %v1948_v10 = vadd.f32 %v2712_v24, %v2684_v14  ;;  %v2715_v15 = vadd.f32 %v2714_v27, %v2713_v25 }
 0x26a   : > { %v1951_v28 = vadd.f32 %v2715_v15, %v2687_v26 }
 0x27b   : > { %v2732_v11 = vpop.f32.mrb[8].mxu0 }
 0x27c   : > { %v2733_v16 = vpop.f32.mrb[9].mxu0 }
 0x27d   : > { %v2734_v29 = vadd.f32 %v2733_v16, %v2732_v11  ;;  %v2735_v30 = vpop.f32.mrb[10].mxu0  ;;  %v2760_v31 = vpop.f32.mrb[8].mxu1 }
 0x27e   : > { %v2736_v32 = vpop.f32.mrb[11].mxu0  ;;  %v2761_v33 = vpop.f32.mrb[9].mxu1 }
 0x27f   : > { %v1989_v34 = vadd.f32 %v2734_v29, %v1940_v0  ;;  %v2737_v35 = vadd.f32 %v2736_v32, %v2735_v30  ;;  %v2762_v36 = vadd.f32 %v2761_v33, %v2760_v31  ;;  %v2763_v37 = vpop.f32.mrb[10].mxu1 }
 0x280   : > { %v2764_v38 = vpop.f32.mrb[11].mxu1 }
 0x281   : > { %v1992_v39 = vadd.f32 %v2737_v35, %v1943_v5  ;;  %v2765_v40 = vadd.f32 %v2764_v38, %v2763_v37  ;;  %v2038_v41 = vadd.f32 %v2762_v36, %v1989_v34 }
 0x283   : > { %v2738_v42 = vpop.f32.mrb[12].mxu0  ;;  %v2041_v43 = vadd.f32 %v2765_v40, %v1992_v39 }
 0x284   : > { %v2739_v44 = vpop.f32.mrb[13].mxu0 }
 0x285   : > { %v2740_v45 = vadd.f32 %v2739_v44, %v2738_v42  ;;  %v2741_v46 = vpop.f32.mrb[14].mxu0  ;;  %v2766_v47 = vpop.f32.mrb[12].mxu1 }
 0x286   : > { %v2742_v48 = vpop.f32.mrb[15].mxu0  ;;  %v2767_v49 = vpop.f32.mrb[13].mxu1 }
 0x287   : > { %v1997_v50 = vadd.f32 %v2740_v45, %v1948_v10  ;;  %v2743_v51 = vadd.f32 %v2742_v48, %v2741_v46  ;;  %v2768_v2 = vadd.f32 %v2767_v49, %v2766_v47  ;;  %v2769_v7 = vpop.f32.mrb[14].mxu1 }
 0x288   : > { %v2770_v3 = vpop.f32.mrb[15].mxu1 }
 0x289   : > { %v2000_v8 = vadd.f32 %v2743_v51, %v1951_v28  ;;  %v2771_v52 = vadd.f32 %v2770_v3, %v2769_v7  ;;  %v2046_v53 = vadd.f32 %v2768_v2, %v1997_v50 }
 0x28b   : > { %v2049_v12 = vadd.f32 %v2771_v52, %v2000_v8 }
 0x29b   : > { %v2820_v4 = vpop.f32.mrb[16].mxu0 }
 0x29c   : > { %v2095_v9 = vadd.f32 %v2820_v4, %v2046_v53  ;;  %v2086_v13 = vpop.f32.mrb[17].mxu0 }
 0x29d   : > { %v2087_v17 = vadd.f32 %v2086_v13, %v2038_v41  ;;  %v2821_v18 = vpop.f32.mrb[18].mxu0 }
 0x29e   : > { %2530 = vst [vmem:[%s3213_s5 + $0x10] sm:$0xff] %v2095_v9   ;;  %v2098_v54 = vadd.f32 %v2821_v18, %v2049_v12  ;;  %v2089_v55 = vpop.f32.mrb[19].mxu0  ;;  %v2127_v60 = vmul.f32 %v2095_v9, %v2095_v9 }
 0x29f   : > { %2101 = vst [vmem:[%s3213_s5] sm:$0xff] %v2087_v17   ;;  %v2090_v56 = vadd.f32 %v2089_v55, %v2041_v43  ;;  %v2125_v57 = vmul.f32 %v2087_v17, %v2087_v17 }
 0x2a0   : > { %2532 = vst [vmem:[%s3213_s5 + $0x18] sm:$0xff] %v2098_v54   ;;  %v2128_v63 = vmul.f32 %v2098_v54, %v2098_v54 }
 0x2a1   : > { %2528 = vst [vmem:[%s3213_s5 + $0x8] sm:$0xff] %v2090_v56   ;;  %v2116_v58 = vadd.f32 %v2090_v56, %v2087_v17  ;;  %v2126_v59 = vmul.f32 %v2090_v56, %v2090_v56 }
 0x2a3   : > { %v2117_v61 = vadd.f32 %v2116_v58, %v2095_v9  ;;  %v2129_v62 = vadd.f32 %v2126_v59, %v2125_v57 }
 0x2a5   : > { %v2118_v0 = vadd.f32 %v2117_v61, %v2098_v54  ;;  %v2130_v1 = vadd.f32 %v2129_v62, %v2127_v60 }
 0x2a7   : > { %v2119_v5 = vrot.slane %v2118_v0, 4  ;;  %v2131_v6 = vadd.f32 %v2130_v1, %v2128_v63 }
 0x2a9   : > { %v2120_v20 = vadd.f32 %v2119_v5, %v2118_v0  ;;  %v2132_v21 = vrot.slane %v2131_v6, 4 }
 0x2ab   : > { %v2121_v14 = vrot.slane %v2120_v20, 2  ;;  %v2133_v19 = vadd.f32 %v2132_v21, %v2131_v6 }
 0x2ad   : > { %v2122_v22 = vadd.f32 %v2121_v14, %v2120_v20  ;;  %v2134_v23 = vrot.slane %v2133_v19, 2 }
 0x2af   : > { %v2123_v24 = vrot.slane %v2122_v22, 1  ;;  %v2135_v25 = vadd.f32 %v2134_v23, %v2133_v19 }
 0x2b1   : > { %v2136_v26 = vrot.slane %v2135_v25, 1  ;;  %v2124_v27 = vadd.f32 %v2123_v24, %v2122_v22 }
 0x2b3   : > { %v2137_v10 = vadd.f32 %v2136_v26, %v2135_v25 }
 0x2b5   : > { %v2139_v15 = vsel %vm2138_vm1, %v2124_v27, %v2137_v10 }
 0x2b6   : > { %2140 = vst [vmem:[%s3201_s27] sm:$0x3] %v2139_v15 }
 0x2b7 PF: > { %2155 = sbr.rel (!%p3095_p3) target bundleno = 702 (0x2be), region = 40  ;;  %s2535_s6 = sshll.u32 (%p3095_p3), %s3036_s14, 2  ;;  %v2176_v28 = vld [vmem:[%s3213_s5] sm:$0xf] (%p3095_p3)  ;;  %v2178_v11 = vld [vmem:[%s3213_s5 + $0x4] sm:$0xf] (%p3095_p3) }
 0x2b8   : > { %s2160_s27 = scalar_lea.vmem (%p3095_p3), %s3762_s2, %s2535_s6  ;;  %v2180_v16 = vld [vmem:[%s3213_s5 + $0x8] sm:$0xf] (%p3095_p3)  ;;  %v2182_v29 = vld [vmem:[%s3213_s5 + $0xc] sm:$0xf] (%p3095_p3)  ;;  %v2184_v30 = vld [vmem:[%s3213_s5 + $0x10] sm:$0xf] (%p3095_p3) }
 0x2b9   : > { %2177 = vst [vmem:[%s2160_s27] sm:$0xf] (%p3095_p3), %v2176_v28  ;;  %2179 = vst [vmem:[%s2160_s27 + $0x8] sm:$0xf] (%p3095_p3), %v2178_v11  ;;  %v2186_v31 = vld [vmem:[%s3213_s5 + $0x14] sm:$0xf] (%p3095_p3) }
 0x2ba   : > { %2181 = vst [vmem:[%s2160_s27 + $0x10] sm:$0xf] (%p3095_p3), %v2180_v16  ;;  %2183 = vst [vmem:[%s2160_s27 + $0x18] sm:$0xf] (%p3095_p3), %v2182_v29  ;;  %v2188_v32 = vld [vmem:[%s3213_s5 + $0x18] sm:$0xf] (%p3095_p3) }
 0x2bb   : > { %2185 = vst [vmem:[%s2160_s27 + $0x20] sm:$0xf] (%p3095_p3), %v2184_v30  ;;  %v2190_v33 = vld [vmem:[%s3213_s5 + $0x1c] sm:$0xf] (%p3095_p3)  ;;  %2187 = vst [vmem:[%s2160_s27 + $0x28] sm:$0xf] (%p3095_p3), %v2186_v31 }
 0x2bc   : > { %2189 = vst [vmem:[%s2160_s27 + $0x30] sm:$0xf] (%p3095_p3), %v2188_v32  ;;  %2191 = vst [vmem:[%s2160_s27 + $0x38] sm:$0xf] (%p3095_p3), %v2190_v33 }
 0x2be PF: > { %s14_s16 = sadd.s32 1, %s3044_s16   ;;  %s3765_s12 = smov %s3032_s13 }
 0x2bf   : > { %p11_p11 = scmp.ge.s32.totalorder %s14_s16, 4   ;;  %s3766_s13 = smov %s3104_s22 }
 0x2c0   : > { %s3767_s14 = smov %s3040_s15  ;;  %s3768_s15 = smov %s3770_s18 }
 0x2c1   :  { %13 = sbr.rel (!%p11_p11) target bundleno = 3 (0x3), region = 133 }

// kernel: _lambda_.5
= control target key start
LH: loop header
LB: loop body
LE: loop exit
PB: predicated region body
PF: predicated region fallthrough
CT: control target
= control target key end

     0   :  { %s3103_s9 = smov 0   ;;  %s3105_s10 = smov 0   ;;  %s3883_s0 = inlined_call_operand.vmem [shape: bf16[128,576], index: 0, kind: input, shape index: {}]   ;;  %s3884_s1 = inlined_call_operand.vmem [shape: bf16[1152,128], index: 1, kind: input, shape index: {}]   ;;  %s3885_s2 = inlined_call_operand.vmem [shape: bf16[16,2,8,128], index: 2, kind: output, shape index: {}]  }
   0x1   :  { %s3107_s11 = smov 0   ;;  %s3109_s12 = smov 0  }
   0x2   :  { %s3111_s13 = smov 0  }
   0x3 LB: > { %s2190_s14 = sadd.s32 4294967295, %s3086_s13   ;;  %s21_s15 = sadd.s32 1, %s3082_s12  ;;  %s3086_s13 = sphi %s3111_s13, %s12_s13   ;;  %s3082_s12 = sphi %s3109_s12, %s3958_s12   ;;  %s3078_s11 = sphi %s3107_s11, %s3957_s11   ;;  %s3074_s10 = sphi %s3105_s10, %s3956_s10   ;;  %s3070_s9 = sphi %s3103_s9, %s3955_s9  }
   0x4   : > { %p22_p0 = scmp.ge.s32.totalorder %s21_s15, 2  ;;  %s80_s16 = sadd.s32 1, %s3074_s10 }
   0x5   : > { %p90_p1 = scmp.ne.s32.totalorder %s3074_s10, %s3070_s9  ;;  %p91_p2 = scmp.eq.s32.totalorder %s2190_s14, 1 }
   0x6   : > { %s3960_s15 = smov (%p22_p0, %s21_s15), 0  ;;  %p2194_p4 = scmp.ge.s32.totalorder %s3086_s13, 1 }
   0x7   : > { %p3132_p3 = por %p91_p2, %p90_p1  ;;  %s76_s18 = ssub.s32 %s3082_s12, %s3960_s15 }
   0x8   : > { %p128_p5 = scmp.lt.s32.totalorder %s3086_s13, 3  ;;  %p78_p6 = scmp.eq.s32.totalorder %s76_s18, 0 }
   0xa   : > { %p129_p7 = pnand %p2194_p4, %p128_p5 }
   0xb   : > { %s3141_s19 = scalar_select %p78_p6, %s3074_s10, %s80_s16  }
   0xc   : > { %132 = sbr.rel (%p129_p7) target bundleno = 731 (0x2db), region = 28 }
  0x13   : > { %s147_s20 = sand.u32 1, %s3070_s9   ;;  %v3146_v0 = vld [vmem:[%s3883_s0] sm:$0xff]  ;;  %v3151_v1 = vld [vmem:[%s3883_s0 + $0x8] sm:$0xff]  ;;  %v3156_v2 = vld [vmem:[%s3883_s0 + $0x10] sm:$0xf]  ;;  %p2196_p8 = scmp.ne.s32.totalorder %s3078_s11, 0 }
  0x14   : > { %3913 = vst [vmem:[#allocation3_spill] sm:$0xff] %v3156_v2  ;;  %s3158_s27 = sshll.u32 %s147_s20, 6  ;;  %v3163_v3 = vld [vmem:[%s3883_s0 + $0x14] sm:$0xff]  ;;  %v3168_v4 = vld [vmem:[%s3883_s0 + $0x1c] sm:$0xff]  ;;  %v3173_v5 = vld [vmem:[%s3883_s0 + $0x24] sm:$0xf] }
  0x15   : > { %3914 = vst [vmem:[#allocation4_spill] sm:$0xff] %v3173_v5  ;;  %v3178_v6 = vld [vmem:[%s3883_s0 + $0x28] sm:$0xff]  ;;  %v3183_v7 = vld [vmem:[%s3883_s0 + $0x30] sm:$0xff]  ;;  %v3188_v8 = vld [vmem:[%s3883_s0 + $0x38] sm:$0xf]  ;;  %s3386_s14 = scalar_lea.vmem [#allocation2], %s3158_s27  ;;  %v2198_v49 = vcombine.high (!%p2196_p8), %v3146_v0, %v3163_v3  ;;  %v2200_v50 = vcombine.high (!%p2196_p8), %v3151_v1, %v3168_v4 }
  0x16   : > { %3915 = vst [vmem:[#allocation5_spill] sm:$0xff] %v3188_v8  ;;  %v3193_v9 = vld [vmem:[%s3883_s0 + $0x3c] sm:$0xff]  ;;  %v3198_v10 = vld [vmem:[%s3883_s0 + $0x44] sm:$0xff]  ;;  %v3203_v11 = vld [vmem:[%s3883_s0 + $0x4c] sm:$0xf]  ;;  %vm699_vm0 = vcmask (!%p2196_p8), 523264  }
  0x17   : > { %3916 = vst [vmem:[#allocation6_spill] sm:$0xff] %v3203_v11  ;;  %v3208_v12 = vld [vmem:[%s3883_s0 + $0x50] sm:$0xff]  ;;  %v3213_v13 = vld [vmem:[%s3883_s0 + $0x58] sm:$0xff]  ;;  %v3218_v14 = vld [vmem:[%s3883_s0 + $0x60] sm:$0xf]  ;;  %756 = vmatprep.mubr.bf16.mxu0 (!%p2196_p8), %v2198_v49  ;;  %853 = vmatprep.mubr.bf16.mxu1 (!%p2196_p8), %v2200_v50 }
  0x18   : > { %3917 = vst [vmem:[#allocation7_spill] sm:$0xff] %v3218_v14  ;;  %v3223_v15 = vld [vmem:[%s3883_s0 + $0x64] sm:$0xff]  ;;  %v3228_v16 = vld [vmem:[%s3883_s0 + $0x6c] sm:$0xff]  ;;  %v3233_v17 = vld [vmem:[%s3883_s0 + $0x74] sm:$0xf] }
  0x19   : > { %3918 = vst [vmem:[#allocation8_spill] sm:$0xff] %v3233_v17  ;;  %v3238_v18 = vld [vmem:[%s3883_s0 + $0x78] sm:$0xff]  ;;  %v3243_v19 = vld [vmem:[%s3883_s0 + $0x80] sm:$0xff]  ;;  %v3248_v20 = vld [vmem:[%s3883_s0 + $0x88] sm:$0xf] }
  0x1a   : > { %3919 = vst [vmem:[#allocation9_spill] sm:$0xff] %v3248_v20  ;;  %v3253_v21 = vld [vmem:[%s3883_s0 + $0x8c] sm:$0xff]  ;;  %v3258_v22 = vld [vmem:[%s3883_s0 + $0x94] sm:$0xff]  ;;  %v3263_v23 = vld [vmem:[%s3883_s0 + $0x9c] sm:$0xf] }
  0x1b   : > { %3920 = vst [vmem:[#allocation10_spill] sm:$0xff] %v3263_v23  ;;  %v3268_v24 = vld [vmem:[%s3883_s0 + $0xa0] sm:$0xff]  ;;  %v3273_v25 = vld [vmem:[%s3883_s0 + $0xa8] sm:$0xff]  ;;  %v3278_v26 = vld [vmem:[%s3883_s0 + $0xb0] sm:$0xf] }
  0x1c   : > { %3921 = vst [vmem:[#allocation11_spill] sm:$0xff] %v3278_v26  ;;  %v3283_v27 = vld [vmem:[%s3883_s0 + $0xb4] sm:$0xff]  ;;  %v3288_v28 = vld [vmem:[%s3883_s0 + $0xbc] sm:$0xff]  ;;  %v3293_v29 = vld [vmem:[%s3883_s0 + $0xc4] sm:$0xf] }
  0x1d   : > { %3922 = vst [vmem:[#allocation12_spill] sm:$0xff] %v3293_v29  ;;  %v3298_v30 = vld [vmem:[%s3883_s0 + $0xc8] sm:$0xff]  ;;  %v3303_v31 = vld [vmem:[%s3883_s0 + $0xd0] sm:$0xff]  ;;  %v3308_v32 = vld [vmem:[%s3883_s0 + $0xd8] sm:$0xf] }
  0x1e   : > { %3923 = vst [vmem:[#allocation13_spill] sm:$0xff] %v3308_v32  ;;  %v3313_v33 = vld [vmem:[%s3883_s0 + $0xdc] sm:$0xff]  ;;  %v3318_v34 = vld [vmem:[%s3883_s0 + $0xe4] sm:$0xff]  ;;  %v3323_v35 = vld [vmem:[%s3883_s0 + $0xec] sm:$0xf] }
  0x1f   : > { %3924 = vst [vmem:[#allocation14_spill] sm:$0xff] %v3323_v35  ;;  %v3328_v36 = vld [vmem:[%s3883_s0 + $0xf0] sm:$0xff]  ;;  %v3333_v37 = vld [vmem:[%s3883_s0 + $0xf8] sm:$0xff]  ;;  %v3338_v38 = vld [vmem:[%s3883_s0 + $0x100] sm:$0xf]  ;;  %210 = sbr.rel (%p2196_p8) target bundleno = 377 (0x179), region = 32 }
  0x20   : > { %3925 = vst [vmem:[#allocation15_spill] sm:$0xff] %v3333_v37  ;;  %3926 = vst [vmem:[#allocation16_spill] sm:$0xff] %v3338_v38  ;;  %v3343_v39 = vld [vmem:[%s3883_s0 + $0x104] sm:$0xff]  ;;  %v3348_v40 = vld [vmem:[%s3883_s0 + $0x10c] sm:$0xff] }
  0x21   : > { %v3353_v41 = vld [vmem:[%s3883_s0 + $0x114] sm:$0xf]  ;;  %v3358_v42 = vld [vmem:[%s3883_s0 + $0x118] sm:$0xff]  ;;  %v3363_v43 = vld [vmem:[%s3883_s0 + $0x120] sm:$0xff] }
  0x22   : > { %3927 = vst [vmem:[#allocation17_spill] sm:$0xff] %v3353_v41  ;;  %3928 = vst [vmem:[#allocation18_spill] sm:$0xff] %v3358_v42  ;;  %v3368_v44 = vld [vmem:[%s3883_s0 + $0x128] sm:$0xf]  ;;  %v3373_v45 = vld [vmem:[%s3883_s0 + $0x12c] sm:$0xff] }
  0x23   : > { %3929 = vst [vmem:[#allocation19_spill] sm:$0xff] %v3363_v43  ;;  %3930 = vst [vmem:[#allocation20_spill] sm:$0xff] %v3368_v44  ;;  %v3378_v46 = vld [vmem:[%s3883_s0 + $0x134] sm:$0xff]  ;;  %v3383_v47 = vld [vmem:[%s3883_s0 + $0x13c] sm:$0xf] }
  0x24   : > { %3931 = vst [vmem:[#allocation21_spill] sm:$0xff] %v3373_v45  ;;  %3932 = vst [vmem:[#allocation22_spill] sm:$0xff] %v3378_v46  ;;  %v2912_v48 = vld [vmem:[%s3884_s1 + $0x40] sm:$0xff] (!%p2196_p8)   ;;  %v2916_v54 = vld [vmem:[%s3884_s1 + $0x48] sm:$0xff] (!%p2196_p8)  }
  0x25   : > { %3933 = vst [vmem:[#allocation23_spill] sm:$0xff] %v3383_v47  ;;  %v2913_v51 = vld [vmem:[%s3884_s1 + $0xc0] sm:$0xff] (!%p2196_p8)   ;;  %2528 = vmatprep.subr.bf16.mxu0 (!%p2196_p8), %v2912_v48  ;;  %v2917_v55 = vld [vmem:[%s3884_s1 + $0xc8] sm:$0xff] (!%p2196_p8)   ;;  %v2920_v58 = vld [vmem:[%s3884_s1 + $0x50] sm:$0xff] (!%p2196_p8)  }
  0x26   : > { %v2914_v52 = vld [vmem:[%s3884_s1] sm:$0xff]   ;;  %2592 = vmatprep.subr.bf16.mxu1 %v2913_v51  ;;  %v2918_v56 = vld [vmem:[%s3884_s1 + $0x8] sm:$0xff]   ;;  %v2921_v59 = vld [vmem:[%s3884_s1 + $0xd0] sm:$0xff]  }
  0x27   : > { %v2915_v53 = vld [vmem:[%s3884_s1 + $0x80] sm:$0xff]   ;;  %2529 = vmatpush3.bf16.msra.mxu0 %v2914_v52  ;;  %v2919_v57 = vld [vmem:[%s3884_s1 + $0x88] sm:$0xff]   ;;  %v2922_v60 = vld [vmem:[%s3884_s1 + $0x10] sm:$0xff]  }
  0x28   : > { %2593 = vmatpush3.bf16.msra.mxu1 %v2915_v53  ;;  %2530 = vmatprep.subr.bf16.mxu0 %v2916_v54  ;;  %v2923_v61 = vld [vmem:[%s3884_s1 + $0x90] sm:$0xff]   ;;  %v2924_v62 = vld [vmem:[%s3884_s1 + $0x58] sm:$0xff]   ;;  %v2928_v50 = vld [vmem:[%s3884_s1 + $0x60] sm:$0xff]  }
  0x29   : > { %2594 = vmatprep.subr.bf16.mxu1 %v2917_v55  ;;  %v2925_v63 = vld [vmem:[%s3884_s1 + $0xd8] sm:$0xff]   ;;  %v2929_v51 = vld [vmem:[%s3884_s1 + $0xe0] sm:$0xff]   ;;  %v2932_v54 = vld [vmem:[%s3884_s1 + $0x68] sm:$0xff]  }
  0x2a   : > { %v2926_v48 = vld [vmem:[%s3884_s1 + $0x18] sm:$0xff]   ;;  %v2930_v52 = vld [vmem:[%s3884_s1 + $0x20] sm:$0xff]   ;;  %v2933_v55 = vld [vmem:[%s3884_s1 + $0xe8] sm:$0xff]  }
  0x2b   : > { %2531 = vmatpush3.bf16.msra.mxu0 %v2918_v56  ;;  %v2927_v49 = vld [vmem:[%s3884_s1 + $0x98] sm:$0xff]   ;;  %v2931_v53 = vld [vmem:[%s3884_s1 + $0xa0] sm:$0xff]   ;;  %v2934_v56 = vld [vmem:[%s3884_s1 + $0x28] sm:$0xff]  }
  0x2c   : > { %2595 = vmatpush3.bf16.msra.mxu1 %v2919_v57  ;;  %2532 = vmatprep.subr.bf16.mxu0 %v2920_v58  ;;  %v2935_v57 = vld [vmem:[%s3884_s1 + $0xa8] sm:$0xff]   ;;  %v2936_v58 = vld [vmem:[%s3884_s1 + $0x70] sm:$0xff]  }
  0x2d   : > { %2596 = vmatprep.subr.bf16.mxu1 %v2921_v59  ;;  %v2937_v59 = vld [vmem:[%s3884_s1 + $0xf0] sm:$0xff]  }
  0x2f   : > { %2533 = vmatpush3.bf16.msra.mxu0 %v2922_v60  ;;  %v2938_v60 = vld [vmem:[%s3884_s1 + $0x30] sm:$0xff]  }
  0x30   : > { %2597 = vmatpush3.bf16.msra.mxu1 %v2923_v61  ;;  %2534 = vmatprep.subr.bf16.mxu0 %v2924_v62  ;;  %v2939_v61 = vld [vmem:[%s3884_s1 + $0xb0] sm:$0xff]   ;;  %v2940_v62 = vld [vmem:[%s3884_s1 + $0x78] sm:$0xff]  }
  0x31   : > { %2598 = vmatprep.subr.bf16.mxu1 %v2925_v63  ;;  %v2941_v63 = vld [vmem:[%s3884_s1 + $0xf8] sm:$0xff]  }
  0x33   : > { %2535 = vmatpush3.bf16.msra.mxu0 %v2926_v48  ;;  %v2942_v48 = vld [vmem:[%s3884_s1 + $0x38] sm:$0xff]  }
  0x34   : > { %2599 = vmatpush3.bf16.msra.mxu1 %v2927_v49  ;;  %2536 = vmatprep.subr.bf16.mxu0 %v2928_v50  ;;  %v2943_v49 = vld [vmem:[%s3884_s1 + $0xb8] sm:$0xff]   ;;  %v2197_v50 = vcombine.low %v3146_v0, %v3163_v3 }
  0x35   : > { %2600 = vmatprep.subr.bf16.mxu1 %v2929_v51  ;;  %v2199_v51 = vcombine.low %v3151_v1, %v3168_v4 }
  0x37   : > { %2537 = vmatpush3.bf16.msra.mxu0 %v2930_v52  ;;  %v2944_v52 = vld [vmem:[%s3884_s1 + $0x100] sm:$0xff]  }
  0x38   : > { %2601 = vmatpush3.bf16.msra.mxu1 %v2931_v53  ;;  %2538 = vmatprep.subr.bf16.mxu0 %v2932_v54  ;;  %v2203_v53 = vcombine.high %v3178_v6, %v3193_v9  ;;  %v2205_v54 = vcombine.high %v3183_v7, %v3198_v10 }
  0x39   : > { %2602 = vmatprep.subr.bf16.mxu1 %v2933_v55  ;;  %v2945_v55 = vld [vmem:[%s3884_s1 + $0x108] sm:$0xff]  }
  0x3b   : > { %2539 = vmatpush3.bf16.msra.mxu0 %v2934_v56  ;;  %v2946_v56 = vld [vmem:[%s3884_s1 + $0x110] sm:$0xff]  }
  0x3c   : > { %2603 = vmatpush3.bf16.msra.mxu1 %v2935_v57  ;;  %2540 = vmatprep.subr.bf16.mxu0 %v2936_v58  ;;  %v2202_v57 = vcombine.low %v3178_v6, %v3193_v9  ;;  %v2204_v58 = vcombine.low %v3183_v7, %v3198_v10 }
  0x3d   : > { %2604 = vmatprep.subr.bf16.mxu1 %v2937_v59  ;;  %v2208_v59 = vcombine.high %v3208_v12, %v3223_v15 }
  0x3f   : > { %2541 = vmatpush3.bf16.msra.mxu0 %v2938_v60  ;;  %v2210_v60 = vcombine.high %v3213_v13, %v3228_v16 }
  0x40   : > { %2605 = vmatpush3.bf16.msra.mxu1 %v2939_v61  ;;  %2542 = vmatprep.subr.bf16.mxu0 %v2940_v62  ;;  %v2947_v61 = vld [vmem:[%s3884_s1 + $0x118] sm:$0xff]   ;;  %v2207_v62 = vcombine.low %v3208_v12, %v3223_v15 }
  0x41   : > { %2606 = vmatprep.subr.bf16.mxu1 %v2941_v63  ;;  %v2209_v63 = vcombine.low %v3213_v13, %v3228_v16 }
  0x43   : > { %2543 = vmatpush3.bf16.msra.mxu0 %v2942_v48  ;;  %v2213_v48 = vcombine.high %v3238_v18, %v3253_v21 }
  0x44   : > { %2607 = vmatpush3.bf16.msra.mxu1 %v2943_v49  ;;  %2808 = vmatprep.subr.bf16.mxu0 %v2944_v52  ;;  %v2215_v49 = vcombine.high %v3243_v19, %v3258_v22 }
  0x45   : > { %2856 = vmatprep.subr.bf16.mxu1 %v2944_v52 }
  0x46   : > { %757 = vmatmul.mubr.bf16.vlgmr.msra.gmra.mrb[0].mxu0 %v2197_v50  ;;  %v2212_v50 = vcombine.low %v3238_v18, %v3253_v21 }
  0x47   : > { %854 = vmatmul.mubr.bf16.vlgmr.msra.gmra.mrb[0].mxu1 %v2199_v51  ;;  %2809 = vmatpush3.bf16.msra.mxu0 %v2944_v52  ;;  %v2214_v51 = vcombine.low %v3243_v19, %v3258_v22 }
  0x48   : > { %2860 = vmatpush3.bf16.msra.mxu1 %v2944_v52  ;;  %764 = vmatprep.mubr.bf16.mxu0 %v2203_v53  ;;  %v2218_v52 = vcombine.high %v3268_v24, %v3283_v27  ;;  %v2220_v53 = vcombine.high %v3273_v25, %v3288_v28 }
  0x49   : > { %861 = vmatprep.mubr.bf16.mxu1 %v2205_v54  ;;  %2810 = vmatprep.subr.bf16.mxu0 %v2945_v55  ;;  %v2217_v54 = vcombine.low %v3268_v24, %v3283_v27 }
  0x4a   : > { %2857 = vmatprep.subr.bf16.mxu1 %v2945_v55 }
  0x4b   : > { %2811 = vmatpush3.bf16.msra.mxu0 %v2945_v55 }
  0x4c   : > { %2861 = vmatpush3.bf16.msra.mxu1 %v2945_v55  ;;  %2812 = vmatprep.subr.bf16.mxu0 %v2946_v56  ;;  %v2219_v55 = vcombine.low %v3273_v25, %v3288_v28 }
  0x4d   : > { %2858 = vmatprep.subr.bf16.mxu1 %v2946_v56 }
  0x4e   : > { %765 = vmatmul.mubr.bf16.gmra.mrb[4].mxu0 %v2202_v57  ;;  %v2225_v57 = vcombine.high %v3303_v31, %v3318_v34 }
  0x4f   : > { %862 = vmatmul.mubr.bf16.gmra.mrb[4].mxu1 %v2204_v58  ;;  %772 = vmatprep.mubr.bf16.mxu0 %v2208_v59  ;;  %v2222_v58 = vcombine.low %v3298_v30, %v3313_v33  ;;  %v2224_v59 = vcombine.low %v3303_v31, %v3318_v34 }
  0x50   : > { %869 = vmatprep.mubr.bf16.mxu1 %v2210_v60  ;;  %2813 = vmatpush3.bf16.msra.mxu0 %v2946_v56  ;;  %v2228_v60 = vcombine.high %v3328_v36, %v3343_v39 }
  0x51   : > { %2862 = vmatpush3.bf16.msra.mxu1 %v2946_v56  ;;  %2814 = vmatprep.subr.bf16.mxu0 %v2947_v61  ;;  %v2223_v56 = vcombine.high %v3298_v30, %v3313_v33 }
  0x52   : > { %2859 = vmatprep.subr.bf16.mxu1 %v2947_v61 }
  0x54   : > { %2815 = vmatpush3.bf16.msra.mxu0 %v2947_v61 }
  0x55   : > { %2863 = vmatpush3.bf16.msra.mxu1 %v2947_v61  ;;  %v2230_v61 = vcombine.high %v3333_v37, %v3348_v40 }
  0x56   : > { %773 = vmatmul.mubr.bf16.gmra.mrb[8].mxu0 %v2207_v62  ;;  %v2227_v62 = vcombine.low %v3328_v36, %v3343_v39 }
  0x57   : > { %870 = vmatmul.mubr.bf16.gmra.mrb[8].mxu1 %v2209_v63  ;;  %780 = vmatprep.mubr.bf16.mxu0 %v2213_v48  ;;  %v2229_v63 = vcombine.low %v3333_v37, %v3348_v40  ;;  %v2233_v48 = vcombine.high %v3358_v42, %v3373_v45 }
  0x58   : > { %877 = vmatprep.mubr.bf16.mxu1 %v2215_v49  ;;  %v2235_v49 = vcombine.high %v3363_v43, %v3378_v46 }
  0x5e   : > { %781 = vmatmul.mubr.bf16.gmra.mrb[12].mxu0 %v2212_v50  ;;  %v2232_v50 = vcombine.low %v3358_v42, %v3373_v45 }
  0x5f   : > { %878 = vmatmul.mubr.bf16.gmra.mrb[12].mxu1 %v2214_v51  ;;  %788 = vmatprep.mubr.bf16.mxu0 %v2218_v52  ;;  %v2234_v51 = vcombine.low %v3363_v43, %v3378_v46  ;;  %v2201_v52 = vcombine.low %v3156_v2, %v3173_v5 }
  0x60   : > { %885 = vmatprep.mubr.bf16.mxu1 %v2220_v53  ;;  %v2221_v53 = vcombine.low %v3278_v26, %v3293_v29 }
  0x66   : > { %789 = vmatmul.mubr.bf16.gmra.mrb[16].mxu0 %v2217_v54  ;;  %v2206_v54 = vcombine.low %v3188_v8, %v3203_v11 }
  0x67   : > { %886 = vmatmul.mubr.bf16.gmra.mrb[16].mxu1 %v2219_v55  ;;  %796 = vmatprep.mubr.bf16.mxu0 %v2223_v56  ;;  %v2226_v55 = vcombine.low %v3308_v32, %v3323_v35  ;;  %v2211_v56 = vcombine.low %v3218_v14, %v3233_v17 }
  0x68   : > { %893 = vmatprep.mubr.bf16.mxu1 %v2225_v57  ;;  %v2231_v57 = vcombine.low %v3338_v38, %v3353_v41 }
  0x6e   : > { %797 = vmatmul.mubr.bf16.gmra.mrb[20].mxu0 %v2222_v58  ;;  %v2216_v58 = vcombine.low %v3248_v20, %v3263_v23 }
  0x6f   : > { %894 = vmatmul.mubr.bf16.gmra.mrb[20].mxu1 %v2224_v59  ;;  %804 = vmatprep.mubr.bf16.mxu0 %v2228_v60  ;;  %v2236_v59 = vcombine.low %v3368_v44, %v3383_v47 }
  0x70   : > { %901 = vmatprep.mubr.bf16.mxu1 %v2230_v61 }
  0x76   : > { %805 = vmatmul.mubr.bf16.gmra.mrb[24].mxu0 %v2227_v62 }
  0x77   : > { %902 = vmatmul.mubr.bf16.gmra.mrb[24].mxu1 %v2229_v63  ;;  %812 = vmatprep.mubr.bf16.mxu0 %v2233_v48 }
  0x78   : > { %909 = vmatprep.mubr.bf16.mxu1 %v2235_v49 }
  0x7e   : > { %813 = vmatmul.mubr.bf16.gmra.mrb[28].mxu0 %v2232_v50 }
  0x7f   : > { %910 = vmatmul.mubr.bf16.gmra.mrb[28].mxu1 %v2234_v51  ;;  %2816 = vmatprep.mubr.msk.bf16.mxu0 %vm699_vm0, %v2201_v52 }
  0x80   : > { %2824 = vmatprep.mubr.msk.bf16.mxu1 %vm699_vm0, %v2221_v53 }
  0x86   : > { %2817 = vmatmul.mubr.msk.bf16.vlgmr.msra.gmra.mrb[32].mxu0 %vm699_vm0, %v2206_v54 }
  0x87   : > { %2825 = vmatmul.mubr.msk.bf16.vlgmr.msra.gmra.mrb[32].mxu1 %vm699_vm0, %v2226_v55  ;;  %2820 = vmatprep.mubr.msk.bf16.mxu0 %vm699_vm0, %v2211_v56 }
  0x88   : > { %2828 = vmatprep.mubr.msk.bf16.mxu1 %vm699_vm0, %v2231_v57 }
  0x8e   : > { %2821 = vmatmul.mubr.msk.bf16.gmra.mrb[36].mxu0 %vm699_vm0, %v2216_v58 }
  0x8f   : > { %2829 = vmatmul.mubr.msk.bf16.gmra.mrb[36].mxu1 %vm699_vm0, %v2236_v59 }
 0x119   : > { %v2544_v60 = vpop.f32.mrb[0].mxu0 }
 0x11a   : > { %v2608_v61 = vpop.f32.mrb[0].mxu1  ;;  %v2545_v62 = vpop.f32.mrb[1].mxu0 }
 0x11b   : > { %v2546_v63 = vadd.f32 %v2545_v62, %v2544_v60  ;;  %v2609_v48 = vpop.f32.mrb[1].mxu1  ;;  %v2547_v49 = vpop.f32.mrb[2].mxu0 }
 0x11c   : > { %v2610_v50 = vadd.f32 %v2609_v48, %v2608_v61  ;;  %v2611_v51 = vpop.f32.mrb[2].mxu1  ;;  %v2548_v52 = vpop.f32.mrb[3].mxu0 }
 0x11d   : > { %v2549_v53 = vadd.f32 %v2548_v52, %v2547_v49  ;;  %v2612_v54 = vpop.f32.mrb[3].mxu1 }
 0x11e   : > { %v2613_v55 = vadd.f32 %v2612_v54, %v2611_v51  ;;  %v3585_v56 = vadd.f32 %v2610_v50, %v2546_v63 }
 0x120   : > { %v3587_v57 = vadd.f32 %v2613_v55, %v2549_v53 }
 0x121   : > { %v2550_v44 = vpop.f32.mrb[4].mxu0 }
 0x122   : > { %v2614_v58 = vpop.f32.mrb[4].mxu1  ;;  %v2551_v47 = vpop.f32.mrb[5].mxu0 }
 0x123   : > { %v2552_v59 = vadd.f32 %v2551_v47, %v2550_v44  ;;  %v2615_v20 = vpop.f32.mrb[5].mxu1  ;;  %v2553_v23 = vpop.f32.mrb[6].mxu0 }
 0x124   : > { %v2616_v38 = vadd.f32 %v2615_v20, %v2614_v58  ;;  %v2617_v60 = vpop.f32.mrb[6].mxu1  ;;  %v2554_v62 = vpop.f32.mrb[7].mxu0 }
 0x125   : > { %v2555_v41 = vadd.f32 %v2554_v62, %v2553_v23  ;;  %v2618_v61 = vpop.f32.mrb[7].mxu1 }
 0x126   : > { %v2619_v48 = vadd.f32 %v2618_v61, %v2617_v60  ;;  %v3589_v14 = vadd.f32 %v2616_v38, %v2552_v59 }
 0x128   : > { %v3591_v49 = vadd.f32 %v2619_v48, %v2555_v41 }
 0x129   : > { %v2556_v63 = vpop.f32.mrb[8].mxu0 }
 0x12a   : > { %v2620_v50 = vpop.f32.mrb[8].mxu1  ;;  %v2557_v51 = vpop.f32.mrb[9].mxu0 }
 0x12b   : > { %v2558_v52 = vadd.f32 %v2557_v51, %v2556_v63  ;;  %v2621_v53 = vpop.f32.mrb[9].mxu1  ;;  %v2559_v54 = vpop.f32.mrb[10].mxu0 }
 0x12c   : > { %v2622_v55 = vadd.f32 %v2621_v53, %v2620_v50  ;;  %v2623_v44 = vpop.f32.mrb[10].mxu1  ;;  %v2560_v47 = vpop.f32.mrb[11].mxu0 }
 0x12d   : > { %v2561_v17 = vadd.f32 %v2560_v47, %v2559_v54  ;;  %v2624_v20 = vpop.f32.mrb[11].mxu1 }
 0x12e   : > { %v2625_v58 = vadd.f32 %v2624_v20, %v2623_v44  ;;  %v3593_v32 = vadd.f32 %v2622_v55, %v2558_v52 }
 0x130   : > { %v3595_v23 = vadd.f32 %v2625_v58, %v2561_v17 }
 0x131   : > { %v2562_v38 = vpop.f32.mrb[12].mxu0 }
 0x132   : > { %v2626_v59 = vpop.f32.mrb[12].mxu1  ;;  %v2563_v41 = vpop.f32.mrb[13].mxu0 }
 0x133   : > { %v2564_v60 = vadd.f32 %v2563_v41, %v2562_v38  ;;  %v2627_v62 = vpop.f32.mrb[13].mxu1  ;;  %v2565_v61 = vpop.f32.mrb[14].mxu0 }
 0x134   : > { %v2628_v48 = vadd.f32 %v2627_v62, %v2626_v59  ;;  %v2629_v63 = vpop.f32.mrb[14].mxu1  ;;  %v2566_v51 = vpop.f32.mrb[15].mxu0 }
 0x135   : > { %v2567_v35 = vadd.f32 %v2566_v51, %v2565_v61  ;;  %v2630_v50 = vpop.f32.mrb[15].mxu1 }
 0x136   : > { %v2631_v53 = vadd.f32 %v2630_v50, %v2629_v63  ;;  %v3597_v8 = vadd.f32 %v2628_v48, %v2564_v60 }
 0x138   : > { %v3599_v54 = vadd.f32 %v2631_v53, %v2567_v35 }
 0x139   : > { %v2568_v52 = vpop.f32.mrb[16].mxu0 }
 0x13a   : > { %v2632_v55 = vpop.f32.mrb[16].mxu1  ;;  %v2569_v17 = vpop.f32.mrb[17].mxu0 }
 0x13b   : > { %v2570_v44 = vadd.f32 %v2569_v17, %v2568_v52  ;;  %v2633_v47 = vpop.f32.mrb[17].mxu1  ;;  %v2571_v20 = vpop.f32.mrb[18].mxu0 }
 0x13c   : > { %v2634_v58 = vadd.f32 %v2633_v47, %v2632_v55  ;;  %v2635_v38 = vpop.f32.mrb[18].mxu1  ;;  %v2572_v41 = vpop.f32.mrb[19].mxu0 }
 0x13d   : > { %v2573_v11 = vadd.f32 %v2572_v41, %v2571_v20  ;;  %v2636_v59 = vpop.f32.mrb[19].mxu1 }
 0x13e   : > { %v2637_v62 = vadd.f32 %v2636_v59, %v2635_v38  ;;  %v888_v26 = vadd.f32 %v2634_v58, %v2570_v44 }
 0x140   : > { %v891_v61 = vadd.f32 %v2637_v62, %v2573_v11 }
 0x141   : > { %v2574_v51 = vpop.f32.mrb[20].mxu0 }
 0x142   : > { %v2638_v63 = vpop.f32.mrb[20].mxu1  ;;  %v2575_v60 = vpop.f32.mrb[21].mxu0 }
 0x143   : > { %v2576_v48 = vadd.f32 %v2575_v60, %v2574_v51  ;;  %v2639_v35 = vpop.f32.mrb[21].mxu1  ;;  %v2577_v50 = vpop.f32.mrb[22].mxu0 }
 0x144   : > { %v2640_v53 = vadd.f32 %v2639_v35, %v2638_v63  ;;  %v2641_v29 = vpop.f32.mrb[22].mxu1  ;;  %v2578_v2 = vpop.f32.mrb[23].mxu0 }
 0x145   : > { %v2579_v52 = vadd.f32 %v2578_v2, %v2577_v50  ;;  %v2642_v17 = vpop.f32.mrb[23].mxu1 }
 0x146   : > { %v2643_v5 = vadd.f32 %v2642_v17, %v2641_v29  ;;  %v896_v55 = vadd.f32 %v2640_v53, %v2576_v48 }
 0x148   : > { %v899_v47 = vadd.f32 %v2643_v5, %v2579_v52 }
 0x149   : > { %v2580_v43 = vpop.f32.mrb[24].mxu0 }
 0x14a   : > { %v2644_v20 = vpop.f32.mrb[24].mxu1  ;;  %v2581_v41 = vpop.f32.mrb[25].mxu0 }
 0x14b   : > { %v2582_v38 = vadd.f32 %v2581_v41, %v2580_v43  ;;  %v2645_v44 = vpop.f32.mrb[25].mxu1  ;;  %v2583_v11 = vpop.f32.mrb[26].mxu0 }
 0x14c   : > { %v2646_v58 = vadd.f32 %v2645_v44, %v2644_v20  ;;  %v2647_v59 = vpop.f32.mrb[26].mxu1  ;;  %v2584_v62 = vpop.f32.mrb[27].mxu0 }
 0x14d   : > { %v2585_v51 = vadd.f32 %v2584_v62, %v2583_v11  ;;  %v2648_v60 = vpop.f32.mrb[27].mxu1 }
 0x14e   : > { %v2649_v46 = vadd.f32 %v2648_v60, %v2647_v59  ;;  %v904_v63 = vadd.f32 %v2646_v58, %v2582_v38 }
 0x150   : > { %v907_v35 = vadd.f32 %v2649_v46, %v2585_v51 }
 0x151   : > { %v2586_v42 = vpop.f32.mrb[28].mxu0 }
 0x152   : > { %v2650_v2 = vpop.f32.mrb[28].mxu1  ;;  %v2587_v50 = vpop.f32.mrb[29].mxu0 }
 0x153   : > { %v2588_v29 = vadd.f32 %v2587_v50, %v2586_v42  ;;  %v2651_v48 = vpop.f32.mrb[29].mxu1  ;;  %v2589_v5 = vpop.f32.mrb[30].mxu0 }
 0x154   : > { %v2652_v53 = vadd.f32 %v2651_v48, %v2650_v2  ;;  %v2653_v52 = vpop.f32.mrb[30].mxu1  ;;  %v2590_v17 = vpop.f32.mrb[31].mxu0 }
 0x155   : > { %v2591_v43 = vadd.f32 %v2590_v17, %v2589_v5  ;;  %v2654_v41 = vpop.f32.mrb[31].mxu1 }
 0x156   : > { %v2655_v45 = vadd.f32 %v2654_v41, %v2653_v52  ;;  %v912_v20 = vadd.f32 %v2652_v53, %v2588_v29 }
 0x158   : > { %v915_v44 = vadd.f32 %v2655_v45, %v2591_v43 }
 0x159   : > { %v2818_v37 = vpop.f32.mrb[32].mxu0 }
 0x15a   : > { %v961_v11 = vadd.f32 %v2818_v37, %v3589_v14  ;;  %v2826_v59 = vpop.f32.mrb[32].mxu1  ;;  %v952_v38 = vpop.f32.mrb[33].mxu0 }
 0x15b   : > { %v993_v46 = vadd.f32 %v2826_v59, %v896_v55  ;;  %v953_v58 = vadd.f32 %v952_v38, %v3585_v56  ;;  %v984_v62 = vpop.f32.mrb[33].mxu1  ;;  %v2819_v42 = vpop.f32.mrb[34].mxu0 }
 0x15c   : > { %2948 = vtanh.f32 %v961_v11  ;;  %v985_v51 = vadd.f32 %v984_v62, %v888_v26  ;;  %v964_v60 = vadd.f32 %v2819_v42, %v3591_v49  ;;  %v2827_v2 = vpop.f32.mrb[34].mxu1  ;;  %v955_v50 = vpop.f32.mrb[35].mxu0 }
 0x15d   : > { %2950 = vtanh.f32 %v993_v46  ;;  %v996_v48 = vadd.f32 %v2827_v2, %v899_v47  ;;  %v956_v45 = vadd.f32 %v955_v50, %v3587_v57  ;;  %v987_v29 = vpop.f32.mrb[35].mxu1 }
 0x15e   : > { %2952 = vtanh.f32 %v953_v58  ;;  %v988_v14 = vadd.f32 %v987_v29, %v891_v61 }
 0x15f   : > { %2954 = vtanh.f32 %v985_v51 }
 0x160   : > { %2956 = vtanh.f32 %v964_v60 }
 0x161   : > { %2958 = vtanh.f32 %v996_v48  ;;  %v2822_v37 = vpop.f32.mrb[36].mxu0 }
 0x162   : > { %2960 = vtanh.f32 %v956_v45  ;;  %v977_v56 = vadd.f32 %v2822_v37, %v3597_v8  ;;  %v2830_v55 = vpop.f32.mrb[36].mxu1  ;;  %v968_v26 = vpop.f32.mrb[37].mxu0 }
 0x163   : > { %2962 = vtanh.f32 %v988_v14  ;;  %v1009_v49 = vadd.f32 %v2830_v55, %v912_v20  ;;  %v969_v5 = vadd.f32 %v968_v26, %v3593_v32  ;;  %v1000_v53 = vpop.f32.mrb[37].mxu1  ;;  %v2823_v47 = vpop.f32.mrb[38].mxu0 }
 0x164   : > { %2964 = vtanh.f32 %v977_v56  ;;  %v1001_v57 = vadd.f32 %v1000_v53, %v904_v63  ;;  %v980_v52 = vadd.f32 %v2823_v47, %v3599_v54  ;;  %v2831_v61 = vpop.f32.mrb[38].mxu1  ;;  %v971_v17 = vpop.f32.mrb[39].mxu0 }
 0x165   : > { %2966 = vtanh.f32 %v1009_v49  ;;  %v1012_v43 = vadd.f32 %v2831_v61, %v915_v44  ;;  %v972_v41 = vadd.f32 %v971_v17, %v3595_v23  ;;  %v1003_v11 = vpop.f32.mrb[39].mxu1 }
 0x166   : > { %v2949_v8 = vpop.eup %2948  ;;  %2968 = vtanh.f32 %v969_v5  ;;  %v1004_v59 = vadd.f32 %v1003_v11, %v907_v35 }
 0x167   : > { %v2951_v20 = vpop.eup %2950  ;;  %2970 = vtanh.f32 %v1001_v57 }
 0x168   : > { %v2953_v32 = vpop.eup %2952  ;;  %2972 = vtanh.f32 %v980_v52 }
 0x169   : > { %v2955_v38 = vpop.eup %2954  ;;  %2974 = vtanh.f32 %v1012_v43 }
 0x16a   : > { %v2957_v54 = vpop.eup %2956  ;;  %2976 = vtanh.f32 %v972_v41 }
 0x16b   : > { %v2959_v63 = vpop.eup %2958  ;;  %v2442_v44 = vpack.c.bf16 %v2957_v54, %v2949_v8  ;;  %2978 = vtanh.f32 %v1004_v59 }
 0x16c   : > { %v2961_v23 = vpop.eup %2960  ;;  %v2462_v46 = vpack.c.bf16 %v2959_v63, %v2951_v20 }
 0x16d   : > { %v2963_v58 = vpop.eup %2962  ;;  %2514 = vst [vmem:[%s3386_s14 + $0x8] sm:$0xff] %v2442_v44   ;;  %v2437_v35 = vpack.c.bf16 %v2961_v23, %v2953_v32 }
 0x16e   : > { %v2965_v62 = vpop.eup %2964  ;;  %2518 = vst [vmem:[%s3386_s14 + $0x28] sm:$0xff] %v2462_v46   ;;  %v2457_v42 = vpack.c.bf16 %v2963_v58, %v2955_v38 }
 0x16f   : > { %v2967_v51 = vpop.eup %2966  ;;  %2438 = vst [vmem:[%s3386_s14] sm:$0xff] %v2437_v35  }
 0x170   : > { %v2969_v60 = vpop.eup %2968  ;;  %2517 = vst [vmem:[%s3386_s14 + $0x20] sm:$0xff] %v2457_v42  }
 0x171   : > { %v2971_v2 = vpop.eup %2970 }
 0x172   : > { %v2973_v50 = vpop.eup %2972 }
 0x173   : > { %v2975_v48 = vpop.eup %2974  ;;  %v2452_v45 = vpack.c.bf16 %v2973_v50, %v2965_v62 }
 0x174   : > { %v2977_v29 = vpop.eup %2976  ;;  %v2472_v14 = vpack.c.bf16 %v2975_v48, %v2967_v51 }
 0x175   : > { %v2979_v37 = vpop.eup %2978  ;;  %2516 = vst [vmem:[%s3386_s14 + $0x18] sm:$0xff] %v2452_v45   ;;  %v2447_v56 = vpack.c.bf16 %v2977_v29, %v2969_v60 }
 0x176   : > { %2520 = vst [vmem:[%s3386_s14 + $0x38] sm:$0xff] %v2472_v14   ;;  %v2467_v55 = vpack.c.bf16 %v2979_v37, %v2971_v2 }
 0x177   : > { %2515 = vst [vmem:[%s3386_s14 + $0x10] sm:$0xff] %v2447_v56  }
 0x178   : > { %2519 = vst [vmem:[%s3386_s14 + $0x30] sm:$0xff] %v2467_v55  }
 0x179 PF: > { %p2297_p9 = scmp.ne.s32.totalorder %s3078_s11, 1 }
 0x17a   : > { %v2980_v26 = vld [vmem:[%s3884_s1 + $0x160] sm:$0xff] (!%p2297_p9)   ;;  %v2299_v49 = vcombine.high (!%p2297_p9), %v3146_v0, %v3163_v3  ;;  %v2301_v5 = vcombine.high (!%p2297_p9), %v3151_v1, %v3168_v4  ;;  %v2984_v52 = vld [vmem:[%s3884_s1 + $0x168] sm:$0xff] (!%p2297_p9)   ;;  %v2988_v41 = vld [vmem:[%s3884_s1 + $0x170] sm:$0xff] (!%p2297_p9)   ;;  %v2298_v37 = vcombine.low (!%p2297_p9), %v3146_v0, %v3163_v3  ;;  %v2300_v56 = vcombine.low (!%p2297_p9), %v3151_v1, %v3168_v4 }
 0x17b   : > { %1114 = sbr.rel (%p2297_p9) target bundleno = 719 (0x2cf), region = 36  ;;  %v2981_v53 = vld [vmem:[%s3884_s1 + $0x1e0] sm:$0xff] (!%p2297_p9)   ;;  %2668 = vmatprep.subr.bf16.mxu0 (!%p2297_p9), %v2980_v26  ;;  %v2985_v61 = vld [vmem:[%s3884_s1 + $0x1e8] sm:$0xff] (!%p2297_p9)   ;;  %v2989_v11 = vld [vmem:[%s3884_s1 + $0x1f0] sm:$0xff] (!%p2297_p9)   ;;  %v2304_v26 = vcombine.high (!%p2297_p9), %v3178_v6, %v3193_v9  ;;  %v2303_v3 = vcombine.low (!%p2297_p9), %v3178_v6, %v3193_v9  ;;  %v2305_v4 = vcombine.low (!%p2297_p9), %v3183_v7, %v3198_v10  ;;  %v2308_v6 = vcombine.low (!%p2297_p9), %v3208_v12, %v3223_v15 }
 0x17c   : > { %v2982_v47 = vld [vmem:[%s3884_s1 + $0x120] sm:$0xff] (!%p2297_p9)   ;;  %1660 = vmatprep.mubr.bf16.mxu0 (!%p2297_p9), %v2299_v49  ;;  %2732 = vmatprep.subr.bf16.mxu1 (!%p2297_p9), %v2981_v53  ;;  %v2986_v17 = vld [vmem:[%s3884_s1 + $0x128] sm:$0xff] (!%p2297_p9)   ;;  %v2990_v8 = vld [vmem:[%s3884_s1 + $0x130] sm:$0xff] (!%p2297_p9)   ;;  %v2306_v49 = vcombine.high (!%p2297_p9), %v3183_v7, %v3198_v10  ;;  %v2311_v53 = vcombine.high (!%p2297_p9), %v3213_v13, %v3228_v16  ;;  %v2310_v7 = vcombine.low (!%p2297_p9), %v3213_v13, %v3228_v16  ;;  %vm1603_vm1 = vcmask (!%p2297_p9), 523264  }
 0x17d   : > { %v2983_v57 = vld [vmem:[%s3884_s1 + $0x1a0] sm:$0xff] (!%p2297_p9)   ;;  %1757 = vmatprep.mubr.bf16.mxu1 (!%p2297_p9), %v2301_v5  ;;  %2669 = vmatpush3.bf16.msra.mxu0 (!%p2297_p9), %v2982_v47  ;;  %v2987_v43 = vld [vmem:[%s3884_s1 + $0x1a8] sm:$0xff] (!%p2297_p9)   ;;  %v2991_v59 = vld [vmem:[%s3884_s1 + $0x1b0] sm:$0xff] (!%p2297_p9)   ;;  %v2309_v5 = vcombine.high (!%p2297_p9), %v3208_v12, %v3223_v15  ;;  %v2314_v9 = vcombine.high (!%p2297_p9), %v3238_v18, %v3253_v21  ;;  %v2316_v10 = vcombine.high (!%p2297_p9), %v3243_v19, %v3258_v22 }
 0x17e   : > { %2733 = vmatpush3.bf16.msra.mxu1 (!%p2297_p9), %v2983_v57  ;;  %2670 = vmatprep.subr.bf16.mxu0 (!%p2297_p9), %v2984_v52  ;;  %v2992_v20 = vld [vmem:[%s3884_s1 + $0x178] sm:$0xff] (!%p2297_p9)   ;;  %v2996_v63 = vld [vmem:[%s3884_s1 + $0x180] sm:$0xff] (!%p2297_p9)   ;;  %v3000_v58 = vld [vmem:[%s3884_s1 + $0x188] sm:$0xff] (!%p2297_p9)   ;;  %v2313_v57 = vcombine.low (!%p2297_p9), %v3238_v18, %v3253_v21  ;;  %v2315_v12 = vcombine.low (!%p2297_p9), %v3243_v19, %v3258_v22  ;;  %v2319_v13 = vcombine.high (!%p2297_p9), %v3268_v24, %v3283_v27 }
 0x17f   : > { %2734 = vmatprep.subr.bf16.mxu1 (!%p2297_p9), %v2985_v61  ;;  %v2993_v32 = vld [vmem:[%s3884_s1 + $0x1f8] sm:$0xff] (!%p2297_p9)   ;;  %v2997_v44 = vld [vmem:[%s3884_s1 + $0x200] sm:$0xff] (!%p2297_p9)   ;;  %v3001_v35 = vld [vmem:[%s3884_s1 + $0x208] sm:$0xff] (!%p2297_p9)   ;;  %v2321_v15 = vcombine.high (!%p2297_p9), %v3273_v25, %v3288_v28  ;;  %v2318_v16 = vcombine.low (!%p2297_p9), %v3268_v24, %v3283_v27  ;;  %v2320_v52 = vcombine.low (!%p2297_p9), %v3273_v25, %v3288_v28  ;;  %v2324_v18 = vcombine.high (!%p2297_p9), %v3298_v30, %v3313_v33 }
 0x180   : > { %v2994_v38 = vld [vmem:[%s3884_s1 + $0x138] sm:$0xff] (!%p2297_p9)   ;;  %v2998_v23 = vld [vmem:[%s3884_s1 + $0x140] sm:$0xff] (!%p2297_p9)   ;;  %v3002_v62 = vld [vmem:[%s3884_s1 + $0x148] sm:$0xff] (!%p2297_p9)   ;;  %v2326_v19 = vcombine.high (!%p2297_p9), %v3303_v31, %v3318_v34  ;;  %v2323_v21 = vcombine.low (!%p2297_p9), %v3298_v30, %v3313_v33  ;;  %v2325_v22 = vcombine.low (!%p2297_p9), %v3303_v31, %v3318_v34  ;;  %v2329_v24 = vcombine.high (!%p2297_p9), %v3328_v36, %v3343_v39 }
 0x181   : > { %2671 = vmatpush3.bf16.msra.mxu0 (!%p2297_p9), %v2986_v17  ;;  %v2995_v54 = vld [vmem:[%s3884_s1 + $0x1b8] sm:$0xff] (!%p2297_p9)   ;;  %v2999_v46 = vld [vmem:[%s3884_s1 + $0x1c0] sm:$0xff] (!%p2297_p9)   ;;  %v3003_v42 = vld [vmem:[%s3884_s1 + $0x1c8] sm:$0xff] (!%p2297_p9)   ;;  %v2328_v28 = vcombine.low (!%p2297_p9), %v3328_v36, %v3343_v39 }
 0x182   : > { %2735 = vmatpush3.bf16.msra.mxu1 %v2987_v43  ;;  %2672 = vmatprep.subr.bf16.mxu0 %v2988_v41  ;;  %v3004_v51 = vld [vmem:[%s3884_s1 + $0x190] sm:$0xff]   ;;  %v3008_v48 = vld [vmem:[%s3884_s1 + $0x198] sm:$0xff]   ;;  %v3012_v55 = vld [vmem:[%s3884_s1 + $0x220] sm:$0xff]  }
 0x183   : > { %2736 = vmatprep.subr.bf16.mxu1 %v2989_v11  ;;  %v3005_v60 = vld [vmem:[%s3884_s1 + $0x210] sm:$0xff]   ;;  %v3009_v45 = vld [vmem:[%s3884_s1 + $0x218] sm:$0xff]   ;;  %v3013_v0 = vld [vmem:[%s3884_s1 + $0x228] sm:$0xff]  }
 0x184   : > { %v3006_v2 = vld [vmem:[%s3884_s1 + $0x150] sm:$0xff]   ;;  %v3010_v29 = vld [vmem:[%s3884_s1 + $0x158] sm:$0xff]   ;;  %v3934_v25 = vld [vmem:[#allocation15_spill] sm:$0xff] }
 0x185   : > { %2673 = vmatpush3.bf16.msra.mxu0 %v2990_v8  ;;  %v3007_v50 = vld [vmem:[%s3884_s1 + $0x1d0] sm:$0xff]   ;;  %v3011_v14 = vld [vmem:[%s3884_s1 + $0x1d8] sm:$0xff]   ;;  %v2331_v27 = vcombine.high %v3934_v25, %v3348_v40  ;;  %v2330_v61 = vcombine.low %v3934_v25, %v3348_v40  ;;  %v3938_v34 = vld [vmem:[#allocation19_spill] sm:$0xff] }
 0x186   : > { %2737 = vmatpush3.bf16.msra.mxu1 %v2991_v59  ;;  %2674 = vmatprep.subr.bf16.mxu0 %v2992_v20  ;;  %v3014_v1 = vld [vmem:[%s3884_s1 + $0x230] sm:$0xff]   ;;  %v3015_v47 = vld [vmem:[%s3884_s1 + $0x238] sm:$0xff]   ;;  %v3939_v36 = vld [vmem:[#allocation4_spill] sm:$0xff] }
 0x187   : > { %2738 = vmatprep.subr.bf16.mxu1 %v2993_v32  ;;  %v3935_v30 = vld [vmem:[#allocation21_spill] sm:$0xff]  ;;  %v3936_v33 = vld [vmem:[#allocation18_spill] sm:$0xff]  ;;  %v3940_v39 = vld [vmem:[#allocation3_spill] sm:$0xff] }
 0x188   : > { %v2334_v17 = vcombine.high %v3936_v33, %v3935_v30  ;;  %v3937_v31 = vld [vmem:[#allocation22_spill] sm:$0xff]  ;;  %v2333_v41 = vcombine.low %v3936_v33, %v3935_v30  ;;  %v2302_v8 = vcombine.low %v3940_v39, %v3939_v36  ;;  %v3941_v40 = vld [vmem:[#allocation12_spill] sm:$0xff]  ;;  %v3942_v59 = vld [vmem:[#allocation11_spill] sm:$0xff] }
 0x189   : > { %2675 = vmatpush3.bf16.msra.mxu0 %v2994_v38  ;;  %v2336_v43 = vcombine.high %v3938_v34, %v3937_v31  ;;  %v2335_v11 = vcombine.low %v3938_v34, %v3937_v31  ;;  %v2322_v20 = vcombine.low %v3942_v59, %v3941_v40  ;;  %v3943_v32 = vld [vmem:[#allocation6_spill] sm:$0xff]  ;;  %v3944_v38 = vld [vmem:[#allocation5_spill] sm:$0xff] }
 0x18a   : > { %2739 = vmatpush3.bf16.msra.mxu1 %v2995_v54  ;;  %2676 = vmatprep.subr.bf16.mxu0 %v2996_v63  ;;  %v2307_v54 = vcombine.low %v3944_v38, %v3943_v32  ;;  %v3945_v63 = vld [vmem:[#allocation14_spill] sm:$0xff] }
 0x18b   : > { %2740 = vmatprep.subr.bf16.mxu1 %v2997_v44  ;;  %v3946_v44 = vld [vmem:[#allocation13_spill] sm:$0xff] }
 0x18d   : > { %2677 = vmatpush3.bf16.msra.mxu0 %v2998_v23  ;;  %v2327_v23 = vcombine.low %v3946_v44, %v3945_v63 }
 0x18e   : > { %2741 = vmatpush3.bf16.msra.mxu1 %v2999_v46  ;;  %2678 = vmatprep.subr.bf16.mxu0 %v3000_v58  ;;  %v3947_v46 = vld [vmem:[#allocation8_spill] sm:$0xff]  ;;  %v3948_v58 = vld [vmem:[#allocation7_spill] sm:$0xff] }
 0x18f   : > { %2742 = vmatprep.subr.bf16.mxu1 %v3001_v35  ;;  %v2312_v35 = vcombine.low %v3948_v58, %v3947_v46 }
 0x191   : > { %2679 = vmatpush3.bf16.msra.mxu0 %v3002_v62  ;;  %v3949_v62 = vld [vmem:[#allocation17_spill] sm:$0xff] }
 0x192   : > { %2743 = vmatpush3.bf16.msra.mxu1 %v3003_v42  ;;  %2680 = vmatprep.subr.bf16.mxu0 %v3004_v51  ;;  %v3950_v42 = vld [vmem:[#allocation16_spill] sm:$0xff] }
 0x193   : > { %2744 = vmatprep.subr.bf16.mxu1 %v3005_v60  ;;  %v2332_v51 = vcombine.low %v3950_v42, %v3949_v62  ;;  %v3951_v60 = vld [vmem:[#allocation10_spill] sm:$0xff] }
 0x195   : > { %2681 = vmatpush3.bf16.msra.mxu0 %v3006_v2  ;;  %v3952_v2 = vld [vmem:[#allocation9_spill] sm:$0xff] }
 0x196   : > { %2745 = vmatpush3.bf16.msra.mxu1 %v3007_v50  ;;  %2682 = vmatprep.subr.bf16.mxu0 %v3008_v48  ;;  %v2317_v50 = vcombine.low %v3952_v2, %v3951_v60  ;;  %v3953_v48 = vld [vmem:[#allocation23_spill] sm:$0xff] }
 0x197   : > { %2746 = vmatprep.subr.bf16.mxu1 %v3009_v45  ;;  %v3954_v45 = vld [vmem:[#allocation20_spill] sm:$0xff] }
 0x199   : > { %2683 = vmatpush3.bf16.msra.mxu0 %v3010_v29  ;;  %v2337_v29 = vcombine.low %v3954_v45, %v3953_v48 }
 0x19a   : > { %2747 = vmatpush3.bf16.msra.mxu1 %v3011_v14  ;;  %2832 = vmatprep.subr.bf16.mxu0 %v3012_v55 }
 0x19b   : > { %2864 = vmatprep.subr.bf16.mxu1 %v3012_v55 }
 0x19c   : > { %1661 = vmatmul.mubr.bf16.vlgmr.msra.gmra.mrb[0].mxu0 %v2298_v37 }
 0x19d   : > { %1758 = vmatmul.mubr.bf16.vlgmr.msra.gmra.mrb[0].mxu1 %v2300_v56  ;;  %2833 = vmatpush3.bf16.msra.mxu0 %v3012_v55 }
 0x19e   : > { %2868 = vmatpush3.bf16.msra.mxu1 %v3012_v55  ;;  %1668 = vmatprep.mubr.bf16.mxu0 %v2304_v26 }
 0x19f   : > { %1765 = vmatprep.mubr.bf16.mxu1 %v2306_v49  ;;  %2834 = vmatprep.subr.bf16.mxu0 %v3013_v0 }
 0x1a0   : > { %2865 = vmatprep.subr.bf16.mxu1 %v3013_v0 }
 0x1a1   : > { %2835 = vmatpush3.bf16.msra.mxu0 %v3013_v0 }
 0x1a2   : > { %2869 = vmatpush3.bf16.msra.mxu1 %v3013_v0  ;;  %2836 = vmatprep.subr.bf16.mxu0 %v3014_v1 }
 0x1a3   : > { %2866 = vmatprep.subr.bf16.mxu1 %v3014_v1 }
 0x1a4   : > { %1669 = vmatmul.mubr.bf16.gmra.mrb[4].mxu0 %v2303_v3 }
 0x1a5   : > { %1766 = vmatmul.mubr.bf16.gmra.mrb[4].mxu1 %v2305_v4  ;;  %1676 = vmatprep.mubr.bf16.mxu0 %v2309_v5 }
 0x1a6   : > { %1773 = vmatprep.mubr.bf16.mxu1 %v2311_v53  ;;  %2837 = vmatpush3.bf16.msra.mxu0 %v3014_v1 }
 0x1a7   : > { %2870 = vmatpush3.bf16.msra.mxu1 %v3014_v1  ;;  %2838 = vmatprep.subr.bf16.mxu0 %v3015_v47 }
 0x1a8   : > { %2867 = vmatprep.subr.bf16.mxu1 %v3015_v47 }
 0x1aa   : > { %2839 = vmatpush3.bf16.msra.mxu0 %v3015_v47 }
 0x1ab   : > { %2871 = vmatpush3.bf16.msra.mxu1 %v3015_v47 }
 0x1ac   : > { %1677 = vmatmul.mubr.bf16.gmra.mrb[8].mxu0 %v2308_v6 }
 0x1ad   : > { %1774 = vmatmul.mubr.bf16.gmra.mrb[8].mxu1 %v2310_v7  ;;  %1684 = vmatprep.mubr.bf16.mxu0 %v2314_v9 }
 0x1ae   : > { %1781 = vmatprep.mubr.bf16.mxu1 %v2316_v10 }
 0x1b4   : > { %1685 = vmatmul.mubr.bf16.gmra.mrb[12].mxu0 %v2313_v57 }
 0x1b5   : > { %1782 = vmatmul.mubr.bf16.gmra.mrb[12].mxu1 %v2315_v12  ;;  %1692 = vmatprep.mubr.bf16.mxu0 %v2319_v13 }
 0x1b6   : > { %1789 = vmatprep.mubr.bf16.mxu1 %v2321_v15 }
 0x1bc   : > { %1693 = vmatmul.mubr.bf16.gmra.mrb[16].mxu0 %v2318_v16 }
 0x1bd   : > { %1790 = vmatmul.mubr.bf16.gmra.mrb[16].mxu1 %v2320_v52  ;;  %1700 = vmatprep.mubr.bf16.mxu0 %v2324_v18 }
 0x1be   : > { %1797 = vmatprep.mubr.bf16.mxu1 %v2326_v19 }
 0x1c4   : > { %1701 = vmatmul.mubr.bf16.gmra.mrb[20].mxu0 %v2323_v21 }
 0x1c5   : > { %1798 = vmatmul.mubr.bf16.gmra.mrb[20].mxu1 %v2325_v22  ;;  %1708 = vmatprep.mubr.bf16.mxu0 %v2329_v24 }
 0x1c6   : > { %1805 = vmatprep.mubr.bf16.mxu1 %v2331_v27 }
 0x1cc   : > { %1709 = vmatmul.mubr.bf16.gmra.mrb[24].mxu0 %v2328_v28 }
 0x1cd   : > { %1806 = vmatmul.mubr.bf16.gmra.mrb[24].mxu1 %v2330_v61  ;;  %1716 = vmatprep.mubr.bf16.mxu0 %v2334_v17 }
 0x1ce   : > { %1813 = vmatprep.mubr.bf16.mxu1 %v2336_v43 }
 0x1d4   : > { %1717 = vmatmul.mubr.bf16.gmra.mrb[28].mxu0 %v2333_v41 }
 0x1d5   : > { %1814 = vmatmul.mubr.bf16.gmra.mrb[28].mxu1 %v2335_v11  ;;  %2840 = vmatprep.mubr.msk.bf16.mxu0 %vm1603_vm1, %v2302_v8 }
 0x1d6   : > { %2848 = vmatprep.mubr.msk.bf16.mxu1 %vm1603_vm1, %v2322_v20 }
 0x1dc   : > { %2841 = vmatmul.mubr.msk.bf16.vlgmr.msra.gmra.mrb[32].mxu0 %vm1603_vm1, %v2307_v54 }
 0x1dd   : > { %2849 = vmatmul.mubr.msk.bf16.vlgmr.msra.gmra.mrb[32].mxu1 %vm1603_vm1, %v2327_v23  ;;  %2844 = vmatprep.mubr.msk.bf16.mxu0 %vm1603_vm1, %v2312_v35 }
 0x1de   : > { %2852 = vmatprep.mubr.msk.bf16.mxu1 %vm1603_vm1, %v2332_v51 }
 0x1e4   : > { %2845 = vmatmul.mubr.msk.bf16.gmra.mrb[36].mxu0 %vm1603_vm1, %v2317_v50 }
 0x1e5   : > { %2853 = vmatmul.mubr.msk.bf16.gmra.mrb[36].mxu1 %vm1603_vm1, %v2337_v29 }
 0x26f   : > { %v2684_v14 = vpop.f32.mrb[0].mxu0 }
 0x270   : > { %v2748_v37 = vpop.f32.mrb[0].mxu1  ;;  %v2685_v56 = vpop.f32.mrb[1].mxu0 }
 0x271   : > { %v2686_v55 = vadd.f32 %v2685_v56, %v2684_v14  ;;  %v2749_v26 = vpop.f32.mrb[1].mxu1  ;;  %v2687_v49 = vpop.f32.mrb[2].mxu0 }
 0x272   : > { %v2750_v0 = vadd.f32 %v2749_v26, %v2748_v37  ;;  %v2751_v1 = vpop.f32.mrb[2].mxu1  ;;  %v2688_v3 = vpop.f32.mrb[3].mxu0 }
 0x273   : > { %v2689_v4 = vadd.f32 %v2688_v3, %v2687_v49  ;;  %v2752_v5 = vpop.f32.mrb[3].mxu1 }
 0x274   : > { %v2753_v53 = vadd.f32 %v2752_v5, %v2751_v1  ;;  %v3814_v47 = vadd.f32 %v2750_v0, %v2686_v55 }
 0x276   : > { %v3816_v6 = vadd.f32 %v2753_v53, %v2689_v4 }
 0x277   : > { %v2690_v7 = vpop.f32.mrb[4].mxu0 }
 0x278   : > { %v2754_v9 = vpop.f32.mrb[4].mxu1  ;;  %v2691_v10 = vpop.f32.mrb[5].mxu0 }
 0x279   : > { %v2692_v57 = vadd.f32 %v2691_v10, %v2690_v7  ;;  %v2755_v12 = vpop.f32.mrb[5].mxu1  ;;  %v2693_v13 = vpop.f32.mrb[6].mxu0 }
 0x27a   : > { %v2756_v15 = vadd.f32 %v2755_v12, %v2754_v9  ;;  %v2757_v16 = vpop.f32.mrb[6].mxu1  ;;  %v2694_v52 = vpop.f32.mrb[7].mxu0 }
 0x27b   : > { %v2695_v18 = vadd.f32 %v2694_v52, %v2693_v13  ;;  %v2758_v19 = vpop.f32.mrb[7].mxu1 }
 0x27c   : > { %v2759_v21 = vadd.f32 %v2758_v19, %v2757_v16  ;;  %v3818_v22 = vadd.f32 %v2756_v15, %v2692_v57 }
 0x27e   : > { %v3820_v24 = vadd.f32 %v2759_v21, %v2695_v18 }
 0x27f   : > { %v2696_v25 = vpop.f32.mrb[8].mxu0 }
 0x280   : > { %v2760_v27 = vpop.f32.mrb[8].mxu1  ;;  %v2697_v28 = vpop.f32.mrb[9].mxu0 }
 0x281   : > { %v2698_v61 = vadd.f32 %v2697_v28, %v2696_v25  ;;  %v2761_v30 = vpop.f32.mrb[9].mxu1  ;;  %v2699_v33 = vpop.f32.mrb[10].mxu0 }
 0x282   : > { %v2762_v17 = vadd.f32 %v2761_v30, %v2760_v27  ;;  %v2763_v31 = vpop.f32.mrb[10].mxu1  ;;  %v2700_v34 = vpop.f32.mrb[11].mxu0 }
 0x283   : > { %v2701_v43 = vadd.f32 %v2700_v34, %v2699_v33  ;;  %v2764_v41 = vpop.f32.mrb[11].mxu1 }
 0x284   : > { %v2765_v11 = vadd.f32 %v2764_v41, %v2763_v31  ;;  %v3822_v36 = vadd.f32 %v2762_v17, %v2698_v61 }
 0x286   : > { %v3824_v39 = vadd.f32 %v2765_v11, %v2701_v43 }
 0x287   : > { %v2702_v8 = vpop.f32.mrb[12].mxu0 }
 0x288   : > { %v2766_v40 = vpop.f32.mrb[12].mxu1  ;;  %v2703_v59 = vpop.f32.mrb[13].mxu0 }
 0x289   : > { %v2704_v20 = vadd.f32 %v2703_v59, %v2702_v8  ;;  %v2767_v32 = vpop.f32.mrb[13].mxu1  ;;  %v2705_v38 = vpop.f32.mrb[14].mxu0 }
 0x28a   : > { %v2768_v54 = vadd.f32 %v2767_v32, %v2766_v40  ;;  %v2769_v63 = vpop.f32.mrb[14].mxu1  ;;  %v2706_v44 = vpop.f32.mrb[15].mxu0 }
 0x28b   : > { %v2707_v23 = vadd.f32 %v2706_v44, %v2705_v38  ;;  %v2770_v46 = vpop.f32.mrb[15].mxu1 }
 0x28c   : > { %v2771_v58 = vadd.f32 %v2770_v46, %v2769_v63  ;;  %v3826_v35 = vadd.f32 %v2768_v54, %v2704_v20 }
 0x28e   : > { %v3828_v62 = vadd.f32 %v2771_v58, %v2707_v23 }
 0x28f   : > { %v2708_v42 = vpop.f32.mrb[16].mxu0 }
 0x290   : > { %v2772_v51 = vpop.f32.mrb[16].mxu1  ;;  %v2709_v60 = vpop.f32.mrb[17].mxu0 }
 0x291   : > { %v2710_v2 = vadd.f32 %v2709_v60, %v2708_v42  ;;  %v2773_v50 = vpop.f32.mrb[17].mxu1  ;;  %v2711_v48 = vpop.f32.mrb[18].mxu0 }
 0x292   : > { %v2774_v45 = vadd.f32 %v2773_v50, %v2772_v51  ;;  %v2775_v29 = vpop.f32.mrb[18].mxu1  ;;  %v2712_v14 = vpop.f32.mrb[19].mxu0 }
 0x293   : > { %v2713_v37 = vadd.f32 %v2712_v14, %v2711_v48  ;;  %v2776_v56 = vpop.f32.mrb[19].mxu1 }
 0x294   : > { %v2777_v55 = vadd.f32 %v2776_v56, %v2775_v29  ;;  %v1792_v26 = vadd.f32 %v2774_v45, %v2710_v2 }
 0x296   : > { %v1795_v49 = vadd.f32 %v2777_v55, %v2713_v37 }
 0x297   : > { %v2714_v0 = vpop.f32.mrb[20].mxu0 }
 0x298   : > { %v2778_v1 = vpop.f32.mrb[20].mxu1  ;;  %v2715_v3 = vpop.f32.mrb[21].mxu0 }
 0x299   : > { %v2716_v4 = vadd.f32 %v2715_v3, %v2714_v0  ;;  %v2779_v5 = vpop.f32.mrb[21].mxu1  ;;  %v2717_v53 = vpop.f32.mrb[22].mxu0 }
 0x29a   : > { %v2780_v7 = vadd.f32 %v2779_v5, %v2778_v1  ;;  %v2781_v9 = vpop.f32.mrb[22].mxu1  ;;  %v2718_v10 = vpop.f32.mrb[23].mxu0 }
 0x29b   : > { %v2719_v57 = vadd.f32 %v2718_v10, %v2717_v53  ;;  %v2782_v12 = vpop.f32.mrb[23].mxu1 }
 0x29c   : > { %v2783_v13 = vadd.f32 %v2782_v12, %v2781_v9  ;;  %v1800_v15 = vadd.f32 %v2780_v7, %v2716_v4 }
 0x29e   : > { %v1803_v16 = vadd.f32 %v2783_v13, %v2719_v57 }
 0x29f   : > { %v2720_v52 = vpop.f32.mrb[24].mxu0 }
 0x2a0   : > { %v2784_v18 = vpop.f32.mrb[24].mxu1  ;;  %v2721_v19 = vpop.f32.mrb[25].mxu0 }
 0x2a1   : > { %v2722_v21 = vadd.f32 %v2721_v19, %v2720_v52  ;;  %v2785_v25 = vpop.f32.mrb[25].mxu1  ;;  %v2723_v27 = vpop.f32.mrb[26].mxu0 }
 0x2a2   : > { %v2786_v28 = vadd.f32 %v2785_v25, %v2784_v18  ;;  %v2787_v61 = vpop.f32.mrb[26].mxu1  ;;  %v2724_v30 = vpop.f32.mrb[27].mxu0 }
 0x2a3   : > { %v2725_v33 = vadd.f32 %v2724_v30, %v2723_v27  ;;  %v2788_v17 = vpop.f32.mrb[27].mxu1 }
 0x2a4   : > { %v2789_v31 = vadd.f32 %v2788_v17, %v2787_v61  ;;  %v1808_v34 = vadd.f32 %v2786_v28, %v2722_v21 }
 0x2a6   : > { %v1811_v43 = vadd.f32 %v2789_v31, %v2725_v33 }
 0x2a7   : > { %v2726_v41 = vpop.f32.mrb[28].mxu0 }
 0x2a8   : > { %v2790_v11 = vpop.f32.mrb[28].mxu1  ;;  %v2727_v8 = vpop.f32.mrb[29].mxu0 }
 0x2a9   : > { %v2728_v40 = vadd.f32 %v2727_v8, %v2726_v41  ;;  %v2791_v59 = vpop.f32.mrb[29].mxu1  ;;  %v2729_v20 = vpop.f32.mrb[30].mxu0 }
 0x2aa   : > { %v2792_v32 = vadd.f32 %v2791_v59, %v2790_v11  ;;  %v2793_v38 = vpop.f32.mrb[30].mxu1  ;;  %v2730_v54 = vpop.f32.mrb[31].mxu0 }
 0x2ab   : > { %v2731_v63 = vadd.f32 %v2730_v54, %v2729_v20  ;;  %v2794_v44 = vpop.f32.mrb[31].mxu1 }
 0x2ac   : > { %v2795_v23 = vadd.f32 %v2794_v44, %v2793_v38  ;;  %v1816_v46 = vadd.f32 %v2792_v32, %v2728_v40 }
 0x2ae   : > { %v1819_v58 = vadd.f32 %v2795_v23, %v2731_v63 }
 0x2af   : > { %v2842_v42 = vpop.f32.mrb[32].mxu0 }
 0x2b0   : > { %v1865_v51 = vadd.f32 %v2842_v42, %v3818_v22  ;;  %v2850_v60 = vpop.f32.mrb[32].mxu1  ;;  %v1856_v2 = vpop.f32.mrb[33].mxu0 }
 0x2b1   : > { %v1897_v50 = vadd.f32 %v2850_v60, %v1800_v15  ;;  %v1857_v48 = vadd.f32 %v1856_v2, %v3814_v47  ;;  %v1888_v45 = vpop.f32.mrb[33].mxu1  ;;  %v2843_v29 = vpop.f32.mrb[34].mxu0 }
 0x2b2   : > { %3016 = vtanh.f32 %v1865_v51  ;;  %v1889_v14 = vadd.f32 %v1888_v45, %v1792_v26  ;;  %v1868_v37 = vadd.f32 %v2843_v29, %v3820_v24  ;;  %v2851_v56 = vpop.f32.mrb[34].mxu1  ;;  %v1859_v55 = vpop.f32.mrb[35].mxu0 }
 0x2b3   : > { %3018 = vtanh.f32 %v1897_v50  ;;  %v1900_v0 = vadd.f32 %v2851_v56, %v1803_v16  ;;  %v1860_v1 = vadd.f32 %v1859_v55, %v3816_v6  ;;  %v1891_v3 = vpop.f32.mrb[35].mxu1 }
 0x2b4   : > { %3020 = vtanh.f32 %v1857_v48  ;;  %v1892_v22 = vadd.f32 %v1891_v3, %v1795_v49 }
 0x2b5   : > { %3022 = vtanh.f32 %v1889_v14 }
 0x2b6   : > { %3024 = vtanh.f32 %v1868_v37 }
 0x2b7   : > { %3026 = vtanh.f32 %v1900_v0  ;;  %v2846_v4 = vpop.f32.mrb[36].mxu0 }
 0x2b8   : > { %3028 = vtanh.f32 %v1860_v1  ;;  %v1881_v47 = vadd.f32 %v2846_v4, %v3826_v35  ;;  %v2854_v5 = vpop.f32.mrb[36].mxu1  ;;  %v1872_v26 = vpop.f32.mrb[37].mxu0 }
 0x2b9   : > { %3030 = vtanh.f32 %v1892_v22  ;;  %v1913_v24 = vadd.f32 %v2854_v5, %v1816_v46  ;;  %v1873_v53 = vadd.f32 %v1872_v26, %v3822_v36  ;;  %v1904_v7 = vpop.f32.mrb[37].mxu1  ;;  %v2847_v9 = vpop.f32.mrb[38].mxu0 }
 0x2ba   : > { %3032 = vtanh.f32 %v1881_v47  ;;  %v1905_v6 = vadd.f32 %v1904_v7, %v1808_v34  ;;  %v1884_v10 = vadd.f32 %v2847_v9, %v3828_v62  ;;  %v2855_v49 = vpop.f32.mrb[38].mxu1  ;;  %v1875_v57 = vpop.f32.mrb[39].mxu0 }
 0x2bb   : > { %3034 = vtanh.f32 %v1913_v24  ;;  %v1916_v12 = vadd.f32 %v2855_v49, %v1819_v58  ;;  %v1876_v13 = vadd.f32 %v1875_v57, %v3824_v39  ;;  %v1907_v15 = vpop.f32.mrb[39].mxu1 }
 0x2bc   : > { %v3017_v35 = vpop.eup %3016  ;;  %3036 = vtanh.f32 %v1873_v53  ;;  %v1908_v16 = vadd.f32 %v1907_v15, %v1811_v43 }
 0x2bd   : > { %v3019_v52 = vpop.eup %3018  ;;  %3038 = vtanh.f32 %v1905_v6 }
 0x2be   : > { %v3021_v36 = vpop.eup %3020  ;;  %3040 = vtanh.f32 %v1884_v10 }
 0x2bf   : > { %v3023_v18 = vpop.eup %3022  ;;  %3042 = vtanh.f32 %v1916_v12 }
 0x2c0   : > { %v3025_v62 = vpop.eup %3024  ;;  %3044 = vtanh.f32 %v1876_v13 }
 0x2c1   : > { %v3027_v19 = vpop.eup %3026  ;;  %v2482_v21 = vpack.c.bf16 %v3025_v62, %v3017_v35  ;;  %3046 = vtanh.f32 %v1908_v16 }
 0x2c2   : > { %v3029_v39 = vpop.eup %3028  ;;  %v2502_v25 = vpack.c.bf16 %v3027_v19, %v3019_v52 }
 0x2c3   : > { %v3031_v27 = vpop.eup %3030  ;;  %2521 = vst [vmem:[%s3386_s14 + $0x8] sm:$0xff] %v2482_v21   ;;  %v2477_v28 = vpack.c.bf16 %v3029_v39, %v3021_v36 }
 0x2c4   : > { %v3033_v61 = vpop.eup %3032  ;;  %2525 = vst [vmem:[%s3386_s14 + $0x28] sm:$0xff] %v2502_v25   ;;  %v2497_v30 = vpack.c.bf16 %v3031_v27, %v3023_v18 }
 0x2c5   : > { %v3035_v33 = vpop.eup %3034  ;;  %2478 = vst [vmem:[%s3386_s14] sm:$0xff] %v2477_v28  }
 0x2c6   : > { %v3037_v17 = vpop.eup %3036  ;;  %2524 = vst [vmem:[%s3386_s14 + $0x20] sm:$0xff] %v2497_v30  }
 0x2c7   : > { %v3039_v31 = vpop.eup %3038 }
 0x2c8   : > { %v3041_v34 = vpop.eup %3040 }
 0x2c9   : > { %v3043_v43 = vpop.eup %3042  ;;  %v2492_v41 = vpack.c.bf16 %v3041_v34, %v3033_v61 }
 0x2ca   : > { %v3045_v11 = vpop.eup %3044  ;;  %v2512_v8 = vpack.c.bf16 %v3043_v43, %v3035_v33 }
 0x2cb   : > { %v3047_v40 = vpop.eup %3046  ;;  %2523 = vst [vmem:[%s3386_s14 + $0x18] sm:$0xff] %v2492_v41   ;;  %v2487_v59 = vpack.c.bf16 %v3045_v11, %v3037_v17 }
 0x2cc   : > { %2527 = vst [vmem:[%s3386_s14 + $0x38] sm:$0xff] %v2512_v8   ;;  %v2507_v20 = vpack.c.bf16 %v3047_v40, %v3039_v31 }
 0x2cd   : > { %2522 = vst [vmem:[%s3386_s14 + $0x10] sm:$0xff] %v2487_v59  }
 0x2ce   : > { %2526 = vst [vmem:[%s3386_s14 + $0x30] sm:$0xff] %v2507_v20  }
 0x2cf PF: > { %2021 = sbr.rel (!%p3132_p3) target bundleno = 731 (0x2db), region = 40  ;;  %s2399_s27 = sshll.u32 (%p3132_p3), %s3078_s11, 2  ;;  %v2042_v32 = vld [vmem:[%s3386_s14] sm:$0xf] (%p3132_p3)  ;;  %v2044_v38 = vld [vmem:[%s3386_s14 + $0x4] sm:$0xf] (%p3132_p3) }
 0x2d0   : > { %s2026_s24 = scalar_lea.vmem (%p3132_p3), %s3885_s2, %s2399_s27  ;;  %v2046_v54 = vld [vmem:[%s3386_s14 + $0x8] sm:$0xf] (%p3132_p3)  ;;  %v2048_v63 = vld [vmem:[%s3386_s14 + $0xc] sm:$0xf] (%p3132_p3)  ;;  %v2058_v42 = vld [vmem:[%s3386_s14 + $0x20] sm:$0xf] (%p3132_p3) }
 0x2d1   : > { %2043 = vst [vmem:[%s2026_s24] sm:$0xf] (%p3132_p3), %v2042_v32  ;;  %2045 = vst [vmem:[%s2026_s24 + $0x8] sm:$0xf] (%p3132_p3), %v2044_v38  ;;  %v2060_v51 = vld [vmem:[%s3386_s14 + $0x24] sm:$0xf] (%p3132_p3) }
 0x2d2   : > { %2047 = vst [vmem:[%s2026_s24 + $0x10] sm:$0xf] (%p3132_p3), %v2046_v54  ;;  %2049 = vst [vmem:[%s2026_s24 + $0x18] sm:$0xf] (%p3132_p3), %v2048_v63  ;;  %v2054_v46 = vld [vmem:[%s3386_s14 + $0x18] sm:$0xf] (%p3132_p3) }
 0x2d3   : > { %v2056_v58 = vld [vmem:[%s3386_s14 + $0x1c] sm:$0xf] (%p3132_p3)  ;;  %2055 = vst [vmem:[%s2026_s24 + $0x30] sm:$0xf] (%p3132_p3), %v2054_v46  ;;  %v2062_v60 = vld [vmem:[%s3386_s14 + $0x28] sm:$0xf] (%p3132_p3) }
 0x2d4   : > { %v2050_v44 = vld [vmem:[%s3386_s14 + $0x10] sm:$0xf] (%p3132_p3)  ;;  %v2052_v23 = vld [vmem:[%s3386_s14 + $0x14] sm:$0xf] (%p3132_p3)  ;;  %2057 = vst [vmem:[%s2026_s24 + $0x38] sm:$0xf] (%p3132_p3), %v2056_v58 }
 0x2d5   : > { %2051 = vst [vmem:[%s2026_s24 + $0x20] sm:$0xf] (%p3132_p3), %v2050_v44  ;;  %2053 = vst [vmem:[%s2026_s24 + $0x28] sm:$0xf] (%p3132_p3), %v2052_v23  ;;  %v2064_v2 = vld [vmem:[%s3386_s14 + $0x2c] sm:$0xf] (%p3132_p3) }
 0x2d6   : > { %2059 = vst [vmem:[%s2026_s24 + $0x40] sm:$0xf] %v2058_v42  ;;  %2061 = vst [vmem:[%s2026_s24 + $0x48] sm:$0xf] %v2060_v51  ;;  %v2066_v50 = vld [vmem:[%s3386_s14 + $0x30] sm:$0xf] }
 0x2d7   : > { %2063 = vst [vmem:[%s2026_s24 + $0x50] sm:$0xf] %v2062_v60  ;;  %v2068_v48 = vld [vmem:[%s3386_s14 + $0x34] sm:$0xf]  ;;  %2065 = vst [vmem:[%s2026_s24 + $0x58] sm:$0xf] %v2064_v2 }
 0x2d8   : > { %2067 = vst [vmem:[%s2026_s24 + $0x60] sm:$0xf] %v2066_v50  ;;  %2069 = vst [vmem:[%s2026_s24 + $0x68] sm:$0xf] %v2068_v48  ;;  %v2070_v45 = vld [vmem:[%s3386_s14 + $0x38] sm:$0xf] }
 0x2d9   : > { %v2072_v29 = vld [vmem:[%s3386_s14 + $0x3c] sm:$0xf]  ;;  %2071 = vst [vmem:[%s2026_s24 + $0x70] sm:$0xf] %v2070_v45 }
 0x2da   : > { %2073 = vst [vmem:[%s2026_s24 + $0x78] sm:$0xf] %v2072_v29 }
 0x2db PF: > { %s12_s13 = sadd.s32 1, %s3086_s13   ;;  %s3955_s9 = smov %s3074_s10 }
 0x2dc   : > { %p9_p10 = scmp.ge.s32.totalorder %s12_s13, 4   ;;  %s3956_s10 = smov %s3141_s19 }
 0x2dd   : > { %s3957_s11 = smov %s3082_s12  ;;  %s3958_s12 = smov %s3960_s15 }
 0x2de   :  { %11 = sbr.rel (!%p9_p10) target bundleno = 3 (0x3), region = 107 }

</bundles_post_ra>
